<compile_context>
chip_gen: v5e
topology: v5e:2x2
jax: 0.10.0
libtpu: 0.0.40
codegen_flags: <defaults>
</compile_context>

<pallas_src>
from functools import partial

import jax
import jax.numpy as jnp
from jax import lax
from jax.experimental import pallas as pl
from jax.experimental.pallas import tpu as pltpu


C_IN, C_CONV, C_FC1, LANES = 128, 512, 1024, 128


def _round_up(x, m):
    return (x + m - 1) // m * m


# ---------------------------------------------------------------------------
# Kernel
# ---------------------------------------------------------------------------
def classifier_kernel(x_ref, wc_ref, b1_ref, w1_ref, b2_ref, w2_ref, bfc2_ref,
                      out_ref, vmax_ref, xt_ref, *, chunks):
    """One (batch_tile, hw_tile) grid step.

    x_ref    : (tb, 128, thw) f32   channels-first pixel slab (raw NCHW reshape)
    wc_ref   : (128, 512)     bf16  1x1-conv weight with BN1 scale folded in
    b1_ref   : (1, 512)       f32   conv bias + BN1 folded bias (applied post-max)
    w1_ref   : (512, 1024)    bf16  fc1 weight with BN2 scale folded in
    b2_ref   : (1, 1024)      f32   fc1 bias + BN2 folded bias
    w2_ref   : (1024, 128)    bf16  fc2 weight, lane-padded to 128 outputs
    bfc2_ref : (1, 128)       f32   fc2 bias, lane-padded
    out_ref  : (tb, 128)      f32   resident across the hw grid axis
    vmax_ref : (tb, 512)      f32   running spatial max of the *raw* conv output
    xt_ref   : (nslots, tb, rowmax, 128) bf16  transposed-chunk staging buffers
    chunks   : static tuple of (start, width) spatial column chunks (may overlap)
    """
    hw = pl.program_id(1)
    n_hw = pl.num_programs(1)
    tb = x_ref.shape[0]
    nslots = xt_ref.shape[0]

    @pl.when(hw == 0)
    def _init():
        vmax_ref[...] = jnp.full(vmax_ref.shape, -jnp.inf, vmax_ref.dtype)

    # Fold each chunk of spatial columns into the running channel-wise max.
    # No bias / ReLU / masking in this hot loop (all deferred or eliminated).
    for ci, (s, w) in enumerate(chunks):
        slot = ci % nslots
        wr = w if w % 8 == 0 else _round_up(w, 8)

        def _transpose_row(b, carry, _slot=slot, _s=s, _w=w, _wr=wr):
            # (128, w) f32 channels-first -> (w, 128) bf16 channels-last
            xv = jnp.transpose(x_ref[b, :, _s:_s + _w]).astype(xt_ref.dtype)
            xt_ref[_slot, b, :_w, :] = xv
            if _wr > _w:  # only for tiny HW (< 8): pad rows with duplicates
                xt_ref[_slot, b, _w:_wr, :] = jnp.broadcast_to(
                    xv[:1, :], (_wr - _w, xv.shape[1]))
            return carry

        lax.fori_loop(0, tb, _transpose_row, 0, unroll=tb <= 8)

        xt = xt_ref[slot, :, :wr, :]                        # (tb, wr, 128) bf16
        y = jnp.dot(xt.reshape(tb * wr, C_IN), wc_ref[...],
                    preferred_element_type=jnp.float32)     # (tb*wr, 512) f32
        m = jnp.max(y.reshape(tb, wr, C_CONV), axis=1)      # (tb, 512)
        vmax_ref[...] = jnp.maximum(vmax_ref[...], m)

    # fc stage once, after the last spatial tile.  Conv-bias + BN1-bias + ReLU
    # are applied here: relu(max(y) + b1) == max(relu(y + b1)).
    @pl.when(hw == n_hw - 1)
    def _finish():
        v = jnp.maximum(vmax_ref[...] + b1_ref[...], 0.0)    # deferred bias + ReLU
        h = jnp.dot(v.astype(w1_ref.dtype), w1_ref[...],
                    preferred_element_type=jnp.float32)
        h = jnp.maximum(h + b2_ref[...], 0.0)                # folded BN2 bias + ReLU
        o = jnp.dot(h.astype(w2_ref.dtype), w2_ref[...],
                    preferred_element_type=jnp.float32) + bfc2_ref[...]
        out_ref[...] = o.astype(out_ref.dtype)


# ---------------------------------------------------------------------------
# Parameter construction (BN eval-mode folding, bf16 weights, lane padding)
# ---------------------------------------------------------------------------
def make_params(key, out_s=16, eps=1e-5):
    ks = jax.random.split(key, 14)

    # conv 1x1: PyTorch weight (512,128,1,1) -> matmul form (128,512)
    wc = jax.random.normal(ks[0], (C_IN, C_CONV), jnp.float32) / jnp.sqrt(C_IN)
    bc = jax.random.normal(ks[1], (C_CONV,), jnp.float32) * 0.05
    # bn1 (eval-mode running stats)
    g1 = jax.random.uniform(ks[2], (C_CONV,), jnp.float32, 0.5, 1.5)
    be1 = jax.random.normal(ks[3], (C_CONV,), jnp.float32) * 0.1
    rm1 = jax.random.normal(ks[4], (C_CONV,), jnp.float32) * 0.1
    rv1 = jax.random.uniform(ks[5], (C_CONV,), jnp.float32, 0.5, 1.5)

    # fc1: PyTorch weight (1024,512) -> matmul form (512,1024)
    w1 = jax.random.normal(ks[6], (C_CONV, C_FC1), jnp.float32) / jnp.sqrt(C_CONV)
    bf1 = jax.random.normal(ks[7], (C_FC1,), jnp.float32) * 0.05
    # bn2 (eval-mode running stats)
    g2 = jax.random.uniform(ks[8], (C_FC1,), jnp.float32, 0.5, 1.5)
    be2 = jax.random.normal(ks[9], (C_FC1,), jnp.float32) * 0.1
    rm2 = jax.random.normal(ks[10], (C_FC1,), jnp.float32) * 0.1
    rv2 = jax.random.uniform(ks[11], (C_FC1,), jnp.float32, 0.5, 1.5)

    # fc2: PyTorch weight (out_s,1024) -> matmul form (1024,out_s)
    w2 = jax.random.normal(ks[12], (C_FC1, out_s), jnp.float32) / jnp.sqrt(C_FC1)
    bf2 = jax.random.normal(ks[13], (out_s,), jnp.float32) * 0.05

    # fold BN (inference): scale into the weight matrices, keep only bias.
    s1 = g1 / jnp.sqrt(rv1 + eps)
    b1 = be1 + (bc - rm1) * s1
    s2 = g2 / jnp.sqrt(rv2 + eps)
    b2 = be2 + (bf1 - rm2) * s2

    # lane-pad fc2 output to a multiple of 128 (lane-dense stores in kernel)
    out_pad = max(LANES, _round_up(out_s, LANES))
    w2p = jnp.zeros((C_FC1, out_pad), jnp.float32).at[:, :out_s].set(w2)
    bf2p = jnp.zeros((out_pad,), jnp.float32).at[:out_s].set(bf2)

    return dict(
        wc=(wc * s1[None, :]).astype(jnp.bfloat16),
        b1=b1.reshape(1, C_CONV),
        w1=(w1 * s2[None, :]).astype(jnp.bfloat16),
        b2=b2.reshape(1, C_FC1),
        w2=w2p.astype(jnp.bfloat16),
        bfc2=bf2p.reshape(1, out_pad),
        out_s=out_s,
        out_pad=out_pad,
    )


# ---------------------------------------------------------------------------
# Tiling helpers
# ---------------------------------------------------------------------------
def _choose_tiles(B, HW, tb=None, thw=None):
    # batch tile: prefer a divisor of B (no padding); give the megacore (v7x)
    # at least 2 batch tiles once B >= 16.
    if tb is None:
        for cand in (32, 16, 8):
            if B % cand == 0 and B // cand >= 2:
                tb = cand
                break
        else:
            tb = B if B <= 16 else 8
    if tb >= B:
        tb, B_pad = B, B                       # single full-dim batch block
    elif B % tb == 0:
        B_pad = B
    else:
        tb = _round_up(tb, 8)
        B_pad = _round_up(B, tb)

    # spatial tile: single full-HW block when it fits comfortably, otherwise
    # 128-aligned tiles (HW then edge-padded in the wrapper).
    X_TILE_CAP = 4 << 20                        # f32 bytes per x block
    if thw is None:
        if tb * C_IN * HW * 4 <= X_TILE_CAP:
            thw = HW
        else:
            thw = max(128, min(1024, (X_TILE_CAP // (tb * C_IN * 4)) // 128 * 128))
    if thw >= HW:
        thw, HW_pad = HW, HW
    else:
        thw = max(128, thw // 128 * 128)
        HW_pad = _round_up(HW, thw)
    return tb, thw, B_pad, HW_pad


def _chunk_plan(thw, tb):
    """Static (start, width) chunks covering [0, thw); widths are multiples of 8
    (overlaps are fine for a max), bounding the f32 conv intermediate."""
    cw0 = 128 if tb <= 16 else 64
    if thw <= cw0:
        if thw % 8 == 0 or thw < 8:
            return ((0, thw),)
        w_main = (thw // 8) * 8
        return ((0, w_main), (thw - 8, 8))
    k = -(-thw // cw0)                                     # number of chunks
    cw = min(cw0, _round_up(-(-thw // k), 8))              # near-equal widths
    starts = sorted(set([i * cw for i in range(k - 1)] + [thw - cw]))
    return tuple((s, cw) for s in starts)


def _vmem_limit_bytes(tb, thw, rowmax, nslots, out_pad):
    bf16, f32 = 2, 4
    weights = (C_IN * C_CONV + C_CONV * C_FC1 + C_FC1 * out_pad) * bf16 \
        + (C_CONV + C_FC1 + out_pad) * f32
    x_tile = tb * C_IN * thw * f32
    out_tile = tb * out_pad * f32
    y_chunk = tb * rowmax * C_CONV * f32          # per-chunk conv intermediate
    xt = nslots * tb * rowmax * C_IN * bf16
    vmax = tb * C_CONV * f32
    need = 2 * (weights + x_tile + out_tile) + y_chunk + xt + vmax
    need = int(1.6 * need) + (8 << 20)            # compiler-temporary headroom
    try:
        cap = pltpu.get_tpu_info().vmem_capacity_bytes
    except Exception:
        cap = 64 << 20                            # v7x-safe fallback
    return max(16 << 20, min(need, int(cap) * 3 // 4))


# ---------------------------------------------------------------------------
# Wrapper
# ---------------------------------------------------------------------------
def classifier_forward(x_nchw, params, *, tb=None, thw=None):
    """x_nchw: (B, 128, H, W) float32, H == W (matches F.max_pool2d(v, v.size(2)))."""
    B, C, H, W = x_nchw.shape
    assert C == C_IN and H == W
    HW = H * W
    out_s, out_pad = params["out_s"], params["out_pad"]

    tb, thw, B_pad, HW_pad = _choose_tiles(B, HW, tb=tb, thw=thw)
    nb, nhw = B_pad // tb, HW_pad // thw
    chunks = _chunk_plan(thw, tb)
    rowmax = max((w if w % 8 == 0 else _round_up(w, 8)) for _, w in chunks)
    nslots = 2 if len(chunks) > 1 else 1

    # Free reshape: NCHW -> (B, C, HW).  No transpose / dtype pass in the
    # wrapper -- the channels-last swizzle and bf16 cast happen in-kernel.
    x = x_nchw.reshape(B, C, HW)
    if B_pad != B:                               # rare: zero rows, sliced off below
        x = jnp.pad(x, ((0, B_pad - B), (0, 0), (0, 0)))
    if HW_pad != HW:                             # rare: duplicate pixels, max-neutral
        x = jnp.pad(x, ((0, 0), (0, 0), (0, HW_pad - HW)), mode="edge")

    kernel = partial(classifier_kernel, chunks=chunks)

    grid_spec = pltpu.PrefetchScalarGridSpec(
        num_scalar_prefetch=0,
        grid=(nb, nhw),                                    # reduction (hw) axis last
        in_specs=[
            pl.BlockSpec((tb, C, thw), lambda b, hw: (b, 0, hw)),      # x slab
            pl.BlockSpec((C, C_CONV), lambda b, hw: (0, 0)),           # wc (BN folded)
            pl.BlockSpec((1, C_CONV), lambda b, hw: (0, 0)),           # b1
            pl.BlockSpec((C_CONV, C_FC1), lambda b, hw: (0, 0)),       # w1 (BN folded)
            pl.BlockSpec((1, C_FC1), lambda b, hw: (0, 0)),            # b2
            pl.BlockSpec((C_FC1, out_pad), lambda b, hw: (0, 0)),      # w2 (lane-padded)
            pl.BlockSpec((1, out_pad), lambda b, hw: (0, 0)),          # bfc2
        ],
        out_specs=pl.BlockSpec((tb, out_pad), lambda b, hw: (b, 0)),   # resident over hw
        scratch_shapes=[
            pltpu.VMEM((tb, C_CONV), jnp.float32),                     # running max
            pltpu.VMEM((nslots, tb, rowmax, C_IN), jnp.bfloat16),      # transposed chunks
        ],
    )

    out = pl.pallas_call(
        kernel,
        out_shape=jax.ShapeDtypeStruct((B_pad, out_pad), jnp.float32),
        grid_spec=grid_spec,
        compiler_params=pltpu.CompilerParams(
            dimension_semantics=("parallel", "arbitrary"),
            vmem_limit_bytes=_vmem_limit_bytes(tb, thw, rowmax, nslots, out_pad)),
    )(x, params["wc"], params["b1"], params["w1"], params["b2"],
      params["w2"], params["bfc2"])

    return out[:B, :out_s]


# ---------------------------------------------------------------------------
# Pure-JAX reference (PyTorch op order: per-pixel bias+ReLU, then spatial max)
# ---------------------------------------------------------------------------
def classifier_reference(x_nchw, params):
    B, C, H, W = x_nchw.shape
    x_rows = jnp.transpose(x_nchw, (0, 2, 3, 1)).reshape(B, H * W, C).astype(jnp.bfloat16)
    y = jnp.einsum("bnc,cd->bnd", x_rows, params["wc"],
                   preferred_element_type=jnp.float32)
    y = jnp.maximum(y + params["b1"], 0.0)
    v = jnp.max(y, axis=1)
    h = jnp.dot(v.astype(jnp.bfloat16), params["w1"],
                preferred_element_type=jnp.float32)
    h = jnp.maximum(h + params["b2"], 0.0)
    o = jnp.dot(h.astype(jnp.bfloat16), params["w2"],
                preferred_element_type=jnp.float32) + params["bfc2"]
    return o[:, :params["out_s"]]


if __name__ == "__main__":
    key = jax.random.PRNGKey(0)
    k_x1, k_x2, k_x3, k_p = jax.random.split(key, 4)

    out_s = 16
    params = make_params(k_p, out_s=out_s)

    # Config A: HW=256, forced thw=128 -> grid (1, 2): exercises the running max
    # across hw grid steps with the clean 128-wide chunk path.
    xA = jax.random.normal(k_x1, (2, 128, 16, 16), jnp.float32)
    outA = jax.block_until_ready(classifier_forward(xA, params, thw=128))
    refA = classifier_reference(xA, params)
    assert outA.shape == (2, out_s)
    assert jnp.allclose(outA, refA, rtol=1e-2, atol=1e-2), "config A mismatch vs reference"

    # Config B: HW=25 (single tile, two overlapping 8-multiple chunks: widths 24 & 8),
    # full-dim batch block tb=10: odd spatial size, zero padding anywhere.
    xB = jax.random.normal(k_x2, (10, 128, 5, 5), jnp.float32)
    outB = jax.block_until_ready(classifier_forward(xB, params))
    refB = classifier_reference(xB, params)
    assert outB.shape == (10, out_s)
    assert jnp.allclose(outB, refB, rtol=1e-2, atol=1e-2), "config B mismatch vs reference"

    # Config C: batch zero-padding (B=12, tb=8 -> B_pad=16) and HW edge-padding
    # (HW=144, thw=128 -> HW_pad=256), grid (2, 2).
    xC = jax.random.normal(k_x3, (12, 128, 12, 12), jnp.float32)
    outC = jax.block_until_ready(classifier_forward(xC, params, tb=8, thw=128))
    refC = classifier_reference(xC, params)
    assert outC.shape == (12, out_s)
    assert jnp.allclose(outC, refC, rtol=1e-2, atol=1e-2), "config C mismatch vs reference"

    print("KERNEL_OK")
</pallas_src>

<mosaic_0001>
module attributes {stable_mosaic.version = 11 : i64} {
  func.func @classifier_kernel(%arg0: i32, %arg1: i32, %arg2: memref<2x128x128xf32, #tpu.memory_space<vmem>>, %arg3: memref<128x512xbf16, #tpu.memory_space<vmem>>, %arg4: memref<1x512xf32, #tpu.memory_space<vmem>>, %arg5: memref<512x1024xbf16, #tpu.memory_space<vmem>>, %arg6: memref<1x1024xf32, #tpu.memory_space<vmem>>, %arg7: memref<1024x128xbf16, #tpu.memory_space<vmem>>, %arg8: memref<1x128xf32, #tpu.memory_space<vmem>>, %arg9: memref<2x128xf32, #tpu.memory_space<vmem>>, %arg10: memref<2x512xf32, #tpu.memory_space<vmem>>, %arg11: memref<1x2x128x128xbf16, #tpu.memory_space<vmem>>) attributes {dimension_semantics = [#tpu.dimension_semantics<parallel>, #tpu.dimension_semantics<arbitrary>], iteration_bounds = array<i64: 1, 2>, scalar_prefetch = 0 : i64, scratch_operands = 2 : i64, tpu.core_type = #tpu.core_type<tc>, window_params = [{transform_indices = @transform_0, window_bounds = array<i64: 2, 128, 128>}, {pipeline_mode = #tpu.pipeline_mode<synchronous>, transform_indices = @transform_1, window_bounds = array<i64: 128, 512>}, {pipeline_mode = #tpu.pipeline_mode<synchronous>, transform_indices = @transform_2, window_bounds = array<i64: 1, 512>}, {pipeline_mode = #tpu.pipeline_mode<synchronous>, transform_indices = @transform_3, window_bounds = array<i64: 512, 1024>}, {pipeline_mode = #tpu.pipeline_mode<synchronous>, transform_indices = @transform_4, window_bounds = array<i64: 1, 1024>}, {pipeline_mode = #tpu.pipeline_mode<synchronous>, transform_indices = @transform_5, window_bounds = array<i64: 1024, 128>}, {pipeline_mode = #tpu.pipeline_mode<synchronous>, transform_indices = @transform_6, window_bounds = array<i64: 1, 128>}, {transform_indices = @transform_7, window_bounds = array<i64: 2, 128>}]} {
    %c0_i32 = arith.constant 0 : i32
    %0 = arith.cmpi eq, %arg1, %c0_i32 : i32
    %1 = arith.extui %0 : i1 to i32
    %c0_i32_0 = arith.constant 0 : i32
    %2 = arith.cmpi ne, %1, %c0_i32_0 : i32
    scf.if %2 {
      %cst_24 = arith.constant 0xFF800000 : f32
      %34 = vector.broadcast %cst_24 : f32 to vector<2x512xf32>
      %c0_25 = arith.constant 0 : index
      %c0_26 = arith.constant 0 : index
      %35 = vector.load %arg10[%c0_25, %c0_26] : memref<2x512xf32, #tpu.memory_space<vmem>>, vector<2x512xf32>
      tpu.vector_store %arg10[%c0_25, %c0_26], %34 {strides = array<i32>} : memref<2x512xf32, #tpu.memory_space<vmem>>, vector<2x512xf32>,
    } else {
    }
    %c0_i32_1 = arith.constant 0 : i32
    %3 = arith.index_cast %c0_i32_1 : i32 to index
    %c0 = arith.constant 0 : index
    %c0_2 = arith.constant 0 : index
    %4 = vector.load %arg2[%3, %c0, %c0_2] : memref<2x128x128xf32, #tpu.memory_space<vmem>>, vector<1x128x128xf32>
    %5 = vector.shape_cast %4 : vector<1x128x128xf32> to vector<128x128xf32>
    %6 = tpu.transpose %5, [1, 0] : vector<128x128xf32> -> vector<128x128xf32>
    %7 = arith.truncf %6 : vector<128x128xf32> to vector<128x128xbf16>
    %c0_3 = arith.constant 0 : index
    %8 = arith.index_cast %c0_i32_1 : i32 to index
    %c0_4 = arith.constant 0 : index
    %c0_5 = arith.constant 0 : index
    %9 = vector.load %arg11[%c0_3, %8, %c0_4, %c0_5] : memref<1x2x128x128xbf16, #tpu.memory_space<vmem>>, vector<1x1x128x128xbf16>
    %10 = vector.shape_cast %9 : vector<1x1x128x128xbf16> to vector<128x128xbf16>
    %11 = vector.shape_cast %7 : vector<128x128xbf16> to vector<1x1x128x128xbf16>
    tpu.vector_store %arg11[%c0_3, %8, %c0_4, %c0_5], %11 {strides = array<i32>} : memref<1x2x128x128xbf16, #tpu.memory_space<vmem>>, vector<1x1x128x128xbf16>,
    %c1_i32 = arith.constant 1 : i32
    %12 = arith.index_cast %c1_i32 : i32 to index
    %c0_6 = arith.constant 0 : index
    %c0_7 = arith.constant 0 : index
    %13 = vector.load %arg2[%12, %c0_6, %c0_7] : memref<2x128x128xf32, #tpu.memory_space<vmem>>, vector<1x128x128xf32>
    %14 = vector.shape_cast %13 : vector<1x128x128xf32> to vector<128x128xf32>
    %15 = tpu.transpose %14, [1, 0] : vector<128x128xf32> -> vector<128x128xf32>
    %16 = arith.truncf %15 : vector<128x128xf32> to vector<128x128xbf16>
    %c0_8 = arith.constant 0 : index
    %17 = arith.index_cast %c1_i32 : i32 to index
    %c0_9 = arith.constant 0 : index
    %c0_10 = arith.constant 0 : index
    %18 = vector.load %arg11[%c0_8, %17, %c0_9, %c0_10] : memref<1x2x128x128xbf16, #tpu.memory_space<vmem>>, vector<1x1x128x128xbf16>
    %19 = vector.shape_cast %18 : vector<1x1x128x128xbf16> to vector<128x128xbf16>
    %20 = vector.shape_cast %16 : vector<128x128xbf16> to vector<1x1x128x128xbf16>
    tpu.vector_store %arg11[%c0_8, %17, %c0_9, %c0_10], %20 {strides = array<i32>} : memref<1x2x128x128xbf16, #tpu.memory_space<vmem>>, vector<1x1x128x128xbf16>,
    %c2_i32 = arith.constant 2 : i32
    %c0_11 = arith.constant 0 : index
    %c0_12 = arith.constant 0 : index
    %c0_13 = arith.constant 0 : index
    %c0_14 = arith.constant 0 : index
    %21 = vector.load %arg11[%c0_11, %c0_12, %c0_13, %c0_14] : memref<1x2x128x128xbf16, #tpu.memory_space<vmem>>, vector<1x2x128x128xbf16>
    %22 = vector.shape_cast %21 : vector<1x2x128x128xbf16> to vector<2x128x128xbf16>
    %23 = vector.shape_cast %22 : vector<2x128x128xbf16> to vector<256x128xbf16>
    %c0_15 = arith.constant 0 : index
    %c0_16 = arith.constant 0 : index
    %24 = vector.load %arg3[%c0_15, %c0_16] : memref<128x512xbf16, #tpu.memory_space<vmem>>, vector<128x512xbf16>
    %cst = arith.constant dense<0.000000e+00> : vector<256x512xf32>
    %25 = tpu.matmul %23, %24, %cst {dimension_numbers = #tpu.dot_dimension_numbers<[1], [0], [0], [1], [0, 0, 1, 1], [], []>} : vector<256x128xbf16>, vector<128x512xbf16>, vector<256x512xf32> -> vector<256x512xf32>
    %26 = vector.shape_cast %25 : vector<256x512xf32> to vector<2x128x512xf32>
    %cst_17 = arith.constant dense<0xFF800000> : vector<2x512xf32>
    %27 = vector.multi_reduction <maximumf>, %26, %cst_17 [1] : vector<2x128x512xf32> to vector<2x512xf32>
    %c0_18 = arith.constant 0 : index
    %c0_19 = arith.constant 0 : index
    %28 = vector.load %arg10[%c0_18, %c0_19] : memref<2x512xf32, #tpu.memory_space<vmem>>, vector<2x512xf32>
    %29 = arith.maximumf %28, %27 : vector<2x512xf32>
    %c0_20 = arith.constant 0 : index
    %c0_21 = arith.constant 0 : index
    %30 = vector.load %arg10[%c0_20, %c0_21] : memref<2x512xf32, #tpu.memory_space<vmem>>, vector<2x512xf32>
    tpu.vector_store %arg10[%c0_20, %c0_21], %29 {strides = array<i32>} : memref<2x512xf32, #tpu.memory_space<vmem>>, vector<2x512xf32>,
    %c1_i32_22 = arith.constant 1 : i32
    %31 = arith.cmpi eq, %arg1, %c1_i32_22 : i32
    %32 = arith.extui %31 : i1 to i32
    %c0_i32_23 = arith.constant 0 : i32
    %33 = arith.cmpi ne, %32, %c0_i32_23 : i32
    scf.if %33 {
      %c0_24 = arith.constant 0 : index
      %c0_25 = arith.constant 0 : index
      %34 = vector.load %arg10[%c0_24, %c0_25] : memref<2x512xf32, #tpu.memory_space<vmem>>, vector<2x512xf32>
      %c0_26 = arith.constant 0 : index
      %c0_27 = arith.constant 0 : index
      %35 = vector.load %arg4[%c0_26, %c0_27] : memref<1x512xf32, #tpu.memory_space<vmem>>, vector<1x512xf32>
      %36 = vector.broadcast %35 : vector<1x512xf32> to vector<2x512xf32>
      %37 = arith.addf %34, %36 : vector<2x512xf32>
      %cst_28 = arith.constant 0.000000e+00 : f32
      %38 = vector.broadcast %cst_28 : f32 to vector<2x512xf32>
      %39 = arith.maximumf %37, %38 : vector<2x512xf32>
      %40 = arith.truncf %39 : vector<2x512xf32> to vector<2x512xbf16>
      %c0_29 = arith.constant 0 : index
      %c0_30 = arith.constant 0 : index
      %41 = vector.load %arg5[%c0_29, %c0_30] : memref<512x1024xbf16, #tpu.memory_space<vmem>>, vector<512x1024xbf16>
      %cst_31 = arith.constant dense<0.000000e+00> : vector<2x1024xf32>
      %42 = tpu.matmul %40, %41, %cst_31 {dimension_numbers = #tpu.dot_dimension_numbers<[1], [0], [0], [1], [0, 0, 1, 1], [], []>} : vector<2x512xbf16>, vector<512x1024xbf16>, vector<2x1024xf32> -> vector<2x1024xf32>
      %c0_32 = arith.constant 0 : index
      %c0_33 = arith.constant 0 : index
      %43 = vector.load %arg6[%c0_32, %c0_33] : memref<1x1024xf32, #tpu.memory_space<vmem>>, vector<1x1024xf32>
      %44 = vector.broadcast %43 : vector<1x1024xf32> to vector<2x1024xf32>
      %45 = arith.addf %42, %44 : vector<2x1024xf32>
      %cst_34 = arith.constant 0.000000e+00 : f32
      %46 = vector.broadcast %cst_34 : f32 to vector<2x1024xf32>
      %47 = arith.maximumf %45, %46 : vector<2x1024xf32>
      %48 = arith.truncf %47 : vector<2x1024xf32> to vector<2x1024xbf16>
      %c0_35 = arith.constant 0 : index
      %c0_36 = arith.constant 0 : index
      %49 = vector.load %arg7[%c0_35, %c0_36] : memref<1024x128xbf16, #tpu.memory_space<vmem>>, vector<1024x128xbf16>
      %cst_37 = arith.constant dense<0.000000e+00> : vector<2x128xf32>
      %50 = tpu.matmul %48, %49, %cst_37 {dimension_numbers = #tpu.dot_dimension_numbers<[1], [0], [0], [1], [0, 0, 1, 1], [], []>} : vector<2x1024xbf16>, vector<1024x128xbf16>, vector<2x128xf32> -> vector<2x128xf32>
      %c0_38 = arith.constant 0 : index
      %c0_39 = arith.constant 0 : index
      %51 = vector.load %arg8[%c0_38, %c0_39] : memref<1x128xf32, #tpu.memory_space<vmem>>, vector<1x128xf32>
      %52 = vector.broadcast %51 : vector<1x128xf32> to vector<2x128xf32>
      %53 = arith.addf %50, %52 : vector<2x128xf32>
      %c0_40 = arith.constant 0 : index
      %c0_41 = arith.constant 0 : index
      %54 = vector.load %arg9[%c0_40, %c0_41] : memref<2x128xf32, #tpu.memory_space<vmem>>, vector<2x128xf32>
      tpu.vector_store %arg9[%c0_40, %c0_41], %53 {strides = array<i32>} : memref<2x128xf32, #tpu.memory_space<vmem>>, vector<2x128xf32>,
    } else {
    }
    return
  }
  func.func @transform_0(%arg0: i32, %arg1: i32) -> (i32, i32, i32) {
    %c0_i32 = arith.constant 0 : i32
    %c0_i32_0 = arith.constant 0 : i32
    return %arg0, %c0_i32, %arg1 : i32, i32, i32
  }
  func.func @transform_1(%arg0: i32, %arg1: i32) -> (i32, i32) {
    %c0_i32 = arith.constant 0 : i32
    %c0_i32_0 = arith.constant 0 : i32
    %c0_i32_1 = arith.constant 0 : i32
    return %c0_i32, %c0_i32_0 : i32, i32
  }
  func.func @transform_2(%arg0: i32, %arg1: i32) -> (i32, i32) {
    %c0_i32 = arith.constant 0 : i32
    %c0_i32_0 = arith.constant 0 : i32
    %c0_i32_1 = arith.constant 0 : i32
    return %c0_i32, %c0_i32_0 : i32, i32
  }
  func.func @transform_3(%arg0: i32, %arg1: i32) -> (i32, i32) {
    %c0_i32 = arith.constant 0 : i32
    %c0_i32_0 = arith.constant 0 : i32
    %c0_i32_1 = arith.constant 0 : i32
    return %c0_i32, %c0_i32_0 : i32, i32
  }
  func.func @transform_4(%arg0: i32, %arg1: i32) -> (i32, i32) {
    %c0_i32 = arith.constant 0 : i32
    %c0_i32_0 = arith.constant 0 : i32
    %c0_i32_1 = arith.constant 0 : i32
    return %c0_i32, %c0_i32_0 : i32, i32
  }
  func.func @transform_5(%arg0: i32, %arg1: i32) -> (i32, i32) {
    %c0_i32 = arith.constant 0 : i32
    %c0_i32_0 = arith.constant 0 : i32
    %c0_i32_1 = arith.constant 0 : i32
    return %c0_i32, %c0_i32_0 : i32, i32
  }
  func.func @transform_6(%arg0: i32, %arg1: i32) -> (i32, i32) {
    %c0_i32 = arith.constant 0 : i32
    %c0_i32_0 = arith.constant 0 : i32
    %c0_i32_1 = arith.constant 0 : i32
    return %c0_i32, %c0_i32_0 : i32, i32
  }
  func.func @transform_7(%arg0: i32, %arg1: i32) -> (i32, i32) {
    %c0_i32 = arith.constant 0 : i32
    %c0_i32_0 = arith.constant 0 : i32
    return %arg0, %c0_i32 : i32, i32
  }
}

</mosaic_0001>

<bundles_post_ra>
// kernel: tpu_custom_call.1
= control target key start
LH: loop header
LB: loop body
LE: loop exit
PB: predicated region body
PF: predicated region fallthrough
CT: control target
= control target key end

     0   :  { %s6903_s0 = inlined_call_operand.hbm [shape: f32[2,128,256], index: 0, kind: input, shape index: {}]   ;;  %s6904_s1 = inlined_call_operand.hbm [shape: bf16[128,512], index: 1, kind: input, shape index: {}]   ;;  %s6905_s2 = inlined_call_operand.hbm [shape: f32[1,512], index: 2, kind: input, shape index: {}]   ;;  %s6906_s3 = inlined_call_operand.hbm [shape: bf16[512,1024], index: 3, kind: input, shape index: {}]   ;;  %s6907_s4 = inlined_call_operand.hbm [shape: f32[1,1024], index: 4, kind: input, shape index: {}]   ;;  %s6908_s5 = inlined_call_operand.hbm [shape: bf16[1024,128], index: 5, kind: input, shape index: {}]   ;;  %s6909_s6 = inlined_call_operand.vmem [shape: f32[1,128], index: 6, kind: input, shape index: {}]   ;;  %s6910_s7 = inlined_call_operand.hbm [shape: f32[2,128], index: 7, kind: output, shape index: {}]  }
   0x1   :  { %6912 = sst [smem:[#allocation21_spill]] %s6904_s1 }
   0x2   :  { %6913 = sst [smem:[#allocation22_spill]] %s6906_s3 }
   0x3   :  { %12 = vsyncpa [#allocation5], 0 }
   0x4   :  { %14 = vsyncpa [#allocation5 + $0x1], 0 }
   0x5   :  { %15 = vsyncpa [#allocation8], 0 }
   0x6   :  { %16 = vsyncpa [#allocation11], 0 }
   0x7   :  { %17 = vsyncpa [#allocation14], 0 }
   0x8   :  { %18 = vsyncpa [#allocation6], 0  ;;  %s6629_s24 = smov 0   ;;  %s6631_s25 = smov 0  }
   0x9   :  { %s6633_s26 = smov 0   ;;  %s6635_s27 = smov 0  }
   0xa   :  { %s6637_s28 = smov 0   ;;  %s6639_s29 = smov 0  }
   0xb LB: > { %s6911_s30 = sadd.s32 4294967295, %s6572_s29   ;;  %p58_p0 = scmp.ne.s32.totalorder %s6556_s25, %s6552_s24  ;;  %s6572_s29 = sphi %s6639_s29, %s24_s29   ;;  %s6568_s28 = sphi %s6637_s28, %s6925_s28   ;;  %s6564_s27 = sphi %s6635_s27, %s6924_s27   ;;  %s6560_s26 = sphi %s6633_s26, %s6923_s26   ;;  %s6556_s25 = sphi %s6631_s25, %s6922_s25   ;;  %s6552_s24 = sphi %s6629_s24, %s6921_s24  }
   0xc   : > { %p6661_p1 = scmp.eq.s32.totalorder %s6911_s30, 0  ;;  %p4203_p2 = scmp.ge.s32.totalorder %s6572_s29, 1 }
   0xd   : > { %p221_p3 = scmp.lt.s32.totalorder %s6572_s29, 3  ;;  %s6916_s1 = sld [smem:[#allocation21_spill]] }
   0xe   : > { %p6669_p4 = por %p6661_p1, %p58_p0  ;;  %s6574_s14 = smov [#allocation7]  }
   0xf   : > { %p6676_p5 = pnand %p4203_p2, %p221_p3  ;;  %s234_s15 = sshll.u32 %s6574_s14, 4  ;;  %s235_s15 = int_to_ptr.vmem [resolvable:$true] %s234_s15 }
  0x10   : > { %s6919_s3 = sld [smem:[#allocation22_spill]]  ;;  %s6575_s20 = smov 256  }
  0x11   : > { %p6201_p6 = pneg %p6676_p5  ;;  %s6576_s21 = smov 16  }
  0x12   : > { %s6577_s22 = smov [#allocation10]   ;;  %s6578_s24 = smov 512  }
  0x13   : > { %s232_s12 = sshll.u32 %s6916_s1, 4  ;;  %p6684_p7 = pnand %p6201_p6, %p6661_p1  ;;  %s233_s12 = int_to_ptr.hbm [resolvable:$true] %s232_s12 }
  0x14   : > { %s260_s23 = sshll.u32 %s6577_s22, 4  ;;  %s6579_s10 = smov 32   ;;  %s261_s23 = int_to_ptr.vmem [resolvable:$true] %s260_s23 }
  0x15   : > { %6204 = dma.hbm_to_vmem [thread:$0]  (!%p6684_p7), %s233_s12, 4096, %s235_s15, [#allocation8], %s6575_s20, %s6575_s20, %s6576_s21  }
  0x16   : > { %s258_s19 = sshll.u32 %s6919_s3, 4  ;;  %s247_s17 = sshll.u32 %s6905_s2, 4  ;;  %s259_s19 = int_to_ptr.hbm [resolvable:$true] %s258_s19  ;;  %s248_s17 = int_to_ptr.hbm [resolvable:$true] %s247_s17 }
  0x17   : > { %6210 = dma.hbm_to_vmem [thread:$0]  (!%p6684_p7), %s259_s19, 32768, %s261_s23, [#allocation11], %s6578_s24, %s6578_s24, %s6579_s10  }
  0x18   : > { %s6580_s18 = smov [#allocation9]   ;;  %s273_s12 = sshll.u32 %s6907_s4, 4  ;;  %s274_s12 = int_to_ptr.hbm [resolvable:$true] %s273_s12 }
  0x19   : > { %s249_s30 = sshll.u32 %s6580_s18, 4  ;;  %s6581_s15 = smov [#allocation12]   ;;  %s250_s30 = int_to_ptr.vmem [resolvable:$true] %s249_s30 }
  0x1a   : > { %6207 = dma.hbm_to_vmem [thread:$0]  (!%p6684_p7), %s248_s17, 64, %s250_s30, [#allocation8]  }
  0x1b   : > { %s275_s19 = sshll.u32 %s6581_s15, 4  ;;  %s284_s23 = sshll.u32 %s6908_s5, 4  ;;  %s276_s19 = int_to_ptr.vmem [resolvable:$true] %s275_s19  ;;  %s285_s23 = int_to_ptr.hbm [resolvable:$true] %s284_s23 }
  0x1c   : > { %6213 = dma.hbm_to_vmem [thread:$0]  (!%p6684_p7), %s274_s12, 128, %s276_s19, [#allocation11]  }
  0x1d   : > { %s6582_s1 = smov [#allocation13]   ;;  %s6583_s30 = smov 64  }
  0x1e   : > { %s286_s3 = sshll.u32 %s6582_s1, 4  ;;  %s6584_s24 = smov 4   ;;  %s287_s3 = int_to_ptr.vmem [resolvable:$true] %s286_s3 }
  0x1f   : > { %6216 = dma.hbm_to_vmem [thread:$0]  (!%p6684_p7), %s285_s23, 8192, %s287_s3, [#allocation14], %s6583_s30, %s6583_s30, %s6584_s24  }
  0x20   : > { %s45_s10 = sadd.s32 1, %s6560_s26  ;;  %s33_s11 = sadd.s32 1, %s6568_s28 }
  0x21   : > { %p52_p8 = scmp.ne.s32.totalorder %s6560_s26, %s6556_s25  ;;  %p34_p9 = scmp.ge.s32.totalorder %s33_s11, 2 }
  0x22   : > { %p53_p10 = scmp.eq.s32.totalorder %s6572_s29, 0  ;;  %p6226_p11 = scmp.lt.s32.totalorder %s6572_s29, 2 }
  0x23   : > { %s303_s14 = sand.u32 1, %s6560_s26   ;;  %s6927_s11 = smov (%p34_p9, %s33_s11), 0 }
  0x24   : > { %p54_p12 = por %p53_p10, %p52_p8  ;;  %s41_s17 = ssub.s32 %s6568_s28, %s6927_s11 }
  0x25   : > { %s4210_s18 = sshll.u32 %s303_s14, 8  ;;  %p43_p13 = scmp.eq.s32.totalorder %s41_s17, 0 }
  0x26   : > { %s4211_s12 = sshll.u32 %s6568_s28, 3  ;;  %s307_s15 = scalar_lea.vmem [#allocation4], %s4210_s18 }
  0x27   : > { %s317_s16 = sshll.u32 %s307_s15, 4  ;;  %s314_s23 = scalar_lea.hbm %s6903_s0, %s4211_s12  ;;  %s318_s16 = int_to_ptr.vmem [resolvable:$true] %s317_s16 }
  0x28   : > { %s6725_s19 = scalar_select %p43_p13, %s6560_s26, %s45_s10  }
  0x29   : > { %s315_s1 = sshll.u32 %s314_s23, 4  ;;  %p6218_p0 = pnand %p6226_p11, %p54_p12  ;;  %s316_s1 = int_to_ptr.hbm [resolvable:$true] %s315_s1 }
  0x2a   : > { %s304_s3 = scalar_lea.sflag [#allocation5], %s303_s14  ;;  %s6585_s30 = smov 128  }
  0x2b   : > { %s6586_s24 = smov 8   ;;  %329 = sbr.rel (%p6676_p5) target bundleno = 1233 (0x4d1), region = 48 }
  0x2c   : > { %6220 = dma.hbm_to_vmem [thread:$0]  (!%p6218_p0), %s316_s1, 4096, %s318_s16, %s304_s3, %s6575_s20, %s6585_s30, %s6586_s24  }
  0x2d   : > { %s331_s10 = sand.u32 (!%p6676_p5), 1, %s6556_s25  }
  0x2e   : > { %s4213_s17 = sshll.u32 (!%p6676_p5), %s331_s10, 8  ;;  %s332_s18 = scalar_lea.sflag (!%p6676_p5), [#allocation5], %s331_s10 }
  0x2f   : > { %s6736_s15 = scalar_lea.vmem (!%p6676_p5), [#allocation4], %s4213_s17 }
  0x30   : > { %6531 = dma.done.wait (%p6669_p4), %s332_s18, 4096  }
  0x31   : > { %6533 = vsyncadd (%p6669_p4), %s332_s18, 4294963200 }
  0x32   : > { %6535 = dma.done.wait (%p6661_p1), [#allocation8], 4160  }
  0x33   : > { %6537 = vsyncadd (%p6661_p1), [#allocation8], 4294963136 }
  0x34   : > { %6539 = dma.done.wait (%p6661_p1), [#allocation11], 32896  }
  0x35   : > { %6541 = vsyncadd (%p6661_p1), [#allocation11], 4294934400 }
  0x36   : > { %6543 = dma.done.wait (%p6661_p1), [#allocation14], 8192  }
  0x37   : > { %6545 = vsyncadd (%p6661_p1), [#allocation14], 4294959104  ;;  %p4219_p2 = scmp.ne.s32.totalorder %s6564_s27, 0 }
  0x39   : > { %391 = sbr.rel (%p4219_p2) target bundleno = 64 (0x40), region = 76 }
  0x3e   : > { %v6587_v0 = vmov -inf  }
  0x3f   : > { %392 = vst [vmem:[#allocation2] sm:$0xff] %v6587_v0 }
  0x40 PF: > { %v393_v1 = vld [vmem:[%s6736_s15] sm:$0xff]  ;;  %v394_v2 = vld [vmem:[%s6736_s15 + $0x8] sm:$0xff]  ;;  %v395_v3 = vld [vmem:[%s6736_s15 + $0x10] sm:$0xff]  ;;  %vm1414_vm0 = vcmask 1041408   ;;  %vm1416_vm1 = vcmask 1045508   ;;  %vm1418_vm2 = vcmask 1043456  }
  0x41   : > { %409 = vxpose.xlu0.b32.start [1/16] %v393_v1, 128  ;;  %v396_v4 = vld [vmem:[%s6736_s15 + $0x18] sm:$0xff]  ;;  %v397_v5 = vld [vmem:[%s6736_s15 + $0x20] sm:$0xff]  ;;  %v398_v6 = vld [vmem:[%s6736_s15 + $0x28] sm:$0xff]  ;;  %vm1428_vm3 = vcmask 1041409   ;;  %vm1430_vm4 = vcmask 1043459   ;;  %vm1432_vm5 = vcmask 1045509  }
  0x42   : > { %v399_v7 = vld [vmem:[%s6736_s15 + $0x30] sm:$0xff]  ;;  %v400_v8 = vld [vmem:[%s6736_s15 + $0x38] sm:$0xff]  ;;  %v401_v9 = vld [vmem:[%s6736_s15 + $0x40] sm:$0xff]  ;;  %vm1434_vm6 = vcmask 1047559   ;;  %p4428_p1 = scmp.ne.s32.totalorder %s6564_s27, 1 }
  0x43   : > { %v402_v10 = vld [vmem:[%s6736_s15 + $0x48] sm:$0xff]  ;;  %v403_v11 = vld [vmem:[%s6736_s15 + $0x50] sm:$0xff]  ;;  %v4220_v12 = vld [vmem:[%s6736_s15 + $0x80] sm:$0xff] }
  0x44   : > { %490 = vxpose.xlu1.b32.start [1/16] %v4220_v12, 128  ;;  %v404_v13 = vld [vmem:[%s6736_s15 + $0x58] sm:$0xff]  ;;  %v4221_v14 = vld [vmem:[%s6736_s15 + $0x88] sm:$0xff]  ;;  %v4414_v15 = vld [vmem:[#allocation7 + $0xe0] sm:$0xf] }
  0x45   : > { %v5759_v16 = vld [vmem:[#allocation7 + $0xec] sm:$0xf0]  ;;  %v5757_v18 = vld [vmem:[#allocation7 + $0xe4] sm:$0xf]  ;;  %v4416_v19 = vld [vmem:[#allocation7 + $0xf0] sm:$0xf0] }
  0x46   : > { %v4415_v17 = vor.u32 %v5759_v16, %v4414_v15  ;;  %v4422_v20 = vld [vmem:[#allocation7 + $0xe8] sm:$0xf]  ;;  %v405_v21 = vld [vmem:[%s6736_s15 + $0x60] sm:$0xff]  ;;  %v4419_v22 = vor.u32 %v5757_v18, %v4416_v19  ;;  %v5760_v23 = vld [vmem:[#allocation7 + $0xf4] sm:$0xf0] }
  0x47   : > { %v5758_v24 = vld [vmem:[#allocation7 + $0xec] sm:$0xf]  ;;  %v4424_v25 = vld [vmem:[#allocation7 + $0xf8] sm:$0xf0]  ;;  %v4423_v26 = vor.u32 %v5760_v23, %v4422_v20  ;;  %v4398_v28 = vld [vmem:[#allocation7 + $0xc0] sm:$0xf] }
  0x48   : > { %875 = vmatpush.bf16.msra.mxu0 %v4415_v17  ;;  %v4427_v27 = vor.u32 %v5758_v24, %v4424_v25  ;;  %v5755_v29 = vld [vmem:[#allocation7 + $0xcc] sm:$0xf0]  ;;  %v5753_v30 = vld [vmem:[#allocation7 + $0xc4] sm:$0xf]  ;;  %964 = vmatpush.bf16.msra.mxu1 %v4419_v22  ;;  %v4400_v32 = vld [vmem:[#allocation7 + $0xd0] sm:$0xf0] }
  0x49   : > { %410 = vxpose.xlu0.b32.cont [2/16] %v394_v2, 128  ;;  %v4399_v31 = vor.u32 %v5755_v29, %v4398_v28  ;;  %v4406_v33 = vld [vmem:[#allocation7 + $0xc8] sm:$0xf]  ;;  %v5756_v34 = vld [vmem:[#allocation7 + $0xd4] sm:$0xf0]  ;;  %v4222_v35 = vld [vmem:[%s6736_s15 + $0x90] sm:$0xff]  ;;  %1053 = vmatpush.bf16.msra.mxu2 %v4423_v26  ;;  %v4403_v36 = vor.u32 %v5753_v30, %v4400_v32 }
  0x4a   : > { %1142 = vmatpush.bf16.msra.mxu3 %v4427_v27  ;;  %v4407_v37 = vor.u32 %v5756_v34, %v4406_v33  ;;  %v5754_v38 = vld [vmem:[#allocation7 + $0xcc] sm:$0xf]  ;;  %v4408_v39 = vld [vmem:[#allocation7 + $0xd8] sm:$0xf0]  ;;  %v4382_v41 = vld [vmem:[#allocation7 + $0xa0] sm:$0xf] }
  0x4b   : > { %v4411_v40 = vor.u32 %v5754_v38, %v4408_v39  ;;  %v5751_v42 = vld [vmem:[#allocation7 + $0xac] sm:$0xf0]  ;;  %v5749_v43 = vld [vmem:[#allocation7 + $0xa4] sm:$0xf]  ;;  %v4384_v45 = vld [vmem:[#allocation7 + $0xb0] sm:$0xf0] }
  0x4c   : > { %491 = vxpose.xlu1.b32.cont [2/16] %v4221_v14, 128  ;;  %876 = vmatpush.bf16.msra.mxu0 %v4399_v31  ;;  %v4383_v44 = vor.u32 %v5751_v42, %v4382_v41  ;;  %v4390_v46 = vld [vmem:[#allocation7 + $0xa8] sm:$0xf]  ;;  %v5752_v47 = vld [vmem:[#allocation7 + $0xb4] sm:$0xf0]  ;;  %v4387_v48 = vor.u32 %v5749_v43, %v4384_v45  ;;  %v5750_v49 = vld [vmem:[#allocation7 + $0xac] sm:$0xf] }
  0x4d   : > { %965 = vmatpush.bf16.msra.mxu1 %v4403_v36  ;;  %v4392_v50 = vld [vmem:[#allocation7 + $0xb8] sm:$0xf0]  ;;  %1054 = vmatpush.bf16.msra.mxu2 %v4407_v37  ;;  %v4391_v51 = vor.u32 %v5752_v47, %v4390_v46  ;;  %v406_v53 = vld [vmem:[%s6736_s15 + $0x68] sm:$0xff]  ;;  %v407_v55 = vld [vmem:[%s6736_s15 + $0x70] sm:$0xff] }
  0x4e   : > { %1143 = vmatpush.bf16.msra.mxu3 %v4411_v40  ;;  %v4395_v52 = vor.u32 %v5750_v49, %v4392_v50  ;;  %v4223_v54 = vld [vmem:[%s6736_s15 + $0x98] sm:$0xff]  ;;  %v4224_v56 = vld [vmem:[%s6736_s15 + $0xa0] sm:$0xff]  ;;  %v4225_v58 = vld [vmem:[%s6736_s15 + $0xa8] sm:$0xff] }
  0x4f   : > { %v408_v57 = vld [vmem:[%s6736_s15 + $0x78] sm:$0xff]  ;;  %v4366_v59 = vld [vmem:[#allocation7 + $0x80] sm:$0xf]  ;;  %v5747_v60 = vld [vmem:[#allocation7 + $0x8c] sm:$0xf0] }
  0x50   : > { %877 = vmatpush.bf16.msra.mxu0 %v4383_v44  ;;  %v5745_v61 = vld [vmem:[#allocation7 + $0x84] sm:$0xf]  ;;  %v4367_v62 = vor.u32 %v5747_v60, %v4366_v59  ;;  %v4368_v63 = vld [vmem:[#allocation7 + $0x90] sm:$0xf0]  ;;  %v4374_v0 = vld [vmem:[#allocation7 + $0x88] sm:$0xf] }
  0x51   : > { %411 = vxpose.xlu0.b32.cont [3/16] %v395_v3, 128  ;;  %966 = vmatpush.bf16.msra.mxu1 %v4387_v48  ;;  %v5748_v1 = vld [vmem:[#allocation7 + $0x94] sm:$0xf0]  ;;  %v4371_v2 = vor.u32 %v5745_v61, %v4368_v63  ;;  %v4352_v12 = vld [vmem:[#allocation7 + $0x70] sm:$0xf0]  ;;  %v5742_v17 = vld [vmem:[#allocation7 + $0x6c] sm:$0xf] }
  0x52   : > { %1055 = vmatpush.bf16.msra.mxu2 %v4391_v51  ;;  %1144 = vmatpush.bf16.msra.mxu3 %v4395_v52  ;;  %v4375_v3 = vor.u32 %v5748_v1, %v4374_v0  ;;  %v5744_v14 = vld [vmem:[#allocation7 + $0x74] sm:$0xf0]  ;;  %v4360_v18 = vld [vmem:[#allocation7 + $0x78] sm:$0xf0]  ;;  %v4334_v20 = vld [vmem:[#allocation7 + $0x40] sm:$0xf] }
  0x53   : > { %v4363_v19 = vor.u32 %v5742_v17, %v4360_v18  ;;  %v5737_v22 = vld [vmem:[#allocation7 + $0x44] sm:$0xf]  ;;  %v4336_v24 = vld [vmem:[#allocation7 + $0x50] sm:$0xf0]  ;;  %v4342_v25 = vld [vmem:[#allocation7 + $0x48] sm:$0xf] }
  0x54   : > { %492 = vxpose.xlu1.b32.cont [3/16] %v4222_v35, 128  ;;  %878 = vmatpush.bf16.msra.mxu0 %v4367_v62  ;;  %v5740_v26 = vld [vmem:[#allocation7 + $0x54] sm:$0xf0]  ;;  %v4339_v27 = vor.u32 %v5737_v22, %v4336_v24  ;;  %v5738_v29 = vld [vmem:[#allocation7 + $0x4c] sm:$0xf]  ;;  %v4344_v30 = vld [vmem:[#allocation7 + $0x58] sm:$0xf0] }
  0x55   : > { %967 = vmatpush.bf16.msra.mxu1 %v4371_v2  ;;  %v4343_v28 = vor.u32 %v5740_v26, %v4342_v25  ;;  %v4347_v31 = vor.u32 %v5738_v29, %v4344_v30  ;;  %v4318_v32 = vld [vmem:[#allocation7 + $0x20] sm:$0xf]  ;;  %v5735_v33 = vld [vmem:[#allocation7 + $0x2c] sm:$0xf0]  ;;  %v5733_v34 = vld [vmem:[#allocation7 + $0x24] sm:$0xf] }
  0x56   : > { %1056 = vmatpush.bf16.msra.mxu2 %v4375_v3  ;;  %v4227_v35 = vld [vmem:[%s6736_s15 + $0xb8] sm:$0xff]  ;;  %v4319_v36 = vor.u32 %v5735_v33, %v4318_v32  ;;  %v4320_v37 = vld [vmem:[#allocation7 + $0x30] sm:$0xf0]  ;;  %v4326_v38 = vld [vmem:[#allocation7 + $0x28] sm:$0xf] }
  0x57   : > { %v4323_v39 = vor.u32 %v5733_v34, %v4320_v37  ;;  %v5736_v40 = vld [vmem:[#allocation7 + $0x34] sm:$0xf0]  ;;  %v5734_v41 = vld [vmem:[#allocation7 + $0x2c] sm:$0xf]  ;;  %v4328_v42 = vld [vmem:[#allocation7 + $0x38] sm:$0xf0] }
  0x58   : > { %v4327_v43 = vor.u32 %v5736_v40, %v4326_v38  ;;  %v4331_v44 = vor.u32 %v5734_v41, %v4328_v42  ;;  %v4302_v45 = vld [vmem:[#allocation7] sm:$0xf]  ;;  %v5731_v46 = vld [vmem:[#allocation7 + $0xc] sm:$0xf0]  ;;  %v5729_v47 = vld [vmem:[#allocation7 + $0x4] sm:$0xf] }
  0x59   : > { %412 = vxpose.xlu0.b32.cont [4/16] %v396_v4, 128  ;;  %v5746_v4 = vld [vmem:[#allocation7 + $0x8c] sm:$0xf]  ;;  %v4303_v48 = vor.u32 %v5731_v46, %v4302_v45  ;;  %v4304_v49 = vld [vmem:[#allocation7 + $0x10] sm:$0xf0]  ;;  %v4310_v50 = vld [vmem:[#allocation7 + $0x8] sm:$0xf] }
  0x5a   : > { %v5732_v51 = vld [vmem:[#allocation7 + $0x14] sm:$0xf0]  ;;  %v4307_v52 = vor.u32 %v5729_v47, %v4304_v49  ;;  %v4230_v60 = vld [vmem:[%s6736_s15 + $0xd0] sm:$0xff]  ;;  %v4232_v2 = vld [vmem:[%s6736_s15 + $0xe0] sm:$0xff] }
  0x5b   : > { %v4231_v63 = vld [vmem:[%s6736_s15 + $0xd8] sm:$0xff] }
  0x5c   : > { %493 = vxpose.xlu1.b32.cont [4/16] %v4223_v54, 128  ;;  %v5730_v54 = vld [vmem:[#allocation7 + $0xc] sm:$0xf] }
  0x61   : > { %413 = vxpose.xlu0.b32.cont [5/16] %v397_v5, 128  ;;  %v4376_v5 = vld [vmem:[#allocation7 + $0x98] sm:$0xf0] }
  0x64   : > { %494 = vxpose.xlu1.b32.cont [5/16] %v4224_v56, 128 }
  0x69   : > { %414 = vxpose.xlu0.b32.cont [6/16] %v398_v6, 128  ;;  %v4226_v6 = vld [vmem:[%s6736_s15 + $0xb0] sm:$0xff] }
  0x6c   : > { %495 = vxpose.xlu1.b32.cont [6/16] %v4225_v58, 128  ;;  %v4229_v58 = vld [vmem:[%s6736_s15 + $0xc8] sm:$0xff] }
  0x71   : > { %415 = vxpose.xlu0.b32.cont [7/16] %v399_v7, 128  ;;  %v4379_v7 = vor.u32 %v5746_v4, %v4376_v5  ;;  %v4233_v5 = vld [vmem:[%s6736_s15 + $0xe8] sm:$0xff] }
  0x73   : > { %1145 = vmatpush.bf16.msra.mxu3 %v4379_v7 }
  0x74   : > { %496 = vxpose.xlu1.b32.cont [7/16] %v4226_v6, 128 }
  0x77   : > { %1146 = vmatpush.bf16.msra.mxu3 %v4363_v19 }
  0x79   : > { %416 = vxpose.xlu0.b32.cont [8/16] %v400_v8, 128  ;;  %v4350_v8 = vld [vmem:[#allocation7 + $0x60] sm:$0xf] }
  0x7b   : > { %1147 = vmatpush.bf16.msra.mxu3 %v4347_v31 }
  0x7c   : > { %497 = vxpose.xlu1.b32.cont [8/16] %v4227_v35, 128 }
  0x7f   : > { %1148 = vmatpush.bf16.msra.mxu3 %v4331_v44 }
  0x81   : > { %417 = vxpose.xlu0.b32.cont [9/16] %v401_v9, 128  ;;  %v5743_v9 = vld [vmem:[#allocation7 + $0x6c] sm:$0xf0] }
  0x89   : > { %418 = vxpose.xlu0.b32.cont [10/16] %v402_v10, 128  ;;  %v5741_v10 = vld [vmem:[#allocation7 + $0x64] sm:$0xf] }
  0x8a   : > { %v4355_v15 = vor.u32 %v5741_v10, %v4352_v12 }
  0x8c   : > { %968 = vmatpush.bf16.msra.mxu1 %v4355_v15 }
  0x90   : > { %969 = vmatpush.bf16.msra.mxu1 %v4339_v27 }
  0x91   : > { %419 = vxpose.xlu0.b32.cont [11/16] %v403_v11, 128  ;;  %v4351_v11 = vor.u32 %v5743_v9, %v4350_v8  ;;  %v4234_v8 = vld [vmem:[%s6736_s15 + $0xf0] sm:$0xff] }
  0x93   : > { %879 = vmatpush.bf16.msra.mxu0 %v4351_v11  ;;  %v4235_v11 = vld [vmem:[%s6736_s15 + $0xf8] sm:$0xff] }
  0x94   : > { %970 = vmatpush.bf16.msra.mxu1 %v4323_v39 }
  0x98   : > { %971 = vmatpush.bf16.msra.mxu1 %v4307_v52 }
  0x99   : > { %420 = vxpose.xlu0.b32.cont [12/16] %v404_v13, 128  ;;  %v4358_v13 = vld [vmem:[#allocation7 + $0x68] sm:$0xf] }
  0x9a   : > { %v4359_v16 = vor.u32 %v5744_v14, %v4358_v13 }
  0x9c   : > { %1057 = vmatpush.bf16.msra.mxu2 %v4359_v16 }
  0xa0   : > { %1058 = vmatpush.bf16.msra.mxu2 %v4343_v28 }
  0xa1   : > { %421 = vxpose.xlu0.b32.cont [13/16] %v405_v21, 128  ;;  %v5739_v21 = vld [vmem:[#allocation7 + $0x4c] sm:$0xf0] }
  0xa2   : > { %v4335_v23 = vor.u32 %v5739_v21, %v4334_v20 }
  0xa4   : > { %880 = vmatpush.bf16.msra.mxu0 %v4335_v23  ;;  %1059 = vmatpush.bf16.msra.mxu2 %v4327_v43 }
  0xa8   : > { %881 = vmatpush.bf16.msra.mxu0 %v4319_v36 }
  0xa9   : > { %422 = vxpose.xlu0.b32.cont [14/16] %v406_v53, 128  ;;  %v4311_v53 = vor.u32 %v5732_v51, %v4310_v50 }
  0xab   : > { %1060 = vmatpush.bf16.msra.mxu2 %v4311_v53 }
  0xac   : > { %882 = vmatpush.bf16.msra.mxu0 %v4303_v48 }
  0xb1   : > { %423 = vxpose.xlu0.b32.cont [15/16] %v407_v55, 128  ;;  %v4312_v55 = vld [vmem:[#allocation7 + $0x18] sm:$0xf0] }
  0xb2   : > { %v4315_v56 = vor.u32 %v5730_v54, %v4312_v55 }
  0xb4   : > { %1149 = vmatpush.bf16.msra.mxu3 %v4315_v56 }
  0xb9   : > { %424 = vxpose.xlu0.b32.end [16/16] %v408_v57, 128  ;;  %v4228_v57 = vld [vmem:[%s6736_s15 + $0xc0] sm:$0xff] }
  0xba   : > { %498 = vxpose.xlu1.b32.cont [9/16] %v4228_v57, 128 }
  0xc2   : > { %499 = vxpose.xlu1.b32.cont [10/16] %v4229_v58, 128 }
  0xca   : > { %500 = vxpose.xlu1.b32.cont [11/16] %v4230_v60, 128 }
  0xd2   : > { %501 = vxpose.xlu1.b32.cont [12/16] %v4231_v63, 128 }
  0xda   : > { %502 = vxpose.xlu1.b32.cont [13/16] %v4232_v2, 128 }
  0xe2   : > { %503 = vxpose.xlu1.b32.cont [14/16] %v4233_v5, 128 }
  0xe5   : > { %v425_v59 = vpop.trf.xlu0 }
  0xea   : > { %504 = vxpose.xlu1.b32.cont [15/16] %v4234_v8, 128 }
  0xed   : > { %v426_v61 = vpop.trf.xlu0 }
  0xee   : > { %v6084_v62 = vpack.c.bf16 %v426_v61, %v425_v59 }
  0xf0   : > { %6085 = vst [vmem:[#allocation3 + $0x30] sm:$0xff] %v6084_v62  }
  0xf2   : > { %505 = vxpose.xlu1.b32.end [16/16] %v4235_v11, 128 }
  0xf5   : > { %v427_v0 = vpop.trf.xlu0 }
  0xf7   : > { %v5713_v1 = vld [vmem:[#allocation3 + $0x30] sm:$0xff] }
  0xf8   : > { %883 = vmatmul.bf16.vlgmr.msra.gmra.mxu0 %v5713_v1  ;;  %972 = vmatmul.bf16.vlgmr.msra.gmra.mxu1 %v5713_v1 }
  0xf9   : > { %1061 = vmatmul.bf16.vlgmr.msra.gmra.mxu2 %v5713_v1  ;;  %1150 = vmatmul.bf16.vlgmr.msra.gmra.mxu3 %v5713_v1 }
  0xfd   : > { %v428_v3 = vpop.trf.xlu0 }
  0xfe   : > { %v6089_v4 = vpack.c.bf16 %v428_v3, %v427_v0 }
 0x100   : > { %6161 = vst [vmem:[#allocation3] sm:$0xff] %v6089_v4  }
 0x105   : > { %v429_v6 = vpop.trf.xlu0 }
 0x107   : > { %v5714_v7 = vld [vmem:[#allocation3] sm:$0xff] }
 0x108   : > { %888 = vmatmul.bf16.gmra.mxu0 %v5714_v7  ;;  %977 = vmatmul.bf16.gmra.mxu1 %v5714_v7 }
 0x109   : > { %1066 = vmatmul.bf16.gmra.mxu2 %v5714_v7  ;;  %1155 = vmatmul.bf16.gmra.mxu3 %v5714_v7 }
 0x10d   : > { %v430_v9 = vpop.trf.xlu0 }
 0x10e   : > { %v6094_v10 = vpack.c.bf16 %v430_v9, %v429_v6 }
 0x110   : > { %6162 = vst [vmem:[#allocation3 + $0x58] sm:$0xff] %v6094_v10  }
 0x115   : > { %v431_v12 = vpop.trf.xlu0 }
 0x117   : > { %v5715_v13 = vld [vmem:[#allocation3 + $0x58] sm:$0xff] }
 0x118   : > { %893 = vmatmul.bf16.gmra.mxu0 %v5715_v13  ;;  %982 = vmatmul.bf16.gmra.mxu1 %v5715_v13 }
 0x119   : > { %1071 = vmatmul.bf16.gmra.mxu2 %v5715_v13  ;;  %1160 = vmatmul.bf16.gmra.mxu3 %v5715_v13 }
 0x11d   : > { %v432_v14 = vpop.trf.xlu0 }
 0x11e   : > { %v6099_v15 = vpack.c.bf16 %v432_v14, %v431_v12  ;;  %v506_v24 = vpop.trf.xlu1 }
 0x120   : > { %6163 = vst [vmem:[#allocation3 + $0x18] sm:$0xff] %v6099_v15  }
 0x125   : > { %v433_v16 = vpop.trf.xlu0 }
 0x126   : > { %v507_v27 = vpop.trf.xlu1 }
 0x127   : > { %v5716_v17 = vld [vmem:[#allocation3 + $0x18] sm:$0xff]  ;;  %v6124_v28 = vpack.c.bf16 %v507_v27, %v506_v24 }
 0x128   : > { %898 = vmatmul.bf16.gmra.mxu0 %v5716_v17  ;;  %987 = vmatmul.bf16.gmra.mxu1 %v5716_v17 }
 0x129   : > { %1076 = vmatmul.bf16.gmra.mxu2 %v5716_v17  ;;  %1165 = vmatmul.bf16.gmra.mxu3 %v5716_v17  ;;  %6125 = vst [vmem:[#allocation3 + $0x40] sm:$0xff] %v6124_v28  }
 0x12d   : > { %v434_v18 = vpop.trf.xlu0 }
 0x12e   : > { %v6104_v19 = vpack.c.bf16 %v434_v18, %v433_v16  ;;  %v508_v31 = vpop.trf.xlu1 }
 0x130   : > { %6164 = vst [vmem:[#allocation3 + $0x50] sm:$0xff] %v6104_v19   ;;  %v5721_v45 = vld [vmem:[#allocation3 + $0x40] sm:$0xff] }
 0x135   : > { %v435_v20 = vpop.trf.xlu0 }
 0x136   : > { %v509_v34 = vpop.trf.xlu1 }
 0x137   : > { %v5717_v21 = vld [vmem:[#allocation3 + $0x50] sm:$0xff]  ;;  %v6129_v35 = vpack.c.bf16 %v509_v34, %v508_v31 }
 0x138   : > { %903 = vmatmul.bf16.gmra.mxu0 %v5717_v21  ;;  %992 = vmatmul.bf16.gmra.mxu1 %v5717_v21 }
 0x139   : > { %1081 = vmatmul.bf16.gmra.mxu2 %v5717_v21  ;;  %1170 = vmatmul.bf16.gmra.mxu3 %v5717_v21  ;;  %6168 = vst [vmem:[#allocation3 + $0x20] sm:$0xff] %v6129_v35  }
 0x13d   : > { %v436_v22 = vpop.trf.xlu0 }
 0x13e   : > { %v6109_v23 = vpack.c.bf16 %v436_v22, %v435_v20  ;;  %v510_v38 = vpop.trf.xlu1 }
 0x140   : > { %6165 = vst [vmem:[#allocation3 + $0x68] sm:$0xff] %v6109_v23   ;;  %v5722_v63 = vld [vmem:[#allocation3 + $0x20] sm:$0xff] }
 0x145   : > { %v437_v25 = vpop.trf.xlu0 }
 0x146   : > { %v511_v40 = vpop.trf.xlu1 }
 0x147   : > { %v5718_v26 = vld [vmem:[#allocation3 + $0x68] sm:$0xff]  ;;  %v6134_v41 = vpack.c.bf16 %v511_v40, %v510_v38 }
 0x148   : > { %908 = vmatmul.bf16.gmra.mxu0 %v5718_v26  ;;  %997 = vmatmul.bf16.gmra.mxu1 %v5718_v26 }
 0x149   : > { %1086 = vmatmul.bf16.gmra.mxu2 %v5718_v26  ;;  %1175 = vmatmul.bf16.gmra.mxu3 %v5718_v26  ;;  %6169 = vst [vmem:[#allocation3 + $0x10] sm:$0xff] %v6134_v41  }
 0x14d   : > { %v438_v29 = vpop.trf.xlu0 }
 0x14e   : > { %v6114_v30 = vpack.c.bf16 %v438_v29, %v437_v25  ;;  %v512_v42 = vpop.trf.xlu1 }
 0x150   : > { %6166 = vst [vmem:[#allocation3 + $0x8] sm:$0xff] %v6114_v30   ;;  %v5723_v19 = vld [vmem:[#allocation3 + $0x10] sm:$0xff] }
 0x155   : > { %v439_v32 = vpop.trf.xlu0 }
 0x156   : > { %v513_v46 = vpop.trf.xlu1 }
 0x157   : > { %v5719_v33 = vld [vmem:[#allocation3 + $0x8] sm:$0xff]  ;;  %v6139_v47 = vpack.c.bf16 %v513_v46, %v512_v42 }
 0x158   : > { %913 = vmatmul.bf16.gmra.mxu0 %v5719_v33  ;;  %1002 = vmatmul.bf16.gmra.mxu1 %v5719_v33 }
 0x159   : > { %1091 = vmatmul.bf16.gmra.mxu2 %v5719_v33  ;;  %1180 = vmatmul.bf16.gmra.mxu3 %v5719_v33  ;;  %6170 = vst [vmem:[#allocation3 + $0x38] sm:$0xff] %v6139_v47  }
 0x15d   : > { %v440_v36 = vpop.trf.xlu0 }
 0x15e   : > { %v6119_v37 = vpack.c.bf16 %v440_v36, %v439_v32  ;;  %v514_v54 = vpop.trf.xlu1 }
 0x160   : > { %6167 = vst [vmem:[#allocation3 + $0x48] sm:$0xff] %v6119_v37  }
 0x166   : > { %v515_v0 = vpop.trf.xlu1 }
 0x167   : > { %v5720_v39 = vld [vmem:[#allocation3 + $0x48] sm:$0xff]  ;;  %v6144_v1 = vpack.c.bf16 %v515_v0, %v514_v54 }
 0x168   : > { %918 = vmatmul.bf16.gmra.mxu0 %v5720_v39  ;;  %1007 = vmatmul.bf16.gmra.mxu1 %v5720_v39 }
 0x169   : > { %1096 = vmatmul.bf16.gmra.mxu2 %v5720_v39  ;;  %1185 = vmatmul.bf16.gmra.mxu3 %v5720_v39  ;;  %6171 = vst [vmem:[#allocation3 + $0x60] sm:$0xff] %v6144_v1   ;;  %v5724_v39 = vld [vmem:[#allocation3 + $0x38] sm:$0xff] }
 0x16e   : > { %v516_v10 = vpop.trf.xlu1 }
 0x175   : > { %v884_v43 = vpop.f32.mrf.mxu0  ;;  %v973_v44 = vpop.f32.mrf.mxu1 }
 0x176   : > { %v517_v20 = vpop.trf.xlu1 }
 0x177   : > { %v6149_v21 = vpack.c.bf16 %v517_v20, %v516_v10 }
 0x178   : > { %923 = vmatmul.bf16.gmra.mxu0 %v5721_v45  ;;  %1012 = vmatmul.bf16.gmra.mxu1 %v5721_v45 }
 0x179   : > { %1101 = vmatmul.bf16.gmra.mxu2 %v5721_v45  ;;  %1190 = vmatmul.bf16.gmra.mxu3 %v5721_v45  ;;  %6172 = vst [vmem:[#allocation3 + $0x70] sm:$0xff] %v6149_v21  }
 0x17c   : > { %v1062_v48 = vpop.f32.mrf.mxu2  ;;  %v1151_v49 = vpop.f32.mrf.mxu3 }
 0x17d   : > { %v886_v50 = vpop.f32.mrf.mxu0  ;;  %v975_v51 = vpop.f32.mrf.mxu1 }
 0x17e   : > { %v1231_v52 = vmax.f32 %v884_v43, %v886_v50  ;;  %v1252_v53 = vmax.f32 %v973_v44, %v975_v51  ;;  %v518_v30 = vpop.trf.xlu1 }
 0x184   : > { %v1064_v55 = vpop.f32.mrf.mxu2  ;;  %v1153_v56 = vpop.f32.mrf.mxu3 }
 0x185   : > { %v1273_v57 = vmax.f32 %v1062_v48, %v1064_v55  ;;  %v1294_v58 = vmax.f32 %v1151_v49, %v1153_v56  ;;  %v889_v59 = vpop.f32.mrf.mxu0  ;;  %v978_v60 = vpop.f32.mrf.mxu1 }
 0x186   : > { %v1232_v61 = vmax.f32 %v1231_v52, %v889_v59  ;;  %v1253_v62 = vmax.f32 %v1252_v53, %v978_v60  ;;  %v519_v40 = vpop.trf.xlu1  ;;  %v5725_v59 = vld [vmem:[#allocation3 + $0x60] sm:$0xff] }
 0x187   : > { %v6154_v41 = vpack.c.bf16 %v519_v40, %v518_v30 }
 0x188   : > { %928 = vmatmul.bf16.gmra.mxu0 %v5722_v63  ;;  %1017 = vmatmul.bf16.gmra.mxu1 %v5722_v63 }
 0x189   : > { %1106 = vmatmul.bf16.gmra.mxu2 %v5722_v63  ;;  %1195 = vmatmul.bf16.gmra.mxu3 %v5722_v63  ;;  %6173 = vst [vmem:[#allocation3 + $0x78] sm:$0xff] %v6154_v41  }
 0x18c   : > { %v1067_v2 = vpop.f32.mrf.mxu2  ;;  %v1156_v3 = vpop.f32.mrf.mxu3 }
 0x18d   : > { %v1274_v4 = vmax.f32 %v1273_v57, %v1067_v2  ;;  %v1295_v5 = vmax.f32 %v1294_v58, %v1156_v3  ;;  %v891_v6 = vpop.f32.mrf.mxu0  ;;  %v980_v7 = vpop.f32.mrf.mxu1 }
 0x18e   : > { %v1233_v8 = vmax.f32 %v1232_v61, %v891_v6  ;;  %v1254_v9 = vmax.f32 %v1253_v62, %v980_v7  ;;  %v520_v50 = vpop.trf.xlu1 }
 0x194   : > { %v1069_v11 = vpop.f32.mrf.mxu2  ;;  %v1158_v12 = vpop.f32.mrf.mxu3 }
 0x195   : > { %v1275_v13 = vmax.f32 %v1274_v4, %v1069_v11  ;;  %v1296_v14 = vmax.f32 %v1295_v5, %v1158_v12  ;;  %v894_v15 = vpop.f32.mrf.mxu0  ;;  %v983_v16 = vpop.f32.mrf.mxu1 }
 0x196   : > { %v1234_v17 = vmax.f32 %v1233_v8, %v894_v15  ;;  %v1255_v18 = vmax.f32 %v1254_v9, %v983_v16  ;;  %v521_v60 = vpop.trf.xlu1 }
 0x197   : > { %v6159_v61 = vpack.c.bf16 %v521_v60, %v520_v50 }
 0x198   : > { %933 = vmatmul.bf16.gmra.mxu0 %v5723_v19  ;;  %1022 = vmatmul.bf16.gmra.mxu1 %v5723_v19 }
 0x199   : > { %1111 = vmatmul.bf16.gmra.mxu2 %v5723_v19  ;;  %1200 = vmatmul.bf16.gmra.mxu3 %v5723_v19  ;;  %6174 = vst [vmem:[#allocation3 + $0x28] sm:$0xff] %v6159_v61  }
 0x19c   : > { %v1072_v22 = vpop.f32.mrf.mxu2  ;;  %v1161_v23 = vpop.f32.mrf.mxu3 }
 0x19d   : > { %v1276_v24 = vmax.f32 %v1275_v13, %v1072_v22  ;;  %v1297_v25 = vmax.f32 %v1296_v14, %v1161_v23  ;;  %v896_v26 = vpop.f32.mrf.mxu0  ;;  %v985_v27 = vpop.f32.mrf.mxu1  ;;  %v5726_v14 = vld [vmem:[#allocation3 + $0x70] sm:$0xff] }
 0x19e   : > { %v1235_v28 = vmax.f32 %v1234_v17, %v896_v26  ;;  %v1256_v29 = vmax.f32 %v1255_v18, %v985_v27 }
 0x1a4   : > { %v1074_v31 = vpop.f32.mrf.mxu2  ;;  %v1163_v32 = vpop.f32.mrf.mxu3 }
 0x1a5   : > { %v1277_v33 = vmax.f32 %v1276_v24, %v1074_v31  ;;  %v1298_v34 = vmax.f32 %v1297_v25, %v1163_v32  ;;  %v899_v35 = vpop.f32.mrf.mxu0  ;;  %v988_v36 = vpop.f32.mrf.mxu1  ;;  %v5727_v31 = vld [vmem:[#allocation3 + $0x78] sm:$0xff] }
 0x1a6   : > { %v1236_v37 = vmax.f32 %v1235_v28, %v899_v35  ;;  %v1257_v38 = vmax.f32 %v1256_v29, %v988_v36 }
 0x1a8   : > { %938 = vmatmul.bf16.gmra.mxu0 %v5724_v39  ;;  %1027 = vmatmul.bf16.gmra.mxu1 %v5724_v39 }
 0x1a9   : > { %1116 = vmatmul.bf16.gmra.mxu2 %v5724_v39  ;;  %1205 = vmatmul.bf16.gmra.mxu3 %v5724_v39 }
 0x1ac   : > { %v1077_v42 = vpop.f32.mrf.mxu2  ;;  %v1166_v43 = vpop.f32.mrf.mxu3 }
 0x1ad   : > { %v1278_v44 = vmax.f32 %v1277_v33, %v1077_v42  ;;  %v1299_v45 = vmax.f32 %v1298_v34, %v1166_v43  ;;  %v901_v46 = vpop.f32.mrf.mxu0  ;;  %v990_v47 = vpop.f32.mrf.mxu1 }
 0x1ae   : > { %v1237_v48 = vmax.f32 %v1236_v37, %v901_v46  ;;  %v1258_v49 = vmax.f32 %v1257_v38, %v990_v47 }
 0x1b4   : > { %v1079_v51 = vpop.f32.mrf.mxu2  ;;  %v1168_v52 = vpop.f32.mrf.mxu3 }
 0x1b5   : > { %v1279_v53 = vmax.f32 %v1278_v44, %v1079_v51  ;;  %v1300_v54 = vmax.f32 %v1299_v45, %v1168_v52  ;;  %v904_v55 = vpop.f32.mrf.mxu0  ;;  %v993_v56 = vpop.f32.mrf.mxu1 }
 0x1b6   : > { %v1238_v57 = vmax.f32 %v1237_v48, %v904_v55  ;;  %v1259_v58 = vmax.f32 %v1258_v49, %v993_v56  ;;  %v5728_v48 = vld [vmem:[#allocation3 + $0x28] sm:$0xff] }
 0x1b8   : > { %943 = vmatmul.bf16.gmra.mxu0 %v5725_v59  ;;  %1032 = vmatmul.bf16.gmra.mxu1 %v5725_v59 }
 0x1b9   : > { %1121 = vmatmul.bf16.gmra.mxu2 %v5725_v59  ;;  %1210 = vmatmul.bf16.gmra.mxu3 %v5725_v59 }
 0x1bc   : > { %v1082_v62 = vpop.f32.mrf.mxu2  ;;  %v1171_v63 = vpop.f32.mrf.mxu3 }
 0x1bd   : > { %v1280_v0 = vmax.f32 %v1279_v53, %v1082_v62  ;;  %v1301_v1 = vmax.f32 %v1300_v54, %v1171_v63  ;;  %v906_v2 = vpop.f32.mrf.mxu0  ;;  %v995_v3 = vpop.f32.mrf.mxu1 }
 0x1be   : > { %v1239_v4 = vmax.f32 %v1238_v57, %v906_v2  ;;  %v1260_v5 = vmax.f32 %v1259_v58, %v995_v3 }
 0x1c4   : > { %v1084_v6 = vpop.f32.mrf.mxu2  ;;  %v1173_v7 = vpop.f32.mrf.mxu3 }
 0x1c5   : > { %v1281_v8 = vmax.f32 %v1280_v0, %v1084_v6  ;;  %v1302_v9 = vmax.f32 %v1301_v1, %v1173_v7  ;;  %v909_v10 = vpop.f32.mrf.mxu0  ;;  %v998_v11 = vpop.f32.mrf.mxu1 }
 0x1c6   : > { %v1240_v12 = vmax.f32 %v1239_v4, %v909_v10  ;;  %v1261_v13 = vmax.f32 %v1260_v5, %v998_v11 }
 0x1c8   : > { %948 = vmatmul.bf16.gmra.mxu0 %v5726_v14  ;;  %1037 = vmatmul.bf16.gmra.mxu1 %v5726_v14 }
 0x1c9   : > { %1126 = vmatmul.bf16.gmra.mxu2 %v5726_v14  ;;  %1215 = vmatmul.bf16.gmra.mxu3 %v5726_v14 }
 0x1cc   : > { %v1087_v15 = vpop.f32.mrf.mxu2  ;;  %v1176_v16 = vpop.f32.mrf.mxu3 }
 0x1cd   : > { %v1282_v17 = vmax.f32 %v1281_v8, %v1087_v15  ;;  %v1303_v18 = vmax.f32 %v1302_v9, %v1176_v16  ;;  %v911_v19 = vpop.f32.mrf.mxu0  ;;  %v1000_v20 = vpop.f32.mrf.mxu1 }
 0x1ce   : > { %v1241_v21 = vmax.f32 %v1240_v12, %v911_v19  ;;  %v1262_v22 = vmax.f32 %v1261_v13, %v1000_v20 }
 0x1d4   : > { %v1089_v23 = vpop.f32.mrf.mxu2  ;;  %v1178_v24 = vpop.f32.mrf.mxu3 }
 0x1d5   : > { %v1283_v25 = vmax.f32 %v1282_v17, %v1089_v23  ;;  %v1304_v26 = vmax.f32 %v1303_v18, %v1178_v24  ;;  %v914_v27 = vpop.f32.mrf.mxu0  ;;  %v1003_v28 = vpop.f32.mrf.mxu1 }
 0x1d6   : > { %v1242_v29 = vmax.f32 %v1241_v21, %v914_v27  ;;  %v1263_v30 = vmax.f32 %v1262_v22, %v1003_v28 }
 0x1d8   : > { %953 = vmatmul.bf16.gmra.mxu0 %v5727_v31  ;;  %1042 = vmatmul.bf16.gmra.mxu1 %v5727_v31 }
 0x1d9   : > { %1131 = vmatmul.bf16.gmra.mxu2 %v5727_v31  ;;  %1220 = vmatmul.bf16.gmra.mxu3 %v5727_v31 }
 0x1dc   : > { %v1092_v32 = vpop.f32.mrf.mxu2  ;;  %v1181_v33 = vpop.f32.mrf.mxu3 }
 0x1dd   : > { %v1284_v34 = vmax.f32 %v1283_v25, %v1092_v32  ;;  %v1305_v35 = vmax.f32 %v1304_v26, %v1181_v33  ;;  %v916_v36 = vpop.f32.mrf.mxu0  ;;  %v1005_v37 = vpop.f32.mrf.mxu1 }
 0x1de   : > { %v1243_v38 = vmax.f32 %v1242_v29, %v916_v36  ;;  %v1264_v39 = vmax.f32 %v1263_v30, %v1005_v37 }
 0x1e4   : > { %v1094_v40 = vpop.f32.mrf.mxu2  ;;  %v1183_v41 = vpop.f32.mrf.mxu3 }
 0x1e5   : > { %v1285_v42 = vmax.f32 %v1284_v34, %v1094_v40  ;;  %v1306_v43 = vmax.f32 %v1305_v35, %v1183_v41  ;;  %v919_v44 = vpop.f32.mrf.mxu0  ;;  %v1008_v45 = vpop.f32.mrf.mxu1 }
 0x1e6   : > { %v1244_v46 = vmax.f32 %v1243_v38, %v919_v44  ;;  %v1265_v47 = vmax.f32 %v1264_v39, %v1008_v45 }
 0x1e8   : > { %958 = vmatmul.bf16.gmra.mxu0 %v5728_v48  ;;  %1047 = vmatmul.bf16.gmra.mxu1 %v5728_v48 }
 0x1e9   : > { %1136 = vmatmul.bf16.gmra.mxu2 %v5728_v48  ;;  %1225 = vmatmul.bf16.gmra.mxu3 %v5728_v48 }
 0x1ec   : > { %v1097_v49 = vpop.f32.mrf.mxu2  ;;  %v1186_v50 = vpop.f32.mrf.mxu3 }
 0x1ed   : > { %v1286_v51 = vmax.f32 %v1285_v42, %v1097_v49  ;;  %v1307_v52 = vmax.f32 %v1306_v43, %v1186_v50  ;;  %v921_v53 = vpop.f32.mrf.mxu0  ;;  %v1010_v54 = vpop.f32.mrf.mxu1 }
 0x1ee   : > { %v1245_v55 = vmax.f32 %v1244_v46, %v921_v53  ;;  %v1266_v56 = vmax.f32 %v1265_v47, %v1010_v54 }
 0x1f0   : > { %v1246_v57 = vrot.slane %v1245_v55, 4  ;;  %v1267_v58 = vrot.slane %v1266_v56, 4 }
 0x1f2   : > { %v1247_v59 = vmax.f32 %v1245_v55, %v1246_v57  ;;  %v1268_v60 = vmax.f32 %v1266_v56, %v1267_v58 }
 0x1f4   : > { %v1248_v61 = vrot.slane %v1247_v59, 2  ;;  %v1269_v62 = vrot.slane %v1268_v60, 2  ;;  %v1099_v63 = vpop.f32.mrf.mxu2  ;;  %v1188_v0 = vpop.f32.mrf.mxu3 }
 0x1f5   : > { %v1287_v1 = vmax.f32 %v1286_v51, %v1099_v63  ;;  %v1308_v2 = vmax.f32 %v1307_v52, %v1188_v0  ;;  %v924_v3 = vpop.f32.mrf.mxu0  ;;  %v1013_v4 = vpop.f32.mrf.mxu1 }
 0x1f6   : > { %v1249_v5 = vmax.f32 %v1247_v59, %v1248_v61  ;;  %v1270_v6 = vmax.f32 %v1268_v60, %v1269_v62 }
 0x1f7   : > { %v1288_v7 = vrot.slane %v1287_v1, 4  ;;  %v1309_v8 = vrot.slane %v1308_v2, 4 }
 0x1f8   : > { %v1250_v9 = vrot.slane %v1249_v5, 1  ;;  %v1271_v10 = vrot.slane %v1270_v6, 1 }
 0x1f9   : > { %v1289_v11 = vmax.f32 %v1287_v1, %v1288_v7  ;;  %v1310_v12 = vmax.f32 %v1308_v2, %v1309_v8 }
 0x1fa   : > { %v1272_v13 = vmax.f32 %v1270_v6, %v1271_v10  ;;  %v1251_v16 = vmax.f32 %v1249_v5, %v1250_v9 }
 0x1fb   : > { %v1290_v14 = vrot.slane %v1289_v11, 2  ;;  %v1311_v15 = vrot.slane %v1310_v12, 2 }
 0x1fc   : > { %v1408_v17 = vrot.slane %v1272_v13, 6  ;;  %v1102_v18 = vpop.f32.mrf.mxu2  ;;  %v1191_v19 = vpop.f32.mrf.mxu3 }
 0x1fd   : > { %v1291_v20 = vmax.f32 %v1289_v11, %v1290_v14  ;;  %v1312_v21 = vmax.f32 %v1310_v12, %v1311_v15  ;;  %v926_v22 = vpop.f32.mrf.mxu0  ;;  %v1015_v23 = vpop.f32.mrf.mxu1 }
 0x1fe   : > { %v1415_v24 = vsel %vm1414_vm0, %v1251_v16, %v1408_v17  ;;  %v1315_v25 = vmax.f32 %v924_v3, %v926_v22  ;;  %v1336_v26 = vmax.f32 %v1013_v4, %v1015_v23 }
 0x1ff   : > { %v1292_v27 = vrot.slane %v1291_v20, 1  ;;  %v1313_v28 = vrot.slane %v1312_v21, 1 }
 0x201   : > { %v1293_v29 = vmax.f32 %v1291_v20, %v1292_v27  ;;  %v1314_v30 = vmax.f32 %v1312_v21, %v1313_v28 }
 0x203   : > { %v1409_v31 = vrot.slane %v1293_v29, 4  ;;  %v1410_v32 = vrot.slane %v1314_v30, 2 }
 0x204   : > { %v1104_v33 = vpop.f32.mrf.mxu2  ;;  %v1193_v34 = vpop.f32.mrf.mxu3 }
 0x205   : > { %v1417_v35 = vsel %vm1416_vm1, %v1409_v31, %v1410_v32  ;;  %v1357_v36 = vmax.f32 %v1102_v18, %v1104_v33  ;;  %v1378_v37 = vmax.f32 %v1191_v19, %v1193_v34  ;;  %v929_v38 = vpop.f32.mrf.mxu0  ;;  %v1018_v39 = vpop.f32.mrf.mxu1 }
 0x206   : > { %v6790_v40 = vsel %vm1418_vm2, %v1415_v24, %v1417_v35  ;;  %v1316_v41 = vmax.f32 %v1315_v25, %v929_v38  ;;  %v1337_v42 = vmax.f32 %v1336_v26, %v1018_v39 }
 0x20c   : > { %v1107_v43 = vpop.f32.mrf.mxu2  ;;  %v1196_v44 = vpop.f32.mrf.mxu3 }
 0x20d   : > { %v1358_v45 = vmax.f32 %v1357_v36, %v1107_v43  ;;  %v1379_v46 = vmax.f32 %v1378_v37, %v1196_v44  ;;  %v931_v47 = vpop.f32.mrf.mxu0  ;;  %v1020_v48 = vpop.f32.mrf.mxu1 }
 0x20e   : > { %v1317_v49 = vmax.f32 %v1316_v41, %v931_v47  ;;  %v1338_v50 = vmax.f32 %v1337_v42, %v1020_v48 }
 0x214   : > { %v1109_v51 = vpop.f32.mrf.mxu2  ;;  %v1198_v52 = vpop.f32.mrf.mxu3 }
 0x215   : > { %v1359_v53 = vmax.f32 %v1358_v45, %v1109_v51  ;;  %v1380_v54 = vmax.f32 %v1379_v46, %v1198_v52  ;;  %v934_v55 = vpop.f32.mrf.mxu0  ;;  %v1023_v56 = vpop.f32.mrf.mxu1 }
 0x216   : > { %v1318_v57 = vmax.f32 %v1317_v49, %v934_v55  ;;  %v1339_v58 = vmax.f32 %v1338_v50, %v1023_v56 }
 0x21c   : > { %v1112_v59 = vpop.f32.mrf.mxu2  ;;  %v1201_v60 = vpop.f32.mrf.mxu3 }
 0x21d   : > { %v1360_v61 = vmax.f32 %v1359_v53, %v1112_v59  ;;  %v1381_v62 = vmax.f32 %v1380_v54, %v1201_v60  ;;  %v936_v63 = vpop.f32.mrf.mxu0  ;;  %v1025_v0 = vpop.f32.mrf.mxu1 }
 0x21e   : > { %v1319_v29 = vmax.f32 %v1318_v57, %v936_v63  ;;  %v1340_v30 = vmax.f32 %v1339_v58, %v1025_v0 }
 0x224   : > { %v1114_v1 = vpop.f32.mrf.mxu2  ;;  %v1203_v2 = vpop.f32.mrf.mxu3 }
 0x225   : > { %v939_v3 = vpop.f32.mrf.mxu0  ;;  %v1028_v4 = vpop.f32.mrf.mxu1  ;;  %v1361_v42 = vmax.f32 %v1360_v61, %v1114_v1  ;;  %v1382_v43 = vmax.f32 %v1381_v62, %v1203_v2 }
 0x226   : > { %v1320_v31 = vmax.f32 %v1319_v29, %v939_v3  ;;  %v1341_v32 = vmax.f32 %v1340_v30, %v1028_v4 }
 0x22c   : > { %v1117_v5 = vpop.f32.mrf.mxu2  ;;  %v1206_v6 = vpop.f32.mrf.mxu3 }
 0x22d   : > { %v941_v7 = vpop.f32.mrf.mxu0  ;;  %v1030_v8 = vpop.f32.mrf.mxu1  ;;  %v1362_v46 = vmax.f32 %v1361_v42, %v1117_v5  ;;  %v1383_v47 = vmax.f32 %v1382_v43, %v1206_v6 }
 0x22e   : > { %v1321_v37 = vmax.f32 %v1320_v31, %v941_v7  ;;  %v1342_v38 = vmax.f32 %v1341_v32, %v1030_v8 }
 0x234   : > { %v1119_v9 = vpop.f32.mrf.mxu2  ;;  %v1208_v10 = vpop.f32.mrf.mxu3 }
 0x235   : > { %v944_v11 = vpop.f32.mrf.mxu0  ;;  %v1033_v12 = vpop.f32.mrf.mxu1  ;;  %v1363_v52 = vmax.f32 %v1362_v46, %v1119_v9  ;;  %v1384_v53 = vmax.f32 %v1383_v47, %v1208_v10 }
 0x236   : > { %v1322_v39 = vmax.f32 %v1321_v37, %v944_v11  ;;  %v1343_v41 = vmax.f32 %v1342_v38, %v1033_v12 }
 0x23c   : > { %v1122_v13 = vpop.f32.mrf.mxu2  ;;  %v1211_v14 = vpop.f32.mrf.mxu3 }
 0x23d   : > { %v946_v15 = vpop.f32.mrf.mxu0  ;;  %v1035_v16 = vpop.f32.mrf.mxu1  ;;  %v1364_v58 = vmax.f32 %v1363_v52, %v1122_v13  ;;  %v1385_v59 = vmax.f32 %v1384_v53, %v1211_v14 }
 0x23e   : > { %v1323_v44 = vmax.f32 %v1322_v39, %v946_v15  ;;  %v1344_v45 = vmax.f32 %v1343_v41, %v1035_v16 }
 0x244   : > { %v1124_v17 = vpop.f32.mrf.mxu2  ;;  %v1213_v18 = vpop.f32.mrf.mxu3 }
 0x245   : > { %v949_v19 = vpop.f32.mrf.mxu0  ;;  %v1038_v20 = vpop.f32.mrf.mxu1  ;;  %v1365_v61 = vmax.f32 %v1364_v58, %v1124_v17  ;;  %v1386_v62 = vmax.f32 %v1385_v59, %v1213_v18 }
 0x246   : > { %v1324_v48 = vmax.f32 %v1323_v44, %v949_v19  ;;  %v1345_v49 = vmax.f32 %v1344_v45, %v1038_v20 }
 0x24c   : > { %v1127_v21 = vpop.f32.mrf.mxu2  ;;  %v1216_v22 = vpop.f32.mrf.mxu3 }
 0x24d   : > { %v951_v23 = vpop.f32.mrf.mxu0  ;;  %v1040_v24 = vpop.f32.mrf.mxu1  ;;  %v1366_v2 = vmax.f32 %v1365_v61, %v1127_v21  ;;  %v1387_v3 = vmax.f32 %v1386_v62, %v1216_v22 }
 0x24e   : > { %v1325_v56 = vmax.f32 %v1324_v48, %v951_v23  ;;  %v1346_v57 = vmax.f32 %v1345_v49, %v1040_v24 }
 0x254   : > { %v1129_v25 = vpop.f32.mrf.mxu2  ;;  %v1218_v26 = vpop.f32.mrf.mxu3 }
 0x255   : > { %v954_v27 = vpop.f32.mrf.mxu0  ;;  %v1043_v28 = vpop.f32.mrf.mxu1  ;;  %v1367_v8 = vmax.f32 %v1366_v2, %v1129_v25  ;;  %v1388_v9 = vmax.f32 %v1387_v3, %v1218_v26 }
 0x256   : > { %v1326_v60 = vmax.f32 %v1325_v56, %v954_v27  ;;  %v1347_v63 = vmax.f32 %v1346_v57, %v1043_v28  ;;  %v1399_v57 = vld [vmem:[#allocation2] sm:$0xff] }
 0x25c   : > { %v1132_v33 = vpop.f32.mrf.mxu2  ;;  %v1221_v34 = vpop.f32.mrf.mxu3 }
 0x25d   : > { %v956_v35 = vpop.f32.mrf.mxu0  ;;  %v1045_v36 = vpop.f32.mrf.mxu1  ;;  %v1368_v13 = vmax.f32 %v1367_v8, %v1132_v33  ;;  %v1389_v14 = vmax.f32 %v1388_v9, %v1221_v34 }
 0x25e   : > { %v1327_v0 = vmax.f32 %v1326_v60, %v956_v35  ;;  %v1348_v1 = vmax.f32 %v1347_v63, %v1045_v36 }
 0x264   : > { %v1134_v50 = vpop.f32.mrf.mxu2  ;;  %v1223_v51 = vpop.f32.mrf.mxu3 }
 0x265   : > { %v959_v54 = vpop.f32.mrf.mxu0  ;;  %v1048_v55 = vpop.f32.mrf.mxu1  ;;  %v1369_v17 = vmax.f32 %v1368_v13, %v1134_v50  ;;  %v1390_v18 = vmax.f32 %v1389_v14, %v1223_v51 }
 0x266   : > { %v1328_v4 = vmax.f32 %v1327_v0, %v959_v54  ;;  %v1349_v5 = vmax.f32 %v1348_v1, %v1048_v55 }
 0x26c   : > { %v1137_v6 = vpop.f32.mrf.mxu2  ;;  %v1226_v7 = vpop.f32.mrf.mxu3 }
 0x26d   : > { %v961_v10 = vpop.f32.mrf.mxu0  ;;  %v1050_v11 = vpop.f32.mrf.mxu1  ;;  %v1370_v21 = vmax.f32 %v1369_v17, %v1137_v6  ;;  %v1391_v22 = vmax.f32 %v1390_v18, %v1226_v7 }
 0x26e   : > { %v1329_v12 = vmax.f32 %v1328_v4, %v961_v10  ;;  %v1350_v15 = vmax.f32 %v1349_v5, %v1050_v11 }
 0x270   : > { %v1330_v16 = vrot.slane %v1329_v12, 4  ;;  %v1351_v19 = vrot.slane %v1350_v15, 4 }
 0x272   : > { %v1331_v20 = vmax.f32 %v1329_v12, %v1330_v16  ;;  %v1352_v23 = vmax.f32 %v1350_v15, %v1351_v19 }
 0x274   : > { %v1332_v24 = vrot.slane %v1331_v20, 2  ;;  %v1353_v27 = vrot.slane %v1352_v23, 2  ;;  %v1139_v28 = vpop.f32.mrf.mxu2  ;;  %v1228_v29 = vpop.f32.mrf.mxu3 }
 0x275   : > { %v1371_v25 = vmax.f32 %v1370_v21, %v1139_v28  ;;  %v1392_v26 = vmax.f32 %v1391_v22, %v1228_v29 }
 0x276   : > { %v1333_v30 = vmax.f32 %v1331_v20, %v1332_v24  ;;  %v1354_v31 = vmax.f32 %v1352_v23, %v1353_v27 }
 0x277   : > { %v1372_v32 = vrot.slane %v1371_v25, 4  ;;  %v1393_v35 = vrot.slane %v1392_v26, 4 }
 0x278   : > { %v1334_v33 = vrot.slane %v1333_v30, 1  ;;  %v1355_v34 = vrot.slane %v1354_v31, 1 }
 0x279   : > { %v1373_v36 = vmax.f32 %v1371_v25, %v1372_v32  ;;  %v1394_v37 = vmax.f32 %v1392_v26, %v1393_v35 }
 0x27a   : > { %v1356_v38 = vmax.f32 %v1354_v31, %v1355_v34  ;;  %v1335_v42 = vmax.f32 %v1333_v30, %v1334_v33 }
 0x27b   : > { %v1374_v39 = vrot.slane %v1373_v36, 2  ;;  %v1395_v41 = vrot.slane %v1394_v37, 2 }
 0x27c   : > { %v1411_v43 = vrot.slane %v1356_v38, 6 }
 0x27d   : > { %v1375_v44 = vmax.f32 %v1373_v36, %v1374_v39  ;;  %v1396_v45 = vmax.f32 %v1394_v37, %v1395_v41 }
 0x27e   : > { %v1420_v46 = vsel %vm1414_vm0, %v1335_v42, %v1411_v43 }
 0x27f   : > { %v1376_v47 = vrot.slane %v1375_v44, 1  ;;  %v1397_v48 = vrot.slane %v1396_v45, 1 }
 0x281   : > { %v1377_v49 = vmax.f32 %v1375_v44, %v1376_v47  ;;  %v1398_v50 = vmax.f32 %v1396_v45, %v1397_v48 }
 0x283   : > { %v1412_v51 = vrot.slane %v1377_v49, 4  ;;  %v1413_v52 = vrot.slane %v1398_v50, 2 }
 0x285   : > { %v1421_v53 = vsel %vm1416_vm1, %v1412_v51, %v1413_v52 }
 0x286   : > { %v1422_v54 = vsel %vm1418_vm2, %v1420_v46, %v1421_v53 }
 0x287   : > { %v1427_v55 = vrot.slane %v1422_v54, 7 }
 0x289   : > { %v1429_v56 = vsel %vm1428_vm3, %v1427_v55, %v6790_v40 }
 0x28a   : > { %v1431_v58 = vsel %vm1430_vm4, %v1427_v55, %v1429_v56 }
 0x28b   : > { %v1433_v59 = vsel %vm1432_vm5, %v1427_v55, %v1431_v58  ;;  %1442 = sbr.rel (%p4428_p1) target bundleno = 1227 (0x4cb), region = 80 }
 0x28c   : > { %v1435_v60 = vsel %vm1434_vm6, %v1427_v55, %v1433_v59 }
 0x28d   : > { %v1437_v63 = vmax.f32 %v1399_v57, %v1435_v60 }
 0x28f   : > { %1438 = vst [vmem:[#allocation2] sm:$0xff] %v1437_v63 }
 0x290   : > { %v4655_v61 = vld [vmem:[#allocation10 + $0x1c0] sm:$0xf] }
 0x291   : > { %v5821_v62 = vld [vmem:[#allocation10 + $0x1dc] sm:$0xf0] }
 0x292   : > { %v4911_v0 = vld [vmem:[#allocation10 + $0x3c0] sm:$0xf]  ;;  %v4656_v1 = vor.u32 %v5821_v62, %v4655_v61 }
 0x293   : > { %v5885_v2 = vld [vmem:[#allocation10 + $0x3dc] sm:$0xf0] }
 0x294   : > { %v5167_v3 = vld [vmem:[#allocation10 + $0x5c0] sm:$0xf]  ;;  %v4912_v5 = vor.u32 %v5885_v2, %v4911_v0  ;;  %3027 = vmatpush.bf16.msra.mxu0 %v4656_v1 }
 0x295   : > { %v5949_v4 = vld [vmem:[#allocation10 + $0x5dc] sm:$0xf0] }
 0x296   : > { %v5168_v6 = vor.u32 %v5949_v4, %v5167_v3  ;;  %v5423_v40 = vld [vmem:[#allocation10 + $0x7c0] sm:$0xf]  ;;  %3040 = vmatpush.bf16.msra.mxu1 %v4912_v5 }
 0x297   : > { %v6013_v7 = vld [vmem:[#allocation10 + $0x7dc] sm:$0xf0] }
 0x298   : > { %v4623_v8 = vld [vmem:[#allocation10 + $0x180] sm:$0xf]  ;;  %v5424_v9 = vor.u32 %v6013_v7, %v5423_v40  ;;  %3053 = vmatpush.bf16.msra.mxu2 %v5168_v6 }
 0x299   : > { %v5813_v10 = vld [vmem:[#allocation10 + $0x19c] sm:$0xf0] }
 0x29a   : > { %v4879_v11 = vld [vmem:[#allocation10 + $0x380] sm:$0xf]  ;;  %v4624_v15 = vor.u32 %v5813_v10, %v4623_v8  ;;  %3066 = vmatpush.bf16.msra.mxu3 %v5424_v9 }
 0x29b   : > { %v5877_v12 = vld [vmem:[#allocation10 + $0x39c] sm:$0xf0] }
 0x29c   : > { %v4880_v13 = vor.u32 %v5877_v12, %v4879_v11  ;;  %v5135_v14 = vld [vmem:[#allocation10 + $0x580] sm:$0xf]  ;;  %3028 = vmatpush.bf16.msra.mxu0 %v4624_v15 }
 0x29d   : > { %v5941_v16 = vld [vmem:[#allocation10 + $0x59c] sm:$0xf0] }
 0x29e   : > { %v5391_v19 = vld [vmem:[#allocation10 + $0x780] sm:$0xf]  ;;  %v5136_v17 = vor.u32 %v5941_v16, %v5135_v14  ;;  %3041 = vmatpush.bf16.msra.mxu1 %v4880_v13 }
 0x29f   : > { %v6005_v18 = vld [vmem:[#allocation10 + $0x79c] sm:$0xf0] }
 0x2a0   : > { %v4591_v20 = vld [vmem:[#allocation10 + $0x140] sm:$0xf]  ;;  %v5392_v21 = vor.u32 %v6005_v18, %v5391_v19  ;;  %3054 = vmatpush.bf16.msra.mxu2 %v5136_v17 }
 0x2a1   : > { %v5805_v23 = vld [vmem:[#allocation10 + $0x15c] sm:$0xf0] }
 0x2a2   : > { %v4847_v22 = vld [vmem:[#allocation10 + $0x340] sm:$0xf]  ;;  %v4592_v28 = vor.u32 %v5805_v23, %v4591_v20  ;;  %3067 = vmatpush.bf16.msra.mxu3 %v5392_v21 }
 0x2a3   : > { %v5869_v24 = vld [vmem:[#allocation10 + $0x35c] sm:$0xf0] }
 0x2a4   : > { %v5103_v27 = vld [vmem:[#allocation10 + $0x540] sm:$0xf]  ;;  %v4848_v30 = vor.u32 %v5869_v24, %v4847_v22  ;;  %3029 = vmatpush.bf16.msra.mxu0 %v4592_v28  ;;  %v4657_v28 = vld [vmem:[#allocation10 + $0x1e0] sm:$0xf0] }
 0x2a5   : > { %v5933_v29 = vld [vmem:[#allocation10 + $0x55c] sm:$0xf0] }
 0x2a6   : > { %v5359_v25 = vld [vmem:[#allocation10 + $0x740] sm:$0xf]  ;;  %v5104_v31 = vor.u32 %v5933_v29, %v5103_v27  ;;  %3042 = vmatpush.bf16.msra.mxu1 %v4848_v30  ;;  %v5817_v27 = vld [vmem:[#allocation10 + $0x1c4] sm:$0xf] }
 0x2a7   : > { %v5997_v26 = vld [vmem:[#allocation10 + $0x75c] sm:$0xf0]  ;;  %v5881_v29 = vld [vmem:[#allocation10 + $0x3c4] sm:$0xf] }
 0x2a8   : > { %v4559_v32 = vld [vmem:[#allocation10 + $0x100] sm:$0xf]  ;;  %v5360_v34 = vor.u32 %v5997_v26, %v5359_v25  ;;  %3055 = vmatpush.bf16.msra.mxu2 %v5104_v31  ;;  %v4913_v26 = vld [vmem:[#allocation10 + $0x3e0] sm:$0xf0] }
 0x2a9   : > { %v5797_v35 = vld [vmem:[#allocation10 + $0x11c] sm:$0xf0]  ;;  %v5945_v30 = vld [vmem:[#allocation10 + $0x5c4] sm:$0xf] }
 0x2aa   : > { %v4815_v33 = vld [vmem:[#allocation10 + $0x300] sm:$0xf]  ;;  %v4560_v42 = vor.u32 %v5797_v35, %v4559_v32  ;;  %3068 = vmatpush.bf16.msra.mxu3 %v5360_v34  ;;  %v5169_v31 = vld [vmem:[#allocation10 + $0x5e0] sm:$0xf0] }
 0x2ab   : > { %v5861_v36 = vld [vmem:[#allocation10 + $0x31c] sm:$0xf0]  ;;  %v5425_v34 = vld [vmem:[#allocation10 + $0x7e0] sm:$0xf0] }
 0x2ac   : > { %v5071_v37 = vld [vmem:[#allocation10 + $0x500] sm:$0xf]  ;;  %v4816_v43 = vor.u32 %v5861_v36, %v4815_v33  ;;  %3030 = vmatpush.bf16.msra.mxu0 %v4560_v42  ;;  %v6009_v33 = vld [vmem:[#allocation10 + $0x7c4] sm:$0xf] }
 0x2ad   : > { %v5925_v38 = vld [vmem:[#allocation10 + $0x51c] sm:$0xf0]  ;;  %v4625_v42 = vld [vmem:[#allocation10 + $0x1a0] sm:$0xf0] }
 0x2ae   : > { %v5327_v39 = vld [vmem:[#allocation10 + $0x700] sm:$0xf]  ;;  %v5072_v44 = vor.u32 %v5925_v38, %v5071_v37  ;;  %3043 = vmatpush.bf16.msra.mxu1 %v4816_v43  ;;  %v4660_v37 = vor.u32 %v5817_v27, %v4657_v28  ;;  %v4916_v38 = vor.u32 %v5881_v29, %v4913_v26  ;;  %v5873_v43 = vld [vmem:[#allocation10 + $0x384] sm:$0xf] }
 0x2af   : > { %v5989_v41 = vld [vmem:[#allocation10 + $0x71c] sm:$0xf0]  ;;  %v4785_v28 = vld [vmem:[#allocation10 + $0x2e0] sm:$0xf0] }
 0x2b0   : > { %v4527_v45 = vld [vmem:[#allocation10 + $0xc0] sm:$0xf]  ;;  %v5328_v48 = vor.u32 %v5989_v41, %v5327_v39  ;;  %3056 = vmatpush.bf16.msra.mxu2 %v5072_v44  ;;  %v5172_v39 = vor.u32 %v5945_v30, %v5169_v31  ;;  %v5809_v41 = vld [vmem:[#allocation10 + $0x184] sm:$0xf]  ;;  %v5428_v44 = vor.u32 %v6009_v33, %v5425_v34 }
 0x2b1   : > { %v5789_v46 = vld [vmem:[#allocation10 + $0xdc] sm:$0xf0]  ;;  %v5913_v29 = vld [vmem:[#allocation10 + $0x4c4] sm:$0xf] }
 0x2b2   : > { %v4783_v47 = vld [vmem:[#allocation10 + $0x2c0] sm:$0xf]  ;;  %v4528_v54 = vor.u32 %v5789_v46, %v4527_v45  ;;  %3069 = vmatpush.bf16.msra.mxu3 %v5328_v48  ;;  %v4881_v45 = vld [vmem:[#allocation10 + $0x3a0] sm:$0xf0] }
 0x2b3   : > { %v5853_v49 = vld [vmem:[#allocation10 + $0x2dc] sm:$0xf0]  ;;  %v5937_v46 = vld [vmem:[#allocation10 + $0x584] sm:$0xf] }
 0x2b4   : > { %v5039_v50 = vld [vmem:[#allocation10 + $0x4c0] sm:$0xf]  ;;  %v4784_v55 = vor.u32 %v5853_v49, %v4783_v47  ;;  %3031 = vmatpush.bf16.msra.mxu0 %v4528_v54  ;;  %v5137_v47 = vld [vmem:[#allocation10 + $0x5a0] sm:$0xf0] }
 0x2b5   : > { %v5917_v51 = vld [vmem:[#allocation10 + $0x4dc] sm:$0xf0]  ;;  %v6001_v48 = vld [vmem:[#allocation10 + $0x784] sm:$0xf] }
 0x2b6   : > { %v5295_v52 = vld [vmem:[#allocation10 + $0x6c0] sm:$0xf]  ;;  %v5040_v56 = vor.u32 %v5917_v51, %v5039_v50  ;;  %3044 = vmatpush.bf16.msra.mxu1 %v4784_v55  ;;  %v5393_v49 = vld [vmem:[#allocation10 + $0x7a0] sm:$0xf0]  ;;  %v4628_v50 = vor.u32 %v5809_v41, %v4625_v42 }
 0x2b7   : > { %v5981_v53 = vld [vmem:[#allocation10 + $0x6dc] sm:$0xf0]  ;;  %v5801_v51 = vld [vmem:[#allocation10 + $0x144] sm:$0xf] }
 0x2b8   : > { %v4495_v57 = vld [vmem:[#allocation10 + $0x80] sm:$0xf]  ;;  %v5296_v60 = vor.u32 %v5981_v53, %v5295_v52  ;;  %3057 = vmatpush.bf16.msra.mxu2 %v5040_v56  ;;  %v4884_v52 = vor.u32 %v5873_v43, %v4881_v45  ;;  %v5140_v53 = vor.u32 %v5937_v46, %v5137_v47  ;;  %v4593_v54 = vld [vmem:[#allocation10 + $0x160] sm:$0xf0] }
 0x2b9   : > { %v5781_v58 = vld [vmem:[#allocation10 + $0x9c] sm:$0xf0]  ;;  %v5865_v55 = vld [vmem:[#allocation10 + $0x344] sm:$0xf] }
 0x2ba   : > { %v4751_v59 = vld [vmem:[#allocation10 + $0x280] sm:$0xf]  ;;  %v4496_v2 = vor.u32 %v5781_v58, %v4495_v57  ;;  %3070 = vmatpush.bf16.msra.mxu3 %v5296_v60  ;;  %v4849_v56 = vld [vmem:[#allocation10 + $0x360] sm:$0xf0]  ;;  %v5396_v57 = vor.u32 %v6001_v48, %v5393_v49 }
 0x2bb   : > { %v5845_v63 = vld [vmem:[#allocation10 + $0x29c] sm:$0xf0]  ;;  %v5929_v58 = vld [vmem:[#allocation10 + $0x544] sm:$0xf] }
 0x2bc   : > { %v5007_v61 = vld [vmem:[#allocation10 + $0x480] sm:$0xf]  ;;  %v4752_v3 = vor.u32 %v5845_v63, %v4751_v59  ;;  %3032 = vmatpush.bf16.msra.mxu0 %v4496_v2  ;;  %v5105_v59 = vld [vmem:[#allocation10 + $0x560] sm:$0xf0] }
 0x2bd   : > { %v5909_v62 = vld [vmem:[#allocation10 + $0x49c] sm:$0xf0]  ;;  %v5993_v60 = vld [vmem:[#allocation10 + $0x744] sm:$0xf] }
 0x2be   : > { %v5263_v0 = vld [vmem:[#allocation10 + $0x680] sm:$0xf]  ;;  %v5008_v4 = vor.u32 %v5909_v62, %v5007_v61  ;;  %3045 = vmatpush.bf16.msra.mxu1 %v4752_v3  ;;  %v5361_v63 = vld [vmem:[#allocation10 + $0x760] sm:$0xf0]  ;;  %v4596_v62 = vor.u32 %v5801_v51, %v4593_v54  ;;  %v1444_v3 = vld [vmem:[#allocation9] sm:$0xf] }
 0x2bf   : > { %v5973_v1 = vld [vmem:[#allocation10 + $0x69c] sm:$0xf0]  ;;  %v5793_v61 = vld [vmem:[#allocation10 + $0x104] sm:$0xf] }
 0x2c0   : > { %v4463_v5 = vld [vmem:[#allocation10 + $0x40] sm:$0xf]  ;;  %v5264_v7 = vor.u32 %v5973_v1, %v5263_v0  ;;  %3058 = vmatpush.bf16.msra.mxu2 %v5008_v4  ;;  %v4852_v0 = vor.u32 %v5865_v55, %v4849_v56  ;;  %v4561_v1 = vld [vmem:[#allocation10 + $0x120] sm:$0xf0]  ;;  %v5108_v4 = vor.u32 %v5929_v58, %v5105_v59 }
 0x2c1   : > { %v5773_v6 = vld [vmem:[#allocation10 + $0x5c] sm:$0xf0]  ;;  %v5857_v2 = vld [vmem:[#allocation10 + $0x304] sm:$0xf] }
 0x2c2   : > { %v4719_v40 = vld [vmem:[#allocation10 + $0x240] sm:$0xf]  ;;  %v4464_v15 = vor.u32 %v5773_v6, %v4463_v5  ;;  %3071 = vmatpush.bf16.msra.mxu3 %v5264_v7  ;;  %v4817_v5 = vld [vmem:[#allocation10 + $0x320] sm:$0xf0]  ;;  %v1446_v6 = vperm.slane %v1444_v3, 0  ;;  %v1448_v7 = vperm.slane %v1444_v3, 2 }
 0x2c3   : > { %v5837_v8 = vld [vmem:[#allocation10 + $0x25c] sm:$0xf0]  ;;  %v5977_v30 = vld [vmem:[#allocation10 + $0x6c4] sm:$0xf] }
 0x2c4   : > { %v4975_v9 = vld [vmem:[#allocation10 + $0x440] sm:$0xf]  ;;  %v4720_v16 = vor.u32 %v5837_v8, %v4719_v40  ;;  %3033 = vmatpush.bf16.msra.mxu0 %v4464_v15  ;;  %v1447_v40 = vperm.slane %v1444_v3, 1  ;;  %v5364_v8 = vor.u32 %v5993_v60, %v5361_v63  ;;  %v5329_v15 = vld [vmem:[#allocation10 + $0x720] sm:$0xf0] }
 0x2c5   : > { %v5901_v10 = vld [vmem:[#allocation10 + $0x45c] sm:$0xf0]  ;;  %v5297_v31 = vld [vmem:[#allocation10 + $0x6e0] sm:$0xf0] }
 0x2c6   : > { %v5231_v11 = vld [vmem:[#allocation10 + $0x640] sm:$0xf]  ;;  %v4976_v19 = vor.u32 %v5901_v10, %v4975_v9  ;;  %3046 = vmatpush.bf16.msra.mxu1 %v4720_v16  ;;  %v5921_v9 = vld [vmem:[#allocation10 + $0x504] sm:$0xf]  ;;  %v4564_v16 = vor.u32 %v5793_v61, %v4561_v1  ;;  %v5300_v42 = vor.u32 %v5977_v30, %v5297_v31  ;;  %v5814_v30 = vld [vmem:[#allocation10 + $0x1a4] sm:$0xf0] }
 0x2c7   : > { %v5965_v12 = vld [vmem:[#allocation10 + $0x65c] sm:$0xf0]  ;;  %v5073_v10 = vld [vmem:[#allocation10 + $0x520] sm:$0xf0]  ;;  %v4887_v31 = vld [vmem:[#allocation10 + $0x388] sm:$0xf] }
 0x2c8   : > { %v4431_v13 = vld [vmem:[#allocation10] sm:$0xf]  ;;  %v5232_v23 = vor.u32 %v5965_v12, %v5231_v11  ;;  %3059 = vmatpush.bf16.msra.mxu2 %v4976_v19  ;;  %v1449_v11 = vperm.slane %v1444_v3, 3  ;;  %v5985_v12 = vld [vmem:[#allocation10 + $0x704] sm:$0xf] }
 0x2c9   : > { %v5765_v14 = vld [vmem:[#allocation10 + $0x1c] sm:$0xf0]  ;;  %v5785_v19 = vld [vmem:[#allocation10 + $0xc4] sm:$0xf]  ;;  %v5332_v27 = vor.u32 %v5985_v12, %v5329_v15 }
 0x2ca   : > { %v4687_v17 = vld [vmem:[#allocation10 + $0x200] sm:$0xf]  ;;  %v4432_v25 = vor.u32 %v5765_v14, %v4431_v13  ;;  %3072 = vmatpush.bf16.msra.mxu3 %v5232_v23  ;;  %v1450_v13 = vrot.slane %v1447_v40, 6  ;;  %v1451_v14 = vrot.slane %v1448_v7, 4  ;;  %v4529_v23 = vld [vmem:[#allocation10 + $0xe0] sm:$0xf0] }
 0x2cb   : > { %v5829_v18 = vld [vmem:[#allocation10 + $0x21c] sm:$0xf0]  ;;  %v5777_v33 = vld [vmem:[#allocation10 + $0x84] sm:$0xf]  ;;  %v4919_v40 = vld [vmem:[#allocation10 + $0x3c8] sm:$0xf] }
 0x2cc   : > { %v4943_v20 = vld [vmem:[#allocation10 + $0x400] sm:$0xf]  ;;  %v4688_v32 = vor.u32 %v5829_v18, %v4687_v17  ;;  %3034 = vmatpush.bf16.msra.mxu0 %v4432_v25  ;;  %v1452_v17 = vrot.slane %v1449_v11, 2  ;;  %v4820_v18 = vor.u32 %v5857_v2, %v4817_v5  ;;  %v5041_v25 = vld [vmem:[#allocation10 + $0x4e0] sm:$0xf0] }
 0x2cd   : > { %v5893_v21 = vld [vmem:[#allocation10 + $0x41c] sm:$0xf0]  ;;  %v4753_v41 = vld [vmem:[#allocation10 + $0x2a0] sm:$0xf0]  ;;  %v4663_v5 = vld [vmem:[#allocation10 + $0x1c8] sm:$0xf] }
 0x2ce   : > { %v5199_v22 = vld [vmem:[#allocation10 + $0x600] sm:$0xf]  ;;  %v4944_v35 = vor.u32 %v5893_v21, %v4943_v20  ;;  %3047 = vmatpush.bf16.msra.mxu1 %v4688_v32  ;;  %v5076_v20 = vor.u32 %v5921_v9, %v5073_v10  ;;  %v5849_v21 = vld [vmem:[#allocation10 + $0x2c4] sm:$0xf]  ;;  %v1454_v26 = vsel %vm1416_vm1, %v1451_v14, %v1452_v17  ;;  %v5886_v7 = vld [vmem:[#allocation10 + $0x3e4] sm:$0xf0] }
 0x2cf   : > { %v5957_v24 = vld [vmem:[#allocation10 + $0x61c] sm:$0xf0]  ;;  %v5905_v43 = vld [vmem:[#allocation10 + $0x484] sm:$0xf]  ;;  %v5950_v9 = vld [vmem:[#allocation10 + $0x5e4] sm:$0xf0] }
 0x2d0   : > { %v5200_v36 = vor.u32 %v5957_v24, %v5199_v22  ;;  %3060 = vmatpush.bf16.msra.mxu2 %v4944_v35  ;;  %3079 = vmatpush.bf16.msrb.mxu0 %v4660_v37  ;;  %v1443_v22 = vld [vmem:[#allocation2] sm:$0xff]  ;;  %v1453_v24 = vsel %vm1414_vm0, %v1446_v6, %v1450_v13  ;;  %v4532_v35 = vor.u32 %v5785_v19, %v4529_v23  ;;  %v5969_v46 = vld [vmem:[#allocation10 + $0x684] sm:$0xf]  ;;  %v5822_v6 = vld [vmem:[#allocation10 + $0x1e4] sm:$0xf0] }
 0x2d1   : > { %v1455_v32 = vsel %vm1418_vm2, %v1453_v24, %v1454_v26  ;;  %v5044_v37 = vor.u32 %v5913_v29, %v5041_v25  ;;  %v5265_v47 = vld [vmem:[#allocation10 + $0x6a0] sm:$0xf0]  ;;  %v4664_v24 = vor.u32 %v5822_v6, %v4663_v5  ;;  %v6014_v29 = vld [vmem:[#allocation10 + $0x7e4] sm:$0xf0] }
 0x2d2   : > { %3073 = vmatpush.bf16.msra.mxu3 %v5200_v36  ;;  %3092 = vmatpush.bf16.msrb.mxu1 %v4916_v38  ;;  %v1457_v34 = vadd.f32 %v1455_v32, %v1443_v22  ;;  %v4788_v36 = vor.u32 %v5849_v21, %v4785_v28  ;;  %v4497_v38 = vld [vmem:[#allocation10 + $0xa0] sm:$0xf0]  ;;  %v5268_v56 = vor.u32 %v5969_v46, %v5265_v47  ;;  %v5431_v28 = vld [vmem:[#allocation10 + $0x7c8] sm:$0xf] }
 0x2d3   : > { %v4500_v48 = vor.u32 %v5777_v33, %v4497_v38  ;;  %v5769_v49 = vld [vmem:[#allocation10 + $0x44] sm:$0xf]  ;;  %v4631_v25 = vld [vmem:[#allocation10 + $0x188] sm:$0xf] }
 0x2d4   : > { %3105 = vmatpush.bf16.msrb.mxu2 %v5172_v39  ;;  %3080 = vmatpush.bf16.msrb.mxu0 %v4628_v50  ;;  %v5841_v39 = vld [vmem:[#allocation10 + $0x284] sm:$0xf]  ;;  %v1458_v45 = vmax.f32 %v1457_v34, 0.0  ;;  %v5878_v32 = vld [vmem:[#allocation10 + $0x3a4] sm:$0xf0] }
 0x2d5   : > { %v4465_v50 = vld [vmem:[#allocation10 + $0x60] sm:$0xf0]  ;;  %v4756_v51 = vor.u32 %v5841_v39, %v4753_v41  ;;  %v5143_v33 = vld [vmem:[#allocation10 + $0x588] sm:$0xf]  ;;  %v4888_v38 = vor.u32 %v5878_v32, %v4887_v31 }
 0x2d6   : > { %3118 = vmatpush.bf16.msrb.mxu3 %v5428_v44  ;;  %3093 = vmatpush.bf16.msrb.mxu1 %v4884_v52  ;;  %v5009_v44 = vld [vmem:[#allocation10 + $0x4a0] sm:$0xf0]  ;;  %1460 = vst [vmem:[#allocation1] ss:$4 sm:$0xff] %v1458_v45  ;;  %v5942_v34 = vld [vmem:[#allocation10 + $0x5a4] sm:$0xf0] }
 0x2d7   : > { %v5012_v52 = vor.u32 %v5905_v43, %v5009_v44  ;;  %v4721_v54 = vld [vmem:[#allocation10 + $0x260] sm:$0xf0]  ;;  %v5399_v39 = vld [vmem:[#allocation10 + $0x788] sm:$0xf]  ;;  %v5144_v43 = vor.u32 %v5942_v34, %v5143_v33 }
 0x2d8   : > { %3106 = vmatpush.bf16.msrb.mxu2 %v5140_v53  ;;  %3081 = vmatpush.bf16.msrb.mxu0 %v4596_v62  ;;  %v5833_v53 = vld [vmem:[#allocation10 + $0x244] sm:$0xf]  ;;  %v4468_v62 = vor.u32 %v5769_v49, %v4465_v50  ;;  %v6006_v41 = vld [vmem:[#allocation10 + $0x7a4] sm:$0xf0] }
 0x2d9   : > { %v5897_v55 = vld [vmem:[#allocation10 + $0x444] sm:$0xf]  ;;  %v4724_v3 = vor.u32 %v5833_v53, %v4721_v54  ;;  %v5806_v44 = vld [vmem:[#allocation10 + $0x164] sm:$0xf0]  ;;  %v5400_v49 = vor.u32 %v6006_v41, %v5399_v39 }
 0x2da   : > { %3119 = vmatpush.bf16.msrb.mxu3 %v5396_v57  ;;  %3094 = vmatpush.bf16.msrb.mxu1 %v4852_v0  ;;  %v4977_v57 = vld [vmem:[#allocation10 + $0x460] sm:$0xf0]  ;;  %v4855_v45 = vld [vmem:[#allocation10 + $0x348] sm:$0xf] }
 0x2db   : > { %v5961_v58 = vld [vmem:[#allocation10 + $0x644] sm:$0xf]  ;;  %v5870_v46 = vld [vmem:[#allocation10 + $0x364] sm:$0xf0] }
 0x2dc   : > { %3107 = vmatpush.bf16.msrb.mxu2 %v5108_v4  ;;  %3082 = vmatpush.bf16.msrb.mxu0 %v4564_v16  ;;  %v5233_v59 = vld [vmem:[#allocation10 + $0x660] sm:$0xf0]  ;;  %v4980_v4 = vor.u32 %v5897_v55, %v4977_v57  ;;  %v5111_v47 = vld [vmem:[#allocation10 + $0x548] sm:$0xf] }
 0x2dd   : > { %v5761_v60 = vld [vmem:[#allocation10 + $0x4] sm:$0xf]  ;;  %v1463_v10 = vld.sshfl [vmem:[#allocation1 + $0x10] sm:$0xff pattern:$0x73625140]  ;;  %v5236_v12 = vor.u32 %v5961_v58, %v5233_v59 }
 0x2de   : > { %3120 = vmatpush.bf16.msrb.mxu3 %v5364_v8  ;;  %3095 = vmatpush.bf16.msrb.mxu1 %v4820_v18  ;;  %v4433_v63 = vld [vmem:[#allocation10 + $0x20] sm:$0xf0]  ;;  %v5175_v8 = vld [vmem:[#allocation10 + $0x5c8] sm:$0xf]  ;;  %v6800_v15 = vpack.c.bf16 %v1463_v10, %v1463_v10 }
 0x2df   : > { %v5825_v61 = vld [vmem:[#allocation10 + $0x204] sm:$0xf]  ;;  %v1461_v11 = vld.sshfl [vmem:[#allocation1] sm:$0xff pattern:$0x73625140]  ;;  %v4436_v19 = vor.u32 %v5761_v60, %v4433_v63  ;;  %v5176_v26 = vor.u32 %v5950_v9, %v5175_v8 }
 0x2e0   : > { %3108 = vmatpush.bf16.msrb.mxu2 %v5076_v20  ;;  %3083 = vmatpush.bf16.msrb.mxu0 %v4532_v35  ;;  %v4689_v0 = vld [vmem:[#allocation10 + $0x220] sm:$0xf0]  ;;  %v6802_v13 = vpack.c.bf16 %v1461_v11, %v1461_v11  ;;  %v1462_v16 = vld.sshfl [vmem:[#allocation1 + $0x8] sm:$0xff pattern:$0x73625140] }
 0x2e1   : > { %v5889_v1 = vld [vmem:[#allocation10 + $0x404] sm:$0xf]  ;;  %v4692_v17 = vor.u32 %v5825_v61, %v4689_v0  ;;  %v6806_v20 = vpack.c.bf16 %v1462_v16, %v1462_v16  ;;  %3061 = vmatmul.bf16.vlgmr.msra.gmra.mxu2 %v6800_v15  ;;  %v5998_v53 = vld [vmem:[#allocation10 + $0x764] sm:$0xf0] }
 0x2e2   : > { %3121 = vmatpush.bf16.msrb.mxu3 %v5332_v27  ;;  %3096 = vmatpush.bf16.msrb.mxu1 %v4788_v36  ;;  %v4945_v2 = vld [vmem:[#allocation10 + $0x420] sm:$0xf0]  ;;  %v4920_v27 = vor.u32 %v5886_v7, %v4919_v40  ;;  %v5432_v36 = vor.u32 %v6014_v29, %v5431_v28  ;;  %v4567_v54 = vld [vmem:[#allocation10 + $0x108] sm:$0xf] }
 0x2e3   : > { %v1464_v14 = vld.sshfl [vmem:[#allocation1 + $0x18] sm:$0xff pattern:$0x73625140]  ;;  %v4948_v23 = vor.u32 %v5889_v1, %v4945_v2  ;;  %3035 = vmatmul.bf16.vlgmr.msra.gmra.mxu0 %v6802_v13  ;;  %3048 = vmatmul.bf16.vlgmr.msra.gmra.mxu1 %v6806_v20 }
 0x2e4   : > { %3109 = vmatpush.bf16.msrb.mxu2 %v5044_v37  ;;  %3084 = vmatpush.bf16.msrb.mxu0 %v4500_v48  ;;  %v6804_v18 = vpack.c.bf16 %v1464_v14, %v1464_v14  ;;  %v5953_v21 = vld [vmem:[#allocation10 + $0x604] sm:$0xf]  ;;  %v4632_v37 = vor.u32 %v5814_v30, %v4631_v25  ;;  %v5934_v48 = vld [vmem:[#allocation10 + $0x564] sm:$0xf0] }
 0x2e5   : > { %v5201_v22 = vld [vmem:[#allocation10 + $0x620] sm:$0xf0]  ;;  %v5112_v55 = vor.u32 %v5934_v48, %v5111_v47  ;;  %v4823_v57 = vld [vmem:[#allocation10 + $0x308] sm:$0xf] }
 0x2e6   : > { %3122 = vmatpush.bf16.msrb.mxu3 %v5300_v42  ;;  %3097 = vmatpush.bf16.msrb.mxu1 %v4756_v51  ;;  %v5204_v35 = vor.u32 %v5953_v21, %v5201_v22  ;;  %v4599_v42 = vld [vmem:[#allocation10 + $0x148] sm:$0xf]  ;;  %v4856_v51 = vor.u32 %v5870_v46, %v4855_v45 }
 0x2e7   : > { %3074 = vmatmul.bf16.vlgmr.msra.gmra.mxu3 %v6804_v18  ;;  %v4600_v50 = vor.u32 %v5806_v44, %v4599_v42  ;;  %v5862_v58 = vld [vmem:[#allocation10 + $0x324] sm:$0xf0] }
 0x2e8   : > { %3110 = vmatpush.bf16.msrb.mxu2 %v5012_v52  ;;  %3085 = vmatpush.bf16.msrb.mxu0 %v4468_v62  ;;  %v5367_v52 = vld [vmem:[#allocation10 + $0x748] sm:$0xf]  ;;  %v4824_v62 = vor.u32 %v5862_v58, %v4823_v57 }
 0x2e9   : > { %v5079_v59 = vld [vmem:[#allocation10 + $0x508] sm:$0xf]  ;;  %v5368_v63 = vor.u32 %v5998_v53, %v5367_v52  ;;  %v4921_v53 = vld [vmem:[#allocation10 + $0x3e8] sm:$0xf0] }
 0x2ea   : > { %3123 = vmatpush.bf16.msrb.mxu3 %v5268_v56  ;;  %3098 = vmatpush.bf16.msrb.mxu1 %v4724_v3  ;;  %v5798_v56 = vld [vmem:[#allocation10 + $0x124] sm:$0xf0] }
 0x2eb   : > { %v5926_v60 = vld [vmem:[#allocation10 + $0x524] sm:$0xf0]  ;;  %v4568_v61 = vor.u32 %v5798_v56, %v4567_v54  ;;  %v5946_v54 = vld [vmem:[#allocation10 + $0x5cc] sm:$0xf] }
 0x2ec   : > { %3111 = vmatpush.bf16.msrb.mxu2 %v4980_v4  ;;  %3086 = vmatpush.bf16.msrb.mxu0 %v4436_v19  ;;  %v5335_v0 = vld [vmem:[#allocation10 + $0x708] sm:$0xf]  ;;  %v5080_v3 = vor.u32 %v5926_v60, %v5079_v59 }
 0x2ed   : > { %v5990_v1 = vld [vmem:[#allocation10 + $0x724] sm:$0xf0] }
 0x2ee   : > { %3124 = vmatpush.bf16.msrb.mxu3 %v5236_v12  ;;  %3099 = vmatpush.bf16.msrb.mxu1 %v4692_v17  ;;  %v4535_v2 = vld [vmem:[#allocation10 + $0xc8] sm:$0xf]  ;;  %v5336_v8 = vor.u32 %v5990_v1, %v5335_v0 }
 0x2ef   : > { %v5790_v4 = vld [vmem:[#allocation10 + $0xe4] sm:$0xf0] }
 0x2f0   : > { %3112 = vmatpush.bf16.msrb.mxu2 %v4948_v23  ;;  %3131 = vmatpush.bf16.msra.mxu0 %v4664_v24  ;;  %v4791_v5 = vld [vmem:[#allocation10 + $0x2c8] sm:$0xf]  ;;  %v4536_v9 = vor.u32 %v5790_v4, %v4535_v2  ;;  %v5810_v2 = vld [vmem:[#allocation10 + $0x18c] sm:$0xf] }
 0x2f1   : > { %v5854_v6 = vld [vmem:[#allocation10 + $0x2e4] sm:$0xf0]  ;;  %v5874_v4 = vld [vmem:[#allocation10 + $0x38c] sm:$0xf] }
 0x2f2   : > { %3144 = vmatpush.bf16.msra.mxu1 %v4920_v27  ;;  %3125 = vmatpush.bf16.msrb.mxu3 %v5204_v35  ;;  %v5047_v40 = vld [vmem:[#allocation10 + $0x4c8] sm:$0xf]  ;;  %v4792_v10 = vor.u32 %v5854_v6, %v4791_v5  ;;  %v4889_v6 = vld [vmem:[#allocation10 + $0x3a8] sm:$0xf0] }
 0x2f3   : > { %v5918_v7 = vld [vmem:[#allocation10 + $0x4e4] sm:$0xf0]  ;;  %3087 = vmatmul.bf16.vlgmr.msrb.gmra.mxu0 %v6802_v13  ;;  %3113 = vmatmul.bf16.vlgmr.msrb.gmra.mxu2 %v6800_v15 }
 0x2f4   : > { %3157 = vmatpush.bf16.msra.mxu2 %v5176_v26  ;;  %3132 = vmatpush.bf16.msra.mxu0 %v4632_v37  ;;  %v5303_v11 = vld [vmem:[#allocation10 + $0x6c8] sm:$0xf]  ;;  %v5048_v16 = vor.u32 %v5918_v7, %v5047_v40  ;;  %v5938_v40 = vld [vmem:[#allocation10 + $0x58c] sm:$0xf] }
 0x2f5   : > { %v5982_v12 = vld [vmem:[#allocation10 + $0x6e4] sm:$0xf0]  ;;  %3100 = vmatmul.bf16.vlgmr.msrb.gmra.mxu1 %v6806_v20  ;;  %v5145_v7 = vld [vmem:[#allocation10 + $0x5a8] sm:$0xf0] }
 0x2f6   : > { %3170 = vmatpush.bf16.msra.mxu3 %v5432_v36  ;;  %3145 = vmatpush.bf16.msra.mxu1 %v4888_v38  ;;  %v4503_v14 = vld [vmem:[#allocation10 + $0x88] sm:$0xf]  ;;  %v5304_v24 = vor.u32 %v5982_v12, %v5303_v11  ;;  %v5401_v11 = vld [vmem:[#allocation10 + $0x7a8] sm:$0xf0] }
 0x2f7   : > { %v5782_v19 = vld [vmem:[#allocation10 + $0xa4] sm:$0xf0]  ;;  %3126 = vmatmul.bf16.vlgmr.msrb.gmra.mxu3 %v6804_v18  ;;  %v5802_v12 = vld [vmem:[#allocation10 + $0x14c] sm:$0xf] }
 0x2f8   : > { %3158 = vmatpush.bf16.msra.mxu2 %v5144_v43  ;;  %3133 = vmatpush.bf16.msra.mxu0 %v4600_v50  ;;  %v4759_v17 = vld [vmem:[#allocation10 + $0x288] sm:$0xf]  ;;  %v4504_v27 = vor.u32 %v5782_v19, %v4503_v14  ;;  %v4665_v50 = vld [vmem:[#allocation10 + $0x1e8] sm:$0xf0]  ;;  %v4892_v14 = vor.u32 %v5874_v4, %v4889_v6 }
 0x2f9   : > { %v5846_v23 = vld [vmem:[#allocation10 + $0x2a4] sm:$0xf0]  ;;  %v4601_v19 = vld [vmem:[#allocation10 + $0x168] sm:$0xf0] }
 0x2fa   : > { %3171 = vmatpush.bf16.msra.mxu3 %v5400_v49  ;;  %3146 = vmatpush.bf16.msra.mxu1 %v4856_v51  ;;  %v5015_v21 = vld [vmem:[#allocation10 + $0x488] sm:$0xf]  ;;  %v4760_v28 = vor.u32 %v5846_v23, %v4759_v17  ;;  %v5818_v49 = vld [vmem:[#allocation10 + $0x1cc] sm:$0xf] }
 0x2fb   : > { %v5910_v22 = vld [vmem:[#allocation10 + $0x4a4] sm:$0xf0]  ;;  %v5882_v51 = vld [vmem:[#allocation10 + $0x3cc] sm:$0xf] }
 0x2fc   : > { %3159 = vmatpush.bf16.msra.mxu2 %v5112_v55  ;;  %3134 = vmatpush.bf16.msra.mxu0 %v4568_v61  ;;  %v5271_v29 = vld [vmem:[#allocation10 + $0x688] sm:$0xf]  ;;  %v5016_v30 = vor.u32 %v5910_v22, %v5015_v21  ;;  %v5177_v55 = vld [vmem:[#allocation10 + $0x5e8] sm:$0xf0]  ;;  %v4924_v0 = vor.u32 %v5882_v51, %v4921_v53 }
 0x2fd   : > { %v5974_v25 = vld [vmem:[#allocation10 + $0x6a4] sm:$0xf0]  ;;  %v6010_v61 = vld [vmem:[#allocation10 + $0x7cc] sm:$0xf]  ;;  %v5180_v1 = vor.u32 %v5946_v54, %v5177_v55 }
 0x2fe   : > { %3172 = vmatpush.bf16.msra.mxu3 %v5368_v63  ;;  %3147 = vmatpush.bf16.msra.mxu1 %v4824_v62  ;;  %v4471_v26 = vld [vmem:[#allocation10 + $0x48] sm:$0xf]  ;;  %v5272_v36 = vor.u32 %v5974_v25, %v5271_v29  ;;  %v4668_v63 = vor.u32 %v5818_v49, %v4665_v50  ;;  %v5433_v62 = vld [vmem:[#allocation10 + $0x7e8] sm:$0xf0] }
 0x2ff   : > { %v5774_v31 = vld [vmem:[#allocation10 + $0x64] sm:$0xf0]  ;;  %v5866_v17 = vld [vmem:[#allocation10 + $0x34c] sm:$0xf] }
 0x300   : > { %3160 = vmatpush.bf16.msra.mxu2 %v5080_v3  ;;  %3135 = vmatpush.bf16.msra.mxu0 %v4536_v9  ;;  %v4727_v32 = vld [vmem:[#allocation10 + $0x248] sm:$0xf]  ;;  %v4472_v39 = vor.u32 %v5774_v31, %v4471_v26  ;;  %v4633_v3 = vld [vmem:[#allocation10 + $0x1a8] sm:$0xf0] }
 0x301   : > { %v5838_v35 = vld [vmem:[#allocation10 + $0x264] sm:$0xf0]  ;;  %v4636_v9 = vor.u32 %v5810_v2, %v4633_v3  ;;  %v4857_v23 = vld [vmem:[#allocation10 + $0x368] sm:$0xf0] }
 0x302   : > { %3173 = vmatpush.bf16.msra.mxu3 %v5336_v8  ;;  %3148 = vmatpush.bf16.msra.mxu1 %v4792_v10  ;;  %v4983_v33 = vld [vmem:[#allocation10 + $0x448] sm:$0xf]  ;;  %v4728_v41 = vor.u32 %v5838_v35, %v4727_v32  ;;  %v5436_v8 = vor.u32 %v6010_v61, %v5433_v62  ;;  %v6002_v10 = vld [vmem:[#allocation10 + $0x78c] sm:$0xf]  ;;  %v4860_v25 = vor.u32 %v5866_v17, %v4857_v23 }
 0x303   : > { %v5902_v34 = vld [vmem:[#allocation10 + $0x464] sm:$0xf0]  ;;  %v5930_v21 = vld [vmem:[#allocation10 + $0x54c] sm:$0xf] }
 0x304   : > { %3161 = vmatpush.bf16.msra.mxu2 %v5048_v16  ;;  %v5239_v37 = vld [vmem:[#allocation10 + $0x648] sm:$0xf]  ;;  %3136 = vmatpush.bf16.msra.mxu0 %v4504_v27  ;;  %v4984_v45 = vor.u32 %v5902_v34, %v4983_v33  ;;  %v5148_v16 = vor.u32 %v5938_v40, %v5145_v7  ;;  %v5113_v22 = vld [vmem:[#allocation10 + $0x568] sm:$0xf0]  ;;  %v4604_v27 = vor.u32 %v5802_v12, %v4601_v19 }
 0x305   : > { %v5966_v38 = vld [vmem:[#allocation10 + $0x664] sm:$0xf0]  ;;  %v5369_v29 = vld [vmem:[#allocation10 + $0x768] sm:$0xf0]  ;;  %v5116_v26 = vor.u32 %v5930_v21, %v5113_v22 }
 0x306   : > { %3174 = vmatpush.bf16.msra.mxu3 %v5304_v24  ;;  %3149 = vmatpush.bf16.msra.mxu1 %v4760_v28  ;;  %v4439_v42 = vld [vmem:[#allocation10 + $0x8] sm:$0xf]  ;;  %v5240_v52 = vor.u32 %v5966_v38, %v5239_v37  ;;  %v5404_v24 = vor.u32 %v6002_v10, %v5401_v11  ;;  %v5994_v28 = vld [vmem:[#allocation10 + $0x74c] sm:$0xf] }
 0x307   : > { %v5766_v43 = vld [vmem:[#allocation10 + $0x24] sm:$0xf0]  ;;  %v4569_v31 = vld [vmem:[#allocation10 + $0x128] sm:$0xf0] }
 0x308   : > { %v4695_v44 = vld [vmem:[#allocation10 + $0x208] sm:$0xf]  ;;  %3162 = vmatpush.bf16.msra.mxu2 %v5016_v30  ;;  %3137 = vmatpush.bf16.msra.mxu0 %v4472_v39  ;;  %v4440_v56 = vor.u32 %v5766_v43, %v4439_v42  ;;  %v5794_v30 = vld [vmem:[#allocation10 + $0x10c] sm:$0xf] }
 0x309   : > { %v5830_v46 = vld [vmem:[#allocation10 + $0x224] sm:$0xf0]  ;;  %v5858_v32 = vld [vmem:[#allocation10 + $0x30c] sm:$0xf]  ;;  %v4572_v37 = vor.u32 %v5794_v30, %v4569_v31 }
 0x30a   : > { %v4951_v47 = vld [vmem:[#allocation10 + $0x408] sm:$0xf]  ;;  %3175 = vmatpush.bf16.msra.mxu3 %v5272_v36  ;;  %3150 = vmatpush.bf16.msra.mxu1 %v4728_v41  ;;  %v4696_v57 = vor.u32 %v5830_v46, %v4695_v44  ;;  %v4825_v35 = vld [vmem:[#allocation10 + $0x328] sm:$0xf0]  ;;  %v5372_v36 = vor.u32 %v5994_v28, %v5369_v29  ;;  %v5823_v29 = vld [vmem:[#allocation10 + $0x1ec] sm:$0xf0] }
 0x30b   : > { %v5894_v48 = vld [vmem:[#allocation10 + $0x424] sm:$0xf0]  ;;  %v5922_v33 = vld [vmem:[#allocation10 + $0x50c] sm:$0xf]  ;;  %v4828_v41 = vor.u32 %v5858_v32, %v4825_v35  ;;  %v5183_v32 = vld [vmem:[#allocation10 + $0x5d0] sm:$0xf] }
 0x30c   : > { %v5207_v58 = vld [vmem:[#allocation10 + $0x608] sm:$0xf]  ;;  %3163 = vmatpush.bf16.msra.mxu2 %v4984_v45  ;;  %v4952_v60 = vor.u32 %v5894_v48, %v4951_v47  ;;  %3138 = vmatpush.bf16.msra.mxu0 %v4440_v56  ;;  %v5081_v34 = vld [vmem:[#allocation10 + $0x528] sm:$0xf0]  ;;  %v5951_v35 = vld [vmem:[#allocation10 + $0x5ec] sm:$0xf0] }
 0x30d   : > { %v5958_v59 = vld [vmem:[#allocation10 + $0x624] sm:$0xf0]  ;;  %v5986_v38 = vld [vmem:[#allocation10 + $0x70c] sm:$0xf]  ;;  %v5084_v42 = vor.u32 %v5922_v33, %v5081_v34 }
 0x30e   : > { %3176 = vmatpush.bf16.msra.mxu3 %v5240_v52  ;;  %v5208_v5 = vor.u32 %v5958_v59, %v5207_v58  ;;  %3151 = vmatpush.bf16.msra.mxu1 %v4696_v57  ;;  %v5337_v39 = vld [vmem:[#allocation10 + $0x728] sm:$0xf0] }
 0x30f   : > { %3139 = vmatmul.bf16.vlgmr.msra.gmra.mxu0 %v6802_v13  ;;  %v5786_v43 = vld [vmem:[#allocation10 + $0xcc] sm:$0xf]  ;;  %v5340_v49 = vor.u32 %v5986_v38, %v5337_v39 }
 0x310   : > { %3164 = vmatpush.bf16.msra.mxu2 %v4952_v60  ;;  %3183 = vmatpush.bf16.msrb.mxu0 %v4668_v63  ;;  %v4537_v44 = vld [vmem:[#allocation10 + $0xe8] sm:$0xf0] }
 0x311   : > { %3152 = vmatmul.bf16.vlgmr.msra.gmra.mxu1 %v6806_v20  ;;  %v5850_v45 = vld [vmem:[#allocation10 + $0x2cc] sm:$0xf]  ;;  %v4540_v50 = vor.u32 %v5786_v43, %v4537_v44  ;;  %v5184_v43 = vor.u32 %v5951_v35, %v5183_v32  ;;  %v5815_v44 = vld [vmem:[#allocation10 + $0x1ac] sm:$0xf0] }
 0x312   : > { %3196 = vmatpush.bf16.msrb.mxu1 %v4924_v0  ;;  %3177 = vmatpush.bf16.msra.mxu3 %v5208_v5  ;;  %v4793_v46 = vld [vmem:[#allocation10 + $0x2e8] sm:$0xf0]  ;;  %v4767_v32 = vld [vmem:[#allocation10 + $0x290] sm:$0xf] }
 0x313   : > { %3165 = vmatmul.bf16.vlgmr.msra.gmra.mxu2 %v6800_v15  ;;  %v5914_v47 = vld [vmem:[#allocation10 + $0x4cc] sm:$0xf]  ;;  %v4796_v53 = vor.u32 %v5850_v45, %v4793_v46  ;;  %v4895_v45 = vld [vmem:[#allocation10 + $0x390] sm:$0xf] }
 0x314   : > { %3209 = vmatpush.bf16.msrb.mxu2 %v5180_v1  ;;  %3184 = vmatpush.bf16.msrb.mxu0 %v4636_v9  ;;  %v5049_v48 = vld [vmem:[#allocation10 + $0x4e8] sm:$0xf0]  ;;  %v5879_v46 = vld [vmem:[#allocation10 + $0x3ac] sm:$0xf0] }
 0x315   : > { %3178 = vmatmul.bf16.vlgmr.msra.gmra.mxu3 %v6804_v18  ;;  %v5978_v51 = vld [vmem:[#allocation10 + $0x6cc] sm:$0xf]  ;;  %v5052_v54 = vor.u32 %v5914_v47, %v5049_v48  ;;  %v5151_v48 = vld [vmem:[#allocation10 + $0x590] sm:$0xf] }
 0x316   : > { %3222 = vmatpush.bf16.msrb.mxu3 %v5436_v8  ;;  %3197 = vmatpush.bf16.msrb.mxu1 %v4892_v14  ;;  %v5305_v52 = vld [vmem:[#allocation10 + $0x6e8] sm:$0xf0]  ;;  %v5847_v35 = vld [vmem:[#allocation10 + $0x2ac] sm:$0xf0] }
 0x317   : > { %v5778_v55 = vld [vmem:[#allocation10 + $0x8c] sm:$0xf]  ;;  %v5308_v63 = vor.u32 %v5978_v51, %v5305_v52  ;;  %v6007_v51 = vld [vmem:[#allocation10 + $0x7ac] sm:$0xf0] }
 0x318   : > { %3210 = vmatpush.bf16.msrb.mxu2 %v5148_v16  ;;  %3185 = vmatpush.bf16.msrb.mxu0 %v4604_v27  ;;  %v4505_v56 = vld [vmem:[#allocation10 + $0xa8] sm:$0xf0]  ;;  %v4671_v27 = vld [vmem:[#allocation10 + $0x1d0] sm:$0xf] }
 0x319   : > { %v5842_v57 = vld [vmem:[#allocation10 + $0x28c] sm:$0xf]  ;;  %v4508_v61 = vor.u32 %v5778_v55, %v4505_v56  ;;  %v4672_v38 = vor.u32 %v5823_v29, %v4671_v27  ;;  %v5807_v56 = vld [vmem:[#allocation10 + $0x16c] sm:$0xf0] }
 0x31a   : > { %3223 = vmatpush.bf16.msrb.mxu3 %v5404_v24  ;;  %3198 = vmatpush.bf16.msrb.mxu1 %v4860_v25  ;;  %v4761_v58 = vld [vmem:[#allocation10 + $0x2a8] sm:$0xf0]  ;;  %v4927_v25 = vld [vmem:[#allocation10 + $0x3d0] sm:$0xf] }
 0x31b   : > { %v5906_v59 = vld [vmem:[#allocation10 + $0x48c] sm:$0xf]  ;;  %v4764_v1 = vor.u32 %v5842_v57, %v4761_v58  ;;  %v4863_v57 = vld [vmem:[#allocation10 + $0x350] sm:$0xf] }
 0x31c   : > { %3211 = vmatpush.bf16.msrb.mxu2 %v5116_v26  ;;  %3186 = vmatpush.bf16.msrb.mxu0 %v4572_v37  ;;  %v5017_v60 = vld [vmem:[#allocation10 + $0x4a8] sm:$0xf0]  ;;  %v5887_v26 = vld [vmem:[#allocation10 + $0x3ec] sm:$0xf0] }
 0x31d   : > { %v5970_v62 = vld [vmem:[#allocation10 + $0x68c] sm:$0xf]  ;;  %v5020_v2 = vor.u32 %v5906_v59, %v5017_v60  ;;  %v6015_v37 = vld [vmem:[#allocation10 + $0x7ec] sm:$0xf0]  ;;  %v4928_v39 = vor.u32 %v5887_v26, %v4927_v25 }
 0x31e   : > { %3224 = vmatpush.bf16.msrb.mxu3 %v5372_v36  ;;  %3199 = vmatpush.bf16.msrb.mxu1 %v4828_v41  ;;  %v5273_v0 = vld [vmem:[#allocation10 + $0x6a8] sm:$0xf0]  ;;  %v5439_v36 = vld [vmem:[#allocation10 + $0x7d0] sm:$0xf] }
 0x31f   : > { %v5770_v3 = vld [vmem:[#allocation10 + $0x4c] sm:$0xf]  ;;  %v5276_v8 = vor.u32 %v5970_v62, %v5273_v0  ;;  %v4639_v41 = vld [vmem:[#allocation10 + $0x190] sm:$0xf]  ;;  %v5440_v47 = vor.u32 %v6015_v37, %v5439_v36 }
 0x320   : > { %3212 = vmatpush.bf16.msrb.mxu2 %v5084_v42  ;;  %3187 = vmatpush.bf16.msrb.mxu0 %v4540_v50  ;;  %v4473_v4 = vld [vmem:[#allocation10 + $0x68] sm:$0xf0]  ;;  %v5407_v50 = vld [vmem:[#allocation10 + $0x790] sm:$0xf]  ;;  %v4640_v52 = vor.u32 %v5815_v44, %v4639_v41  ;;  %v4768_v41 = vor.u32 %v5847_v35, %v4767_v32  ;;  %v5867_v35 = vld [vmem:[#allocation10 + $0x354] sm:$0xf] }
 0x321   : > { %v5834_v5 = vld [vmem:[#allocation10 + $0x24c] sm:$0xf]  ;;  %v4476_v10 = vor.u32 %v5770_v3, %v4473_v4  ;;  %v5871_v58 = vld [vmem:[#allocation10 + $0x36c] sm:$0xf0]  ;;  %v5408_v59 = vor.u32 %v6007_v51, %v5407_v50 }
 0x322   : > { %3225 = vmatpush.bf16.msrb.mxu3 %v5340_v49  ;;  %3200 = vmatpush.bf16.msrb.mxu1 %v4796_v53  ;;  %v4729_v6 = vld [vmem:[#allocation10 + $0x268] sm:$0xf0]  ;;  %v5943_v49 = vld [vmem:[#allocation10 + $0x5ac] sm:$0xf0]  ;;  %v4896_v53 = vor.u32 %v5879_v46, %v4895_v45 }
 0x323   : > { %v5898_v40 = vld [vmem:[#allocation10 + $0x44c] sm:$0xf]  ;;  %v4732_v16 = vor.u32 %v5834_v5, %v4729_v6  ;;  %v5152_v55 = vor.u32 %v5943_v49, %v5151_v48  ;;  %v5119_v60 = vld [vmem:[#allocation10 + $0x550] sm:$0xf] }
 0x324   : > { %3213 = vmatpush.bf16.msrb.mxu2 %v5052_v54  ;;  %v4985_v7 = vld [vmem:[#allocation10 + $0x468] sm:$0xf0]  ;;  %3188 = vmatpush.bf16.msrb.mxu0 %v4508_v61  ;;  %v4607_v54 = vld [vmem:[#allocation10 + $0x150] sm:$0xf] }
 0x325   : > { %v5962_v9 = vld [vmem:[#allocation10 + $0x64c] sm:$0xf]  ;;  %v4988_v19 = vor.u32 %v5898_v40, %v4985_v7  ;;  %v5375_v61 = vld [vmem:[#allocation10 + $0x750] sm:$0xf]  ;;  %v4608_v0 = vor.u32 %v5807_v56, %v4607_v54 }
 0x326   : > { %3226 = vmatpush.bf16.msrb.mxu3 %v5308_v63  ;;  %v5241_v11 = vld [vmem:[#allocation10 + $0x668] sm:$0xf0]  ;;  %3201 = vmatpush.bf16.msrb.mxu1 %v4764_v1  ;;  %v5935_v63 = vld [vmem:[#allocation10 + $0x56c] sm:$0xf0]  ;;  %v4864_v1 = vor.u32 %v5871_v58, %v4863_v57 }
 0x327   : > { %v5762_v12 = vld [vmem:[#allocation10 + $0xc] sm:$0xf]  ;;  %v5244_v28 = vor.u32 %v5962_v9, %v5241_v11  ;;  %v5999_v62 = vld [vmem:[#allocation10 + $0x76c] sm:$0xf0]  ;;  %v5120_v3 = vor.u32 %v5935_v63, %v5119_v60 }
 0x328   : > { %v4441_v14 = vld [vmem:[#allocation10 + $0x28] sm:$0xf0]  ;;  %3214 = vmatpush.bf16.msrb.mxu2 %v5020_v2  ;;  %3189 = vmatpush.bf16.msrb.mxu0 %v4476_v10  ;;  %v4575_v2 = vld [vmem:[#allocation10 + $0x110] sm:$0xf]  ;;  %v5376_v40 = vor.u32 %v5999_v62, %v5375_v61 }
 0x329   : > { %v5826_v17 = vld [vmem:[#allocation10 + $0x20c] sm:$0xf]  ;;  %v4444_v30 = vor.u32 %v5762_v12, %v4441_v14  ;;  %v5799_v4 = vld [vmem:[#allocation10 + $0x12c] sm:$0xf0] }
 0x32a   : > { %v4697_v23 = vld [vmem:[#allocation10 + $0x228] sm:$0xf0]  ;;  %3227 = vmatpush.bf16.msrb.mxu3 %v5276_v8  ;;  %3202 = vmatpush.bf16.msrb.mxu1 %v4732_v16  ;;  %v4831_v5 = vld [vmem:[#allocation10 + $0x310] sm:$0xf]  ;;  %v4576_v11 = vor.u32 %v5799_v4, %v4575_v2  ;;  %v5883_v2 = vld [vmem:[#allocation10 + $0x3d4] sm:$0xf] }
 0x32b   : > { %v5890_v21 = vld [vmem:[#allocation10 + $0x40c] sm:$0xf]  ;;  %v4700_v33 = vor.u32 %v5826_v17, %v4697_v23  ;;  %v5863_v6 = vld [vmem:[#allocation10 + $0x32c] sm:$0xf0]  ;;  %v5947_v4 = vld [vmem:[#allocation10 + $0x5d4] sm:$0xf] }
 0x32c   : > { %v4953_v22 = vld [vmem:[#allocation10 + $0x428] sm:$0xf0]  ;;  %3215 = vmatpush.bf16.msrb.mxu2 %v4988_v19  ;;  %3190 = vmatpush.bf16.msrb.mxu0 %v4444_v30  ;;  %v5087_v7 = vld [vmem:[#allocation10 + $0x510] sm:$0xf]  ;;  %v4832_v12 = vor.u32 %v5863_v6, %v4831_v5 }
 0x32d   : > { %v5954_v24 = vld [vmem:[#allocation10 + $0x60c] sm:$0xf]  ;;  %v4956_v34 = vor.u32 %v5890_v21, %v4953_v22  ;;  %v5927_v8 = vld [vmem:[#allocation10 + $0x52c] sm:$0xf0] }
 0x32e   : > { %v5209_v31 = vld [vmem:[#allocation10 + $0x628] sm:$0xf0]  ;;  %3228 = vmatpush.bf16.msrb.mxu3 %v5244_v28  ;;  %3203 = vmatpush.bf16.msrb.mxu1 %v4700_v33  ;;  %v5343_v9 = vld [vmem:[#allocation10 + $0x710] sm:$0xf]  ;;  %v5088_v16 = vor.u32 %v5927_v8, %v5087_v7  ;;  %v6011_v7 = vld [vmem:[#allocation10 + $0x7d4] sm:$0xf] }
 0x32f   : > { %v5212_v42 = vor.u32 %v5954_v24, %v5209_v31  ;;  %3191 = vmatmul.bf16.vlgmr.msrb.gmra.mxu0 %v6802_v13  ;;  %v5991_v10 = vld [vmem:[#allocation10 + $0x72c] sm:$0xf0]  ;;  %v5441_v8 = vld [vmem:[#allocation10 + $0x7f0] sm:$0xf0] }
 0x330   : > { %3216 = vmatpush.bf16.msrb.mxu2 %v4956_v34  ;;  %3235 = vmatpush.bf16.msra.mxu0 %v4672_v38  ;;  %v4543_v14 = vld [vmem:[#allocation10 + $0xd0] sm:$0xf]  ;;  %v5344_v21 = vor.u32 %v5991_v10, %v5343_v9 }
 0x331   : > { %3204 = vmatmul.bf16.vlgmr.msrb.gmra.mxu1 %v6806_v20  ;;  %v5791_v19 = vld [vmem:[#allocation10 + $0xec] sm:$0xf0] }
 0x332   : > { %3248 = vmatpush.bf16.msra.mxu1 %v4928_v39  ;;  %3229 = vmatpush.bf16.msrb.mxu3 %v5212_v42  ;;  %v4799_v17 = vld [vmem:[#allocation10 + $0x2d0] sm:$0xf]  ;;  %v4544_v29 = vor.u32 %v5791_v19, %v4543_v14  ;;  %v5811_v14 = vld [vmem:[#allocation10 + $0x194] sm:$0xf] }
 0x333   : > { %3217 = vmatmul.bf16.vlgmr.msrb.gmra.mxu2 %v6800_v15  ;;  %v5855_v23 = vld [vmem:[#allocation10 + $0x2ec] sm:$0xf0] }
 0x334   : > { %3261 = vmatpush.bf16.msra.mxu2 %v5184_v43  ;;  %3236 = vmatpush.bf16.msra.mxu0 %v4640_v52  ;;  %v5055_v22 = vld [vmem:[#allocation10 + $0x4d0] sm:$0xf]  ;;  %v4800_v25 = vor.u32 %v5855_v23, %v4799_v17  ;;  %v5444_v17 = vor.u32 %v6011_v7, %v5441_v8  ;;  %v5875_v23 = vld [vmem:[#allocation10 + $0x394] sm:$0xf] }
 0x335   : > { %3230 = vmatmul.bf16.vlgmr.msrb.gmra.mxu3 %v6804_v18  ;;  %v5919_v24 = vld [vmem:[#allocation10 + $0x4ec] sm:$0xf0]  ;;  %v5907_v7 = vld [vmem:[#allocation10 + $0x494] sm:$0xf] }
 0x336   : > { %3274 = vmatpush.bf16.msra.mxu3 %v5440_v47  ;;  %3249 = vmatpush.bf16.msra.mxu1 %v4896_v53  ;;  %v5311_v27 = vld [vmem:[#allocation10 + $0x6d0] sm:$0xf]  ;;  %v5056_v30 = vor.u32 %v5919_v24, %v5055_v22  ;;  %v5939_v22 = vld [vmem:[#allocation10 + $0x594] sm:$0xf] }
 0x337   : > { %v5983_v28 = vld [vmem:[#allocation10 + $0x6ec] sm:$0xf0]  ;;  %v5153_v24 = vld [vmem:[#allocation10 + $0x5b0] sm:$0xf0] }
 0x338   : > { %3262 = vmatpush.bf16.msra.mxu2 %v5152_v55  ;;  %3237 = vmatpush.bf16.msra.mxu0 %v4608_v0  ;;  %v4511_v26 = vld [vmem:[#allocation10 + $0x90] sm:$0xf]  ;;  %v5312_v33 = vor.u32 %v5983_v28, %v5311_v27  ;;  %v5819_v0 = vld [vmem:[#allocation10 + $0x1d4] sm:$0xf] }
 0x339   : > { %v5783_v31 = vld [vmem:[#allocation10 + $0xac] sm:$0xf0]  ;;  %v6003_v27 = vld [vmem:[#allocation10 + $0x794] sm:$0xf] }
 0x33a   : > { %3275 = vmatpush.bf16.msra.mxu3 %v5408_v59  ;;  %3250 = vmatpush.bf16.msra.mxu1 %v4864_v1  ;;  %v5023_v34 = vld [vmem:[#allocation10 + $0x490] sm:$0xf]  ;;  %v4512_v39 = vor.u32 %v5783_v31, %v4511_v26  ;;  %v4673_v1 = vld [vmem:[#allocation10 + $0x1f0] sm:$0xf0]  ;;  %v5156_v31 = vor.u32 %v5939_v22, %v5153_v24 }
 0x33b   : > { %v5911_v36 = vld [vmem:[#allocation10 + $0x4ac] sm:$0xf0]  ;;  %v4676_v10 = vor.u32 %v5819_v0, %v4673_v1  ;;  %v5409_v28 = vld [vmem:[#allocation10 + $0x7b0] sm:$0xf0] }
 0x33c   : > { %3263 = vmatpush.bf16.msra.mxu2 %v5120_v3  ;;  %3238 = vmatpush.bf16.msra.mxu0 %v4576_v11  ;;  %v5279_v37 = vld [vmem:[#allocation10 + $0x690] sm:$0xf]  ;;  %v5024_v43 = vor.u32 %v5911_v36, %v5023_v34  ;;  %v4929_v3 = vld [vmem:[#allocation10 + $0x3f0] sm:$0xf0]  ;;  %v5412_v32 = vor.u32 %v6003_v27, %v5409_v28 }
 0x33d   : > { %v5975_v38 = vld [vmem:[#allocation10 + $0x6ac] sm:$0xf0]  ;;  %v5803_v26 = vld [vmem:[#allocation10 + $0x154] sm:$0xf] }
 0x33e   : > { %3276 = vmatpush.bf16.msra.mxu3 %v5376_v40  ;;  %3251 = vmatpush.bf16.msra.mxu1 %v4832_v12  ;;  %v4479_v42 = vld [vmem:[#allocation10 + $0x50] sm:$0xf]  ;;  %v5280_v47 = vor.u32 %v5975_v38, %v5279_v37  ;;  %v5185_v40 = vld [vmem:[#allocation10 + $0x5f0] sm:$0xf0]  ;;  %v4932_v12 = vor.u32 %v5883_v2, %v4929_v3 }
 0x33f   : > { %v5775_v44 = vld [vmem:[#allocation10 + $0x6c] sm:$0xf0]  ;;  %v5188_v19 = vor.u32 %v5947_v4, %v5185_v40  ;;  %v5931_v34 = vld [vmem:[#allocation10 + $0x554] sm:$0xf] }
 0x340   : > { %3264 = vmatpush.bf16.msra.mxu2 %v5088_v16  ;;  %3239 = vmatpush.bf16.msra.mxu0 %v4544_v29  ;;  %v4735_v45 = vld [vmem:[#allocation10 + $0x250] sm:$0xf]  ;;  %v4480_v53 = vor.u32 %v5775_v44, %v4479_v42  ;;  %v4641_v16 = vld [vmem:[#allocation10 + $0x1b0] sm:$0xf0] }
 0x341   : > { %v5839_v46 = vld [vmem:[#allocation10 + $0x26c] sm:$0xf0]  ;;  %v4644_v29 = vor.u32 %v5811_v14, %v4641_v16  ;;  %v5121_v36 = vld [vmem:[#allocation10 + $0x570] sm:$0xf0] }
 0x342   : > { %3277 = vmatpush.bf16.msra.mxu3 %v5344_v21  ;;  %3252 = vmatpush.bf16.msra.mxu1 %v4800_v25  ;;  %v4991_v48 = vld [vmem:[#allocation10 + $0x450] sm:$0xf]  ;;  %v4736_v54 = vor.u32 %v5839_v46, %v4735_v45  ;;  %v4897_v21 = vld [vmem:[#allocation10 + $0x3b0] sm:$0xf0]  ;;  %v5124_v44 = vor.u32 %v5931_v34, %v5121_v36 }
 0x343   : > { %v5903_v49 = vld [vmem:[#allocation10 + $0x46c] sm:$0xf0]  ;;  %v4900_v25 = vor.u32 %v5875_v23, %v4897_v21  ;;  %v5995_v37 = vld [vmem:[#allocation10 + $0x754] sm:$0xf] }
 0x344   : > { %3265 = vmatpush.bf16.msra.mxu2 %v5056_v30  ;;  %v5247_v50 = vld [vmem:[#allocation10 + $0x650] sm:$0xf]  ;;  %3240 = vmatpush.bf16.msra.mxu0 %v4512_v39  ;;  %v4992_v58 = vor.u32 %v5903_v49, %v4991_v48  ;;  %v4609_v30 = vld [vmem:[#allocation10 + $0x170] sm:$0xf0] }
 0x345   : > { %v5967_v51 = vld [vmem:[#allocation10 + $0x66c] sm:$0xf0]  ;;  %v5377_v38 = vld [vmem:[#allocation10 + $0x770] sm:$0xf0]  ;;  %v4612_v39 = vor.u32 %v5803_v26, %v4609_v30 }
 0x346   : > { %3278 = vmatpush.bf16.msra.mxu3 %v5312_v33  ;;  %v4447_v52 = vld [vmem:[#allocation10 + $0x10] sm:$0xf]  ;;  %3253 = vmatpush.bf16.msra.mxu1 %v4768_v41  ;;  %v5248_v61 = vor.u32 %v5967_v51, %v5247_v50  ;;  %v4865_v33 = vld [vmem:[#allocation10 + $0x370] sm:$0xf0]  ;;  %v5380_v45 = vor.u32 %v5995_v37, %v5377_v38  ;;  %v4679_v37 = vld [vmem:[#allocation10 + $0x1d8] sm:$0xf] }
 0x347   : > { %v5767_v55 = vld [vmem:[#allocation10 + $0x2c] sm:$0xf0]  ;;  %v4868_v41 = vor.u32 %v5867_v35, %v4865_v33  ;;  %v5795_v42 = vld [vmem:[#allocation10 + $0x114] sm:$0xf]  ;;  %v5824_v38 = vld [vmem:[#allocation10 + $0x1f4] sm:$0xf0] }
 0x348   : > { %v4703_v56 = vld [vmem:[#allocation10 + $0x210] sm:$0xf]  ;;  %3266 = vmatpush.bf16.msra.mxu2 %v5024_v43  ;;  %3241 = vmatpush.bf16.msra.mxu0 %v4480_v53  ;;  %v4448_v5 = vor.u32 %v5767_v55, %v4447_v52  ;;  %v4577_v43 = vld [vmem:[#allocation10 + $0x130] sm:$0xf0] }
 0x349   : > { %v5831_v57 = vld [vmem:[#allocation10 + $0x22c] sm:$0xf0]  ;;  %v5859_v46 = vld [vmem:[#allocation10 + $0x314] sm:$0xf]  ;;  %v4580_v52 = vor.u32 %v5795_v42, %v4577_v43  ;;  %v4935_v42 = vld [vmem:[#allocation10 + $0x3d8] sm:$0xf] }
 0x34a   : > { %v4959_v59 = vld [vmem:[#allocation10 + $0x410] sm:$0xf]  ;;  %3279 = vmatpush.bf16.msra.mxu3 %v5280_v47  ;;  %3254 = vmatpush.bf16.msra.mxu1 %v4736_v54  ;;  %v4704_v6 = vor.u32 %v5831_v57, %v4703_v56  ;;  %v4833_v47 = vld [vmem:[#allocation10 + $0x330] sm:$0xf0] }
 0x34b   : > { %v5895_v60 = vld [vmem:[#allocation10 + $0x42c] sm:$0xf0]  ;;  %v5923_v48 = vld [vmem:[#allocation10 + $0x514] sm:$0xf]  ;;  %v4836_v53 = vor.u32 %v5859_v46, %v4833_v47  ;;  %v5952_v46 = vld [vmem:[#allocation10 + $0x5f4] sm:$0xf0] }
 0x34c   : > { %v5215_v63 = vld [vmem:[#allocation10 + $0x610] sm:$0xf]  ;;  %3267 = vmatpush.bf16.msra.mxu2 %v4992_v58  ;;  %v4960_v9 = vor.u32 %v5895_v60, %v4959_v59  ;;  %3242 = vmatpush.bf16.msra.mxu0 %v4448_v5  ;;  %v5089_v49 = vld [vmem:[#allocation10 + $0x530] sm:$0xf0] }
 0x34d   : > { %v5959_v62 = vld [vmem:[#allocation10 + $0x62c] sm:$0xf0]  ;;  %v5987_v50 = vld [vmem:[#allocation10 + $0x714] sm:$0xf]  ;;  %v5092_v56 = vor.u32 %v5923_v48, %v5089_v49  ;;  %v4680_v48 = vor.u32 %v5824_v38, %v4679_v37  ;;  %v5447_v49 = vld [vmem:[#allocation10 + $0x7d8] sm:$0xf] }
 0x34e   : > { %3280 = vmatpush.bf16.msra.mxu3 %v5248_v61  ;;  %v5216_v11 = vor.u32 %v5959_v62, %v5215_v63  ;;  %3255 = vmatpush.bf16.msra.mxu1 %v4704_v6  ;;  %v5345_v51 = vld [vmem:[#allocation10 + $0x730] sm:$0xf0]  ;;  %v4551_v37 = vld [vmem:[#allocation10 + $0xd8] sm:$0xf] }
 0x34f   : > { %3243 = vmatmul.bf16.vlgmr.msra.gmra.mxu0 %v6802_v13  ;;  %v5787_v54 = vld [vmem:[#allocation10 + $0xd4] sm:$0xf]  ;;  %v5348_v57 = vor.u32 %v5987_v50, %v5345_v51  ;;  %v6016_v50 = vld [vmem:[#allocation10 + $0x7f4] sm:$0xf0] }
 0x350   : > { %3268 = vmatpush.bf16.msra.mxu2 %v4960_v9  ;;  %3287 = vmatpush.bf16.msrb.mxu0 %v4676_v10  ;;  %v4545_v55 = vld [vmem:[#allocation10 + $0xf0] sm:$0xf0]  ;;  %v5792_v38 = vld [vmem:[#allocation10 + $0xf4] sm:$0xf0] }
 0x351   : > { %3256 = vmatmul.bf16.vlgmr.msra.gmra.mxu1 %v6806_v20  ;;  %v5851_v58 = vld [vmem:[#allocation10 + $0x2d4] sm:$0xf]  ;;  %v4548_v0 = vor.u32 %v5787_v54, %v4545_v55 }
 0x352   : > { %3281 = vmatpush.bf16.msra.mxu3 %v5216_v11  ;;  %3300 = vmatpush.bf16.msrb.mxu1 %v4932_v12  ;;  %v4801_v59 = vld [vmem:[#allocation10 + $0x2f0] sm:$0xf0] }
 0x353   : > { %3269 = vmatmul.bf16.vlgmr.msra.gmra.mxu2 %v6800_v15  ;;  %v5915_v60 = vld [vmem:[#allocation10 + $0x4d4] sm:$0xf]  ;;  %v4804_v1 = vor.u32 %v5851_v58, %v4801_v59  ;;  %v4903_v58 = vld [vmem:[#allocation10 + $0x398] sm:$0xf]  ;;  %v5448_v59 = vor.u32 %v6016_v50, %v5447_v49 }
 0x354   : > { %3313 = vmatpush.bf16.msrb.mxu2 %v5188_v19  ;;  %3288 = vmatpush.bf16.msrb.mxu0 %v4644_v29  ;;  %v5057_v63 = vld [vmem:[#allocation10 + $0x4f0] sm:$0xf0]  ;;  %v5984_v49 = vld [vmem:[#allocation10 + $0x6f4] sm:$0xf0] }
 0x355   : > { %3282 = vmatmul.bf16.vlgmr.msra.gmra.mxu3 %v6804_v18  ;;  %v5979_v61 = vld [vmem:[#allocation10 + $0x6d4] sm:$0xf]  ;;  %v5060_v4 = vor.u32 %v5915_v60, %v5057_v63  ;;  %v5880_v60 = vld [vmem:[#allocation10 + $0x3b4] sm:$0xf0] }
 0x356   : > { %3326 = vmatpush.bf16.msrb.mxu3 %v5444_v17  ;;  %3301 = vmatpush.bf16.msrb.mxu1 %v4900_v25  ;;  %v5313_v62 = vld [vmem:[#allocation10 + $0x6f0] sm:$0xf0]  ;;  %v5159_v63 = vld [vmem:[#allocation10 + $0x598] sm:$0xf] }
 0x357   : > { %v5779_v2 = vld [vmem:[#allocation10 + $0x94] sm:$0xf]  ;;  %v5316_v5 = vor.u32 %v5979_v61, %v5313_v62  ;;  %v5944_v61 = vld [vmem:[#allocation10 + $0x5b4] sm:$0xf0] }
 0x358   : > { %3314 = vmatpush.bf16.msrb.mxu2 %v5156_v31  ;;  %3289 = vmatpush.bf16.msrb.mxu0 %v4612_v39  ;;  %v4513_v3 = vld [vmem:[#allocation10 + $0xb0] sm:$0xf0]  ;;  %v5415_v62 = vld [vmem:[#allocation10 + $0x798] sm:$0xf] }
 0x359   : > { %v5843_v6 = vld [vmem:[#allocation10 + $0x294] sm:$0xf]  ;;  %v4516_v11 = vor.u32 %v5779_v2, %v4513_v3  ;;  %v4904_v3 = vor.u32 %v5880_v60, %v4903_v58  ;;  %v4775_v58 = vld [vmem:[#allocation10 + $0x298] sm:$0xf] }
 0x35a   : > { %3327 = vmatpush.bf16.msrb.mxu3 %v5412_v32  ;;  %3302 = vmatpush.bf16.msrb.mxu1 %v4868_v41  ;;  %v4769_v40 = vld [vmem:[#allocation10 + $0x2b0] sm:$0xf0]  ;;  %v5848_v60 = vld [vmem:[#allocation10 + $0x2b4] sm:$0xf0] }
 0x35b   : > { %v5025_v8 = vld [vmem:[#allocation10 + $0x4b0] sm:$0xf0]  ;;  %v4772_v12 = vor.u32 %v5843_v6, %v4769_v40  ;;  %v5808_v6 = vld [vmem:[#allocation10 + $0x174] sm:$0xf0] }
 0x35c   : > { %3315 = vmatpush.bf16.msrb.mxu2 %v5124_v44  ;;  %3290 = vmatpush.bf16.msrb.mxu0 %v4580_v52  ;;  %v5971_v9 = vld [vmem:[#allocation10 + $0x694] sm:$0xf]  ;;  %v5028_v19 = vor.u32 %v5907_v7, %v5025_v8  ;;  %v5888_v44 = vld [vmem:[#allocation10 + $0x3f4] sm:$0xf0] }
 0x35d   : > { %v5281_v10 = vld [vmem:[#allocation10 + $0x6b0] sm:$0xf0]  ;;  %v4936_v54 = vor.u32 %v5888_v44, %v4935_v42  ;;  %v4871_v40 = vld [vmem:[#allocation10 + $0x358] sm:$0xf] }
 0x35e   : > { %3328 = vmatpush.bf16.msrb.mxu3 %v5380_v45  ;;  %3303 = vmatpush.bf16.msrb.mxu1 %v4836_v53  ;;  %v5771_v14 = vld [vmem:[#allocation10 + $0x54] sm:$0xf]  ;;  %v5284_v17 = vor.u32 %v5971_v9, %v5281_v10  ;;  %v5191_v45 = vld [vmem:[#allocation10 + $0x5d8] sm:$0xf]  ;;  %v6828_v53 = vld [vmem:[#allocation12] sm:$0xff] }
 0x35f   : > { %v4481_v16 = vld [vmem:[#allocation10 + $0x70] sm:$0xf0]  ;;  %v5192_v55 = vor.u32 %v5952_v46, %v5191_v45  ;;  %v5872_v8 = vld [vmem:[#allocation10 + $0x374] sm:$0xf0] }
 0x360   : > { %3316 = vmatpush.bf16.msrb.mxu2 %v5092_v56  ;;  %3291 = vmatpush.bf16.msrb.mxu0 %v4548_v0  ;;  %v5835_v23 = vld [vmem:[#allocation10 + $0x254] sm:$0xf]  ;;  %v4484_v29 = vor.u32 %v5771_v14, %v4481_v16  ;;  %v4647_v56 = vld [vmem:[#allocation10 + $0x198] sm:$0xf] }
 0x361   : > { %v4737_v21 = vld [vmem:[#allocation10 + $0x270] sm:$0xf0]  ;;  %v6008_v0 = vld [vmem:[#allocation10 + $0x7b4] sm:$0xf0] }
 0x362   : > { %3329 = vmatpush.bf16.msrb.mxu3 %v5348_v57  ;;  %3304 = vmatpush.bf16.msrb.mxu1 %v4804_v1  ;;  %v5899_v22 = vld [vmem:[#allocation10 + $0x454] sm:$0xf]  ;;  %v4740_v30 = vor.u32 %v5835_v23, %v4737_v21  ;;  %v5816_v57 = vld [vmem:[#allocation10 + $0x1b4] sm:$0xf0]  ;;  %v1731_v1 = vperm.slane %v6828_v53, 0  ;;  %v5416_v7 = vor.u32 %v6008_v0, %v5415_v62  ;;  %v4872_v23 = vor.u32 %v5872_v8, %v4871_v40 }
 0x363   : > { %v4993_v24 = vld [vmem:[#allocation10 + $0x470] sm:$0xf0]  ;;  %v4648_v2 = vor.u32 %v5816_v57, %v4647_v56  ;;  %v5127_v9 = vld [vmem:[#allocation10 + $0x558] sm:$0xf] }
 0x364   : > { %3317 = vmatpush.bf16.msrb.mxu2 %v5060_v4  ;;  %v5963_v27 = vld [vmem:[#allocation10 + $0x654] sm:$0xf]  ;;  %3292 = vmatpush.bf16.msrb.mxu0 %v4516_v11  ;;  %v4996_v33 = vor.u32 %v5899_v22, %v4993_v24  ;;  %v5160_v4 = vor.u32 %v5944_v61, %v5159_v63  ;;  %v5936_v10 = vld [vmem:[#allocation10 + $0x574] sm:$0xf0]  ;;  %v3036_v11 = vpop.f32.mrf.mxu0 }
 0x365   : > { %v5249_v28 = vld [vmem:[#allocation10 + $0x670] sm:$0xf0]  ;;  %v6000_v14 = vld [vmem:[#allocation10 + $0x774] sm:$0xf0]  ;;  %v3037_v16 = vadd.f32 %v3036_v11, %v1731_v1  ;;  %v5128_v21 = vor.u32 %v5936_v10, %v5127_v9 }
 0x366   : > { %3330 = vmatpush.bf16.msrb.mxu3 %v5316_v5  ;;  %v5763_v25 = vld [vmem:[#allocation10 + $0x14] sm:$0xf]  ;;  %3305 = vmatpush.bf16.msrb.mxu1 %v4772_v12  ;;  %v5252_v34 = vor.u32 %v5963_v27, %v5249_v28  ;;  %v4615_v5 = vld [vmem:[#allocation10 + $0x158] sm:$0xf] }
 0x367   : > { %v4449_v26 = vld [vmem:[#allocation10 + $0x30] sm:$0xf0]  ;;  %v5383_v12 = vld [vmem:[#allocation10 + $0x758] sm:$0xf] }
 0x368   : > { %v5827_v31 = vld [vmem:[#allocation10 + $0x214] sm:$0xf]  ;;  %3318 = vmatpush.bf16.msrb.mxu2 %v5028_v19  ;;  %3293 = vmatpush.bf16.msrb.mxu0 %v4484_v29  ;;  %v4452_v43 = vor.u32 %v5763_v25, %v4449_v26  ;;  %v3049_v19 = vpop.f32.mrf.mxu1  ;;  %v4583_v22 = vld [vmem:[#allocation10 + $0x118] sm:$0xf]  ;;  %v5384_v29 = vor.u32 %v6000_v14, %v5383_v12 }
 0x369   : > { %v4705_v32 = vld [vmem:[#allocation10 + $0x230] sm:$0xf0]  ;;  %v5800_v24 = vld [vmem:[#allocation10 + $0x134] sm:$0xf0]  ;;  %v3050_v28 = vadd.f32 %v3049_v19, %v3037_v16 }
 0x36a   : > { %v5891_v35 = vld [vmem:[#allocation10 + $0x414] sm:$0xf]  ;;  %3331 = vmatpush.bf16.msrb.mxu3 %v5284_v17  ;;  %3306 = vmatpush.bf16.msrb.mxu1 %v4740_v30  ;;  %v4708_v47 = vor.u32 %v5827_v31, %v4705_v32  ;;  %v4616_v17 = vor.u32 %v5808_v6, %v4615_v5  ;;  %v4839_v27 = vld [vmem:[#allocation10 + $0x318] sm:$0xf]  ;;  %v3075_v42 = vpop.f32.mrf.mxu3 }
 0x36b   : > { %v4961_v36 = vld [vmem:[#allocation10 + $0x430] sm:$0xf0]  ;;  %v5864_v25 = vld [vmem:[#allocation10 + $0x334] sm:$0xf0] }
 0x36c   : > { %v5955_v39 = vld [vmem:[#allocation10 + $0x614] sm:$0xf]  ;;  %3319 = vmatpush.bf16.msrb.mxu2 %v4996_v33  ;;  %v4964_v51 = vor.u32 %v5891_v35, %v4961_v36  ;;  %3294 = vmatpush.bf16.msrb.mxu0 %v4452_v43  ;;  %v5095_v26 = vld [vmem:[#allocation10 + $0x518] sm:$0xf]  ;;  %v4584_v35 = vor.u32 %v5800_v24, %v4583_v22  ;;  %v3062_v33 = vpop.f32.mrf.mxu2 }
 0x36d   : > { %v5217_v41 = vld [vmem:[#allocation10 + $0x630] sm:$0xf0]  ;;  %v5928_v30 = vld [vmem:[#allocation10 + $0x534] sm:$0xf0] }
 0x36e   : > { %3332 = vmatpush.bf16.msrb.mxu3 %v5252_v34  ;;  %v5220_v52 = vor.u32 %v5955_v39, %v5217_v41  ;;  %3307 = vmatpush.bf16.msrb.mxu1 %v4708_v47  ;;  %v5351_v31 = vld [vmem:[#allocation10 + $0x718] sm:$0xf]  ;;  %v4840_v34 = vor.u32 %v5864_v25, %v4839_v27  ;;  %v5096_v36 = vor.u32 %v5928_v30, %v5095_v26  ;;  %v3038_v47 = vpop.f32.mrf.mxu0 }
 0x36f   : > { %3295 = vmatmul.bf16.vlgmr.msrb.gmra.mxu0 %v6802_v13  ;;  %v5992_v32 = vld [vmem:[#allocation10 + $0x734] sm:$0xf0]  ;;  %v3063_v41 = vadd.f32 %v3062_v33, %v3050_v28  ;;  %v5884_v33 = vld [vmem:[#allocation10 + $0x3dc] sm:$0xf] }
 0x370   : > { %3339 = vmatpush.bf16.msra.mxu0 %v4680_v48  ;;  %3320 = vmatpush.bf16.msrb.mxu2 %v4964_v51  ;;  %v4807_v39 = vld [vmem:[#allocation10 + $0x2d8] sm:$0xf]  ;;  %v5352_v43 = vor.u32 %v5992_v32, %v5351_v31  ;;  %v3051_v51 = vpop.f32.mrf.mxu1  ;;  %v5820_v32 = vld [vmem:[#allocation10 + $0x1dc] sm:$0xf] }
 0x371   : > { %3308 = vmatmul.bf16.vlgmr.msrb.gmra.mxu1 %v6806_v20  ;;  %v5856_v44 = vld [vmem:[#allocation10 + $0x2f4] sm:$0xf0]  ;;  %v6835_v50 = vadd.f32 %v3075_v42, %v3063_v41  ;;  %v6012_v42 = vld [vmem:[#allocation10 + $0x7dc] sm:$0xf] }
 0x372   : > { %3333 = vmatpush.bf16.msrb.mxu3 %v5220_v52  ;;  %3352 = vmatpush.bf16.msra.mxu1 %v4936_v54  ;;  %v5063_v45 = vld [vmem:[#allocation10 + $0x4d8] sm:$0xf]  ;;  %v4552_v52 = vor.u32 %v5792_v38, %v4551_v37  ;;  %v4808_v54 = vor.u32 %v5856_v44, %v4807_v39  ;;  %v5948_v37 = vld [vmem:[#allocation10 + $0x5dc] sm:$0xf] }
 0x373   : > { %3321 = vmatmul.bf16.vlgmr.msrb.gmra.mxu2 %v6800_v15  ;;  %v5920_v46 = vld [vmem:[#allocation10 + $0x4f4] sm:$0xf0]  ;;  %v5193_v38 = vld [vmem:[#allocation10 + $0x5f8] sm:$0xf0] }
 0x374   : > { %3365 = vmatpush.bf16.msra.mxu2 %v5192_v55  ;;  %3340 = vmatpush.bf16.msra.mxu0 %v4648_v2  ;;  %v5319_v48 = vld [vmem:[#allocation10 + $0x6d8] sm:$0xf]  ;;  %v5064_v55 = vor.u32 %v5920_v46, %v5063_v45  ;;  %v3064_v2 = vpop.f32.mrf.mxu2  ;;  %v5196_v47 = vor.u32 %v5948_v37, %v5193_v38  ;;  %v5876_v51 = vld [vmem:[#allocation10 + $0x39c] sm:$0xf] }
 0x375   : > { %3334 = vmatmul.bf16.vlgmr.msrb.gmra.mxu3 %v6804_v18  ;;  %v4519_v56 = vld [vmem:[#allocation10 + $0x98] sm:$0xf]  ;;  %v5804_v2 = vld [vmem:[#allocation10 + $0x15c] sm:$0xf] }
 0x376   : > { %3378 = vmatpush.bf16.msra.mxu3 %v5448_v59  ;;  %3353 = vmatpush.bf16.msra.mxu1 %v4904_v3  ;;  %v5784_v57 = vld [vmem:[#allocation10 + $0xb4] sm:$0xf0]  ;;  %v5320_v59 = vor.u32 %v5984_v49, %v5319_v48  ;;  %v4776_v3 = vor.u32 %v5848_v60, %v4775_v58  ;;  %v5812_v48 = vld [vmem:[#allocation10 + $0x19c] sm:$0xf] }
 0x377   : > { %v5031_v63 = vld [vmem:[#allocation10 + $0x498] sm:$0xf]  ;;  %v4520_v1 = vor.u32 %v5784_v57, %v4519_v56  ;;  %v4649_v49 = vld [vmem:[#allocation10 + $0x1b8] sm:$0xf0] }
 0x378   : > { %3366 = vmatpush.bf16.msra.mxu2 %v5160_v4  ;;  %3341 = vmatpush.bf16.msra.mxu0 %v4616_v17  ;;  %v5912_v61 = vld [vmem:[#allocation10 + $0x4b4] sm:$0xf0]  ;;  %v6839_v31 = vpop.f32.mrf.mxu1  ;;  %v4905_v56 = vld [vmem:[#allocation10 + $0x3b8] sm:$0xf0] }
 0x379   : > { %v5287_v62 = vld [vmem:[#allocation10 + $0x698] sm:$0xf]  ;;  %v5032_v4 = vor.u32 %v5912_v61, %v5031_v63  ;;  %v5940_v57 = vld [vmem:[#allocation10 + $0x59c] sm:$0xf]  ;;  %v4652_v61 = vor.u32 %v5812_v48, %v4649_v49 }
 0x37a   : > { %3379 = vmatpush.bf16.msra.mxu3 %v5416_v7  ;;  %3354 = vmatpush.bf16.msra.mxu1 %v4872_v23  ;;  %v5976_v0 = vld [vmem:[#allocation10 + $0x6b4] sm:$0xf0]  ;;  %v3077_v7 = vpop.f32.mrf.mxu3  ;;  %v6837_v23 = vpop.f32.mrf.mxu0  ;;  %v5161_v58 = vld [vmem:[#allocation10 + $0x5b8] sm:$0xf0] }
 0x37b   : > { %v4487_v5 = vld [vmem:[#allocation10 + $0x58] sm:$0xf]  ;;  %v5288_v8 = vor.u32 %v5976_v0, %v5287_v62  ;;  %v6004_v60 = vld [vmem:[#allocation10 + $0x79c] sm:$0xf]  ;;  %v4908_v0 = vor.u32 %v5876_v51, %v4905_v56 }
 0x37c   : > { %3367 = vmatpush.bf16.msra.mxu2 %v5128_v21  ;;  %3342 = vmatpush.bf16.msra.mxu0 %v4584_v35  ;;  %v5776_v6 = vld [vmem:[#allocation10 + $0x74] sm:$0xf0]  ;;  %v4681_v35 = vld [vmem:[#allocation10 + $0x1f8] sm:$0xf0] }
 0x37d   : > { %v4743_v40 = vld [vmem:[#allocation10 + $0x258] sm:$0xf]  ;;  %v4488_v16 = vor.u32 %v5776_v6, %v4487_v5  ;;  %v4684_v45 = vor.u32 %v5820_v32, %v4681_v35  ;;  %v5417_v63 = vld [vmem:[#allocation10 + $0x7b8] sm:$0xf0] }
 0x37e   : > { %3380 = vmatpush.bf16.msra.mxu3 %v5384_v29  ;;  %3355 = vmatpush.bf16.msra.mxu1 %v4840_v34  ;;  %v5840_v9 = vld [vmem:[#allocation10 + $0x274] sm:$0xf0]  ;;  %v5420_v5 = vor.u32 %v6004_v60, %v5417_v63  ;;  %v4873_v6 = vld [vmem:[#allocation10 + $0x378] sm:$0xf0] }
 0x37f   : > { %v4999_v10 = vld [vmem:[#allocation10 + $0x458] sm:$0xf]  ;;  %v4744_v21 = vor.u32 %v5840_v9, %v4743_v40  ;;  %v5932_v40 = vld [vmem:[#allocation10 + $0x55c] sm:$0xf] }
 0x380   : > { %3368 = vmatpush.bf16.msra.mxu2 %v5096_v36  ;;  %3343 = vmatpush.bf16.msra.mxu0 %v4552_v52  ;;  %v5904_v11 = vld [vmem:[#allocation10 + $0x474] sm:$0xf0]  ;;  %v4937_v36 = vld [vmem:[#allocation10 + $0x3f8] sm:$0xf0]  ;;  %v6841_v52 = vpop.f32.mrf.mxu2  ;;  %v3103_v62 = vpop.f32.mrf.mxu1 }
 0x381   : > { %v5255_v12 = vld [vmem:[#allocation10 + $0x658] sm:$0xf]  ;;  %v5000_v22 = vor.u32 %v5904_v11, %v4999_v10  ;;  %v4940_v46 = vor.u32 %v5884_v33, %v4937_v36  ;;  %v5129_v7 = vld [vmem:[#allocation10 + $0x578] sm:$0xf0] }
 0x382   : > { %3381 = vmatpush.bf16.msra.mxu3 %v5352_v43  ;;  %3356 = vmatpush.bf16.msra.mxu1 %v4808_v54  ;;  %v5968_v14 = vld [vmem:[#allocation10 + $0x674] sm:$0xf0]  ;;  %v5449_v43 = vld [vmem:[#allocation10 + $0x7f8] sm:$0xf0]  ;;  %v6843_v54 = vpop.f32.mrf.mxu3 }
 0x383   : > { %v4455_v19 = vld [vmem:[#allocation10 + $0x18] sm:$0xf]  ;;  %v5256_v29 = vor.u32 %v5968_v14, %v5255_v12  ;;  %v5385_v9 = vld [vmem:[#allocation10 + $0x778] sm:$0xf0]  ;;  %v5132_v12 = vor.u32 %v5932_v40, %v5129_v7 }
 0x384   : > { %3369 = vmatpush.bf16.msra.mxu2 %v5064_v55  ;;  %3344 = vmatpush.bf16.msra.mxu0 %v4520_v1  ;;  %v5768_v17 = vld [vmem:[#allocation10 + $0x34] sm:$0xf0]  ;;  %v5452_v55 = vor.u32 %v6012_v42, %v5449_v43  ;;  %v5164_v1 = vor.u32 %v5940_v57, %v5161_v58  ;;  %v5796_v14 = vld [vmem:[#allocation10 + $0x11c] sm:$0xf] }
 0x385   : > { %v4711_v24 = vld [vmem:[#allocation10 + $0x218] sm:$0xf]  ;;  %v4456_v34 = vor.u32 %v5768_v17, %v4455_v19  ;;  %v5860_v19 = vld [vmem:[#allocation10 + $0x31c] sm:$0xf] }
 0x386   : > { %3382 = vmatpush.bf16.msra.mxu3 %v5320_v59  ;;  %3357 = vmatpush.bf16.msra.mxu1 %v4776_v3  ;;  %v5832_v27 = vld [vmem:[#allocation10 + $0x234] sm:$0xf0]  ;;  %v3090_v59 = vpop.f32.mrf.mxu0  ;;  %v4617_v3 = vld [vmem:[#allocation10 + $0x178] sm:$0xf0] }
 0x387   : > { %v4967_v28 = vld [vmem:[#allocation10 + $0x418] sm:$0xf]  ;;  %v4712_v39 = vor.u32 %v5832_v27, %v4711_v24  ;;  %v4620_v10 = vor.u32 %v5804_v2, %v4617_v3  ;;  %v4841_v24 = vld [vmem:[#allocation10 + $0x338] sm:$0xf0] }
 0x388   : > { %3370 = vmatpush.bf16.msra.mxu2 %v5032_v4  ;;  %v5896_v25 = vld [vmem:[#allocation10 + $0x434] sm:$0xf0]  ;;  %3345 = vmatpush.bf16.msra.mxu0 %v4488_v16  ;;  %v5868_v4 = vld [vmem:[#allocation10 + $0x35c] sm:$0xf]  ;;  %v3116_v17 = vpop.f32.mrf.mxu2  ;;  %v4844_v32 = vor.u32 %v5860_v19, %v4841_v24 }
 0x389   : > { %v5223_v26 = vld [vmem:[#allocation10 + $0x618] sm:$0xf]  ;;  %v4968_v41 = vor.u32 %v5896_v25, %v4967_v28  ;;  %v4876_v11 = vor.u32 %v5868_v4, %v4873_v6  ;;  %v4585_v16 = vld [vmem:[#allocation10 + $0x138] sm:$0xf0] }
 0x38a   : > { %3383 = vmatpush.bf16.msra.mxu3 %v5288_v8  ;;  %v5960_v30 = vld [vmem:[#allocation10 + $0x634] sm:$0xf0]  ;;  %3358 = vmatpush.bf16.msra.mxu1 %v4744_v21  ;;  %v5996_v8 = vld [vmem:[#allocation10 + $0x75c] sm:$0xf]  ;;  %v3129_v21 = vpop.f32.mrf.mxu3 }
 0x38b   : > { %v5224_v44 = vor.u32 %v5960_v30, %v5223_v26  ;;  %v5924_v27 = vld [vmem:[#allocation10 + $0x51c] sm:$0xf]  ;;  %v4588_v26 = vor.u32 %v5796_v14, %v4585_v16 }
 0x38c   : > { %3371 = vmatpush.bf16.msra.mxu2 %v5000_v22  ;;  %3346 = vmatpush.bf16.msra.mxu0 %v4456_v34  ;;  %v5388_v22 = vor.u32 %v5996_v8, %v5385_v9  ;;  %v5097_v28 = vld [vmem:[#allocation10 + $0x538] sm:$0xf0] }
 0x38d   : > { %v5353_v25 = vld [vmem:[#allocation10 + $0x738] sm:$0xf0]  ;;  %v5100_v35 = vor.u32 %v5924_v27, %v5097_v28 }
 0x38e   : > { %3384 = vmatpush.bf16.msra.mxu3 %v5256_v29  ;;  %3359 = vmatpush.bf16.msra.mxu1 %v4712_v39  ;;  %v5988_v29 = vld [vmem:[#allocation10 + $0x71c] sm:$0xf]  ;;  %v6849_v30 = vpop.f32.mrf.mxu0  ;;  %v6851_v42 = vpop.f32.mrf.mxu1 }
 0x38f   : > { %3347 = vmatmul.bf16.vlgmr.msra.gmra.mxu0 %v6802_v13  ;;  %v5788_v33 = vld [vmem:[#allocation10 + $0xdc] sm:$0xf]  ;;  %v5356_v37 = vor.u32 %v5988_v29, %v5353_v25 }
 0x390   : > { %3372 = vmatpush.bf16.msra.mxu2 %v4968_v41  ;;  %3391 = vmatpush.bf16.msrb.mxu0 %v4684_v45  ;;  %v4553_v34 = vld [vmem:[#allocation10 + $0xf8] sm:$0xf0] }
 0x391   : > { %3360 = vmatmul.bf16.vlgmr.msra.gmra.mxu1 %v6806_v20  ;;  %v5852_v36 = vld [vmem:[#allocation10 + $0x2dc] sm:$0xf]  ;;  %v4556_v45 = vor.u32 %v5788_v33, %v4553_v34 }
 0x392   : > { %3385 = vmatpush.bf16.msra.mxu3 %v5224_v44  ;;  %3404 = vmatpush.bf16.msrb.mxu1 %v4940_v46  ;;  %v4809_v38 = vld [vmem:[#allocation10 + $0x2f8] sm:$0xf0] }
 0x393   : > { %3373 = vmatmul.bf16.vlgmr.msra.gmra.mxu2 %v6800_v15  ;;  %v5916_v39 = vld [vmem:[#allocation10 + $0x4dc] sm:$0xf]  ;;  %v4812_v46 = vor.u32 %v5852_v36, %v4809_v38  ;;  %v6024_v36 = vld [vmem:[#allocation13 + $0x38] sm:$0xff] }
 0x394   : > { %3417 = vmatpush.bf16.msrb.mxu2 %v5196_v47  ;;  %3392 = vmatpush.bf16.msrb.mxu0 %v4652_v61  ;;  %v5065_v41 = vld [vmem:[#allocation10 + $0x4f8] sm:$0xf0]  ;;  %v6032_v38 = vld [vmem:[#allocation13 + $0x78] sm:$0xff] }
 0x395   : > { %3386 = vmatmul.bf16.vlgmr.msra.gmra.mxu3 %v6804_v18  ;;  %v5980_v43 = vld [vmem:[#allocation10 + $0x6dc] sm:$0xf]  ;;  %v5068_v47 = vor.u32 %v5916_v39, %v5065_v41  ;;  %v6040_v39 = vld [vmem:[#allocation13 + $0xb8] sm:$0xff] }
 0x396   : > { %3430 = vmatpush.bf16.msrb.mxu3 %v5452_v55  ;;  %3405 = vmatpush.bf16.msrb.mxu1 %v4908_v0  ;;  %v5321_v44 = vld [vmem:[#allocation10 + $0x6f8] sm:$0xf0]  ;;  %v6853_v63 = vpop.f32.mrf.mxu2  ;;  %v3142_v62 = vpop.f32.mrf.mxu0  ;;  %v6048_v41 = vld [vmem:[#allocation13 + $0xf8] sm:$0xff] }
 0x397   : > { %v5780_v48 = vld [vmem:[#allocation10 + $0x9c] sm:$0xf]  ;;  %v5324_v55 = vor.u32 %v5980_v43, %v5321_v44  ;;  %v3155_v9 = vpop.f32.mrf.mxu1  ;;  %v6045_v62 = vld [vmem:[#allocation13 + $0xe0] sm:$0xff] }
 0x398   : > { %3418 = vmatpush.bf16.msrb.mxu2 %v5164_v1  ;;  %3393 = vmatpush.bf16.msrb.mxu0 %v4620_v10  ;;  %v4521_v49 = vld [vmem:[#allocation10 + $0xb8] sm:$0xf0]  ;;  %v6855_v8 = vpop.f32.mrf.mxu3 }
 0x399   : > { %v5844_v51 = vld [vmem:[#allocation10 + $0x29c] sm:$0xf]  ;;  %v4524_v61 = vor.u32 %v5780_v48, %v4521_v49  ;;  %v6030_v48 = vld [vmem:[#allocation13 + $0x68] sm:$0xff] }
 0x39a   : > { %3431 = vmatpush.bf16.msrb.mxu3 %v5420_v5  ;;  %3406 = vmatpush.bf16.msrb.mxu1 %v4876_v11  ;;  %v4777_v56 = vld [vmem:[#allocation10 + $0x2b8] sm:$0xf0]  ;;  %v6038_v49 = vld [vmem:[#allocation13 + $0xa8] sm:$0xff] }
 0x39b   : > { %v5908_v57 = vld [vmem:[#allocation10 + $0x49c] sm:$0xf]  ;;  %v4780_v0 = vor.u32 %v5844_v51, %v4777_v56  ;;  %v1732_v51 = vperm.slane %v6828_v53, 1  ;;  %v6037_v56 = vld [vmem:[#allocation13 + $0xa0] sm:$0xff] }
 0x39c   : > { %3419 = vmatpush.bf16.msrb.mxu2 %v5132_v12  ;;  %3394 = vmatpush.bf16.msrb.mxu0 %v4588_v26  ;;  %v5033_v58 = vld [vmem:[#allocation10 + $0x4b8] sm:$0xf0] }
 0x39d   : > { %v5972_v59 = vld [vmem:[#allocation10 + $0x69c] sm:$0xf]  ;;  %v5036_v1 = vor.u32 %v5908_v57, %v5033_v58  ;;  %v3089_v58 = vadd.f32 %v6837_v23, %v1732_v51  ;;  %v6044_v23 = vld [vmem:[#allocation13 + $0xd8] sm:$0xff] }
 0x39e   : > { %3432 = vmatpush.bf16.msrb.mxu3 %v5388_v22  ;;  %3407 = vmatpush.bf16.msrb.mxu1 %v4844_v32  ;;  %v5289_v60 = vld [vmem:[#allocation10 + $0x6b8] sm:$0xf0]  ;;  %v3168_v26 = vpop.f32.mrf.mxu2  ;;  %v6052_v51 = vld [vmem:[#allocation13 + $0x118] sm:$0xff] }
 0x39f   : > { %v5772_v2 = vld [vmem:[#allocation10 + $0x5c] sm:$0xf]  ;;  %v5292_v5 = vor.u32 %v5972_v59, %v5289_v60 }
 0x3a0   : > { %3420 = vmatpush.bf16.msrb.mxu2 %v5100_v35  ;;  %3395 = vmatpush.bf16.msrb.mxu0 %v4556_v45  ;;  %v4489_v3 = vld [vmem:[#allocation10 + $0x78] sm:$0xf0] }
 0x3a1   : > { %v5836_v4 = vld [vmem:[#allocation10 + $0x25c] sm:$0xf]  ;;  %v4492_v12 = vor.u32 %v5772_v2, %v4489_v3  ;;  %v6036_v2 = vld [vmem:[#allocation13 + $0x98] sm:$0xff]  ;;  %v3102_v3 = vadd.f32 %v6839_v31, %v3089_v58 }
 0x3a2   : > { %3433 = vmatpush.bf16.msrb.mxu3 %v5356_v37  ;;  %3408 = vmatpush.bf16.msrb.mxu1 %v4812_v46  ;;  %v4745_v6 = vld [vmem:[#allocation10 + $0x278] sm:$0xf0]  ;;  %v3181_v37 = vpop.f32.mrf.mxu3 }
 0x3a3   : > { %v5900_v40 = vld [vmem:[#allocation10 + $0x45c] sm:$0xf]  ;;  %v4748_v14 = vor.u32 %v5836_v4, %v4745_v6 }
 0x3a4   : > { %3421 = vmatpush.bf16.msrb.mxu2 %v5068_v47  ;;  %v5001_v7 = vld [vmem:[#allocation10 + $0x478] sm:$0xf0]  ;;  %3396 = vmatpush.bf16.msrb.mxu0 %v4524_v61  ;;  %v6022_v47 = vld [vmem:[#allocation13 + $0x28] sm:$0xff] }
 0x3a5   : > { %v5964_v10 = vld [vmem:[#allocation10 + $0x65c] sm:$0xf]  ;;  %v5004_v16 = vor.u32 %v5900_v40, %v5001_v7 }
 0x3a6   : > { %3434 = vmatpush.bf16.msrb.mxu3 %v5324_v55  ;;  %v5257_v11 = vld [vmem:[#allocation10 + $0x678] sm:$0xf0]  ;;  %3409 = vmatpush.bf16.msrb.mxu1 %v4780_v0  ;;  %v1733_v55 = vperm.slane %v6828_v53, 2  ;;  %v6020_v0 = vld [vmem:[#allocation13 + $0x18] sm:$0xff] }
 0x3a7   : > { %v5764_v19 = vld [vmem:[#allocation10 + $0x1c] sm:$0xf]  ;;  %v5260_v22 = vor.u32 %v5964_v10, %v5257_v11  ;;  %v3115_v11 = vadd.f32 %v6841_v52, %v3102_v3  ;;  %v6042_v52 = vld [vmem:[#allocation13 + $0xc8] sm:$0xff] }
 0x3a8   : > { %3422 = vmatpush.bf16.msrb.mxu2 %v5036_v1  ;;  %v4457_v17 = vld [vmem:[#allocation10 + $0x38] sm:$0xf0]  ;;  %3397 = vmatpush.bf16.msrb.mxu0 %v4492_v12  ;;  %v3141_v60 = vadd.f32 %v6849_v30, %v1733_v55  ;;  %v6028_v1 = vld [vmem:[#allocation13 + $0x58] sm:$0xff] }
 0x3a9   : > { %v5828_v21 = vld [vmem:[#allocation10 + $0x21c] sm:$0xf]  ;;  %v4460_v32 = vor.u32 %v5764_v19, %v4457_v17  ;;  %v6026_v19 = vld [vmem:[#allocation13 + $0x48] sm:$0xff] }
 0x3aa   : > { %3435 = vmatpush.bf16.msrb.mxu3 %v5292_v5  ;;  %v4713_v24 = vld [vmem:[#allocation10 + $0x238] sm:$0xf0]  ;;  %3410 = vmatpush.bf16.msrb.mxu1 %v4748_v14  ;;  %v3154_v5 = vadd.f32 %v6851_v42, %v3141_v60  ;;  %v6034_v17 = vld [vmem:[#allocation13 + $0x88] sm:$0xff] }
 0x3ab   : > { %v5892_v27 = vld [vmem:[#allocation10 + $0x41c] sm:$0xf]  ;;  %v4716_v35 = vor.u32 %v5828_v21, %v4713_v24  ;;  %v3128_v21 = vadd.f32 %v6843_v54, %v3115_v11 }
 0x3ac   : > { %v4969_v28 = vld [vmem:[#allocation10 + $0x438] sm:$0xf0]  ;;  %3423 = vmatpush.bf16.msrb.mxu2 %v5004_v16  ;;  %3398 = vmatpush.bf16.msrb.mxu0 %v4460_v32  ;;  %v3192_v57 = vpop.f32.mrf.mxu0  ;;  %v3167_v14 = vadd.f32 %v6853_v63, %v3154_v5  ;;  %v6018_v16 = vld [vmem:[#allocation13 + $0x8] sm:$0xff]  ;;  %v3443_v63 = vmax.f32 %v6835_v50, 0.0 }
 0x3ad   : > { %v5956_v29 = vld [vmem:[#allocation10 + $0x61c] sm:$0xf]  ;;  %v4972_v33 = vor.u32 %v5892_v27, %v4969_v28  ;;  %v6017_v28 = vld [vmem:[#allocation13] sm:$0xff]  ;;  %v3444_v32 = vmax.f32 %v3128_v21, 0.0 }
 0x3ae   : > { %v5225_v25 = vld [vmem:[#allocation10 + $0x638] sm:$0xf0]  ;;  %3436 = vmatpush.bf16.msrb.mxu3 %v5260_v22  ;;  %3411 = vmatpush.bf16.msrb.mxu1 %v4716_v35  ;;  %v3205_v59 = vpop.f32.mrf.mxu1  ;;  %v3180_v24 = vadd.f32 %v6855_v8, %v3167_v14  ;;  %v6056_v35 = vld [vmem:[#allocation13 + $0x138] sm:$0xff]  ;;  %v6041_v8 = vld [vmem:[#allocation13 + $0xc0] sm:$0xff] }
 0x3af   : > { %v5228_v34 = vor.u32 %v5956_v29, %v5225_v25  ;;  %v6023_v43 = vld [vmem:[#allocation13 + $0x30] sm:$0xff]  ;;  %3399 = vmatmul.bf16.vlgmr.msrb.gmra.mxu0 %v6802_v13  ;;  %v1734_v13 = vperm.slane %v6828_v53, 3  ;;  %v6025_v29 = vld [vmem:[#allocation13 + $0x40] sm:$0xff]  ;;  %v3452_v37 = vpack.c.bf16 %v3444_v32, %v3444_v32 }
 0x3b0   : > { %3424 = vmatpush.bf16.msrb.mxu2 %v4972_v33  ;;  %3975 = vmatpush.bf16.msra.mxu0 %v6024_v36  ;;  %v6031_v44 = vld [vmem:[#allocation13 + $0x70] sm:$0xff]  ;;  %v6033_v25 = vld [vmem:[#allocation13 + $0x80] sm:$0xff]  ;;  %v6064_v33 = vld [vmem:[#allocation13 + $0x178] sm:$0xff]  ;;  %v3451_v36 = vpack.c.bf16 %v3443_v63, %v3443_v63 }
 0x3b1   : > { %v6039_v45 = vld [vmem:[#allocation13 + $0xb0] sm:$0xff]  ;;  %3412 = vmatmul.bf16.vlgmr.msrb.gmra.mxu1 %v6806_v20  ;;  %v6046_v20 = vld [vmem:[#allocation13 + $0xe8] sm:$0xff]  ;;  %v3193_v61 = vadd.f32 %v3192_v57, %v1734_v13  ;;  %v6060_v13 = vld [vmem:[#allocation13 + $0x158] sm:$0xff] }
 0x3b2   : > { %3437 = vmatpush.bf16.msrb.mxu3 %v5228_v34  ;;  %3988 = vmatpush.bf16.msra.mxu1 %v6032_v38  ;;  %v6047_v46 = vld [vmem:[#allocation13 + $0xf0] sm:$0xff]  ;;  %v3445_v34 = vmax.f32 %v3180_v24, 0.0 }
 0x3b3   : > { %3425 = vmatmul.bf16.vlgmr.msrb.gmra.mxu2 %v6800_v15  ;;  %v6021_v15 = vld [vmem:[#allocation13 + $0x20] sm:$0xff]  ;;  %v3206_v6 = vadd.f32 %v3205_v59, %v3193_v61  ;;  %v6019_v40 = vld [vmem:[#allocation13 + $0x10] sm:$0xff]  ;;  %v6072_v61 = vld [vmem:[#allocation13 + $0x1b8] sm:$0xff] }
 0x3b4   : > { %4001 = vmatpush.bf16.msra.mxu2 %v6040_v39  ;;  %3976 = vmatpush.bf16.msra.mxu0 %v6023_v43  ;;  %v6027_v30 = vld [vmem:[#allocation13 + $0x50] sm:$0xff]  ;;  %v3194_v10 = vpop.f32.mrf.mxu0  ;;  %v3453_v39 = vpack.c.bf16 %v3445_v34, %v3445_v34  ;;  %v6054_v43 = vld [vmem:[#allocation13 + $0x128] sm:$0xff]  ;;  %v1737_v34 = vperm.slane %v6828_v53, 6 }
 0x3b5   : > { %3438 = vmatmul.bf16.vlgmr.msrb.gmra.mxu3 %v6804_v18  ;;  %v6029_v18 = vld [vmem:[#allocation13 + $0x60] sm:$0xff]  ;;  %v6035_v7 = vld [vmem:[#allocation13 + $0x90] sm:$0xff]  ;;  %v1736_v10 = vperm.slane %v6828_v53, 5 }
 0x3b6   : > { %4014 = vmatpush.bf16.msra.mxu3 %v6048_v41  ;;  %3989 = vmatpush.bf16.msra.mxu1 %v6031_v44  ;;  %v3218_v4 = vpop.f32.mrf.mxu2  ;;  %v3207_v12 = vpop.f32.mrf.mxu1  ;;  %v6043_v42 = vld [vmem:[#allocation13 + $0xd0] sm:$0xff]  ;;  %v6062_v44 = vld [vmem:[#allocation13 + $0x168] sm:$0xff] }
 0x3b7   : > { %v3219_v31 = vadd.f32 %v3218_v4, %v3206_v6  ;;  %v6055_v38 = vld [vmem:[#allocation13 + $0x130] sm:$0xff]  ;;  %v6049_v6 = vld [vmem:[#allocation13 + $0x100] sm:$0xff] }
 0x3b8   : > { %4002 = vmatpush.bf16.msra.mxu2 %v6039_v45  ;;  %3977 = vmatpush.bf16.msra.mxu0 %v6022_v47  ;;  %v3231_v9 = vpop.f32.mrf.mxu3  ;;  %v6063_v50 = vld [vmem:[#allocation13 + $0x170] sm:$0xff]  ;;  %v1735_v45 = vperm.slane %v6828_v53, 4 }
 0x3b9   : > { %v3232_v27 = vadd.f32 %v3231_v9, %v3219_v31  ;;  %v6051_v57 = vld [vmem:[#allocation13 + $0x110] sm:$0xff]  ;;  %v6068_v9 = vld [vmem:[#allocation13 + $0x198] sm:$0xff] }
 0x3ba   : > { %4015 = vmatpush.bf16.msra.mxu3 %v6047_v46  ;;  %3990 = vmatpush.bf16.msra.mxu1 %v6030_v48  ;;  %v6053_v46 = vld [vmem:[#allocation13 + $0x120] sm:$0xff]  ;;  %v6059_v59 = vld [vmem:[#allocation13 + $0x150] sm:$0xff] }
 0x3bb   : > { %v3446_v54 = vmax.f32 %v3232_v27, 0.0  ;;  %v6061_v48 = vld [vmem:[#allocation13 + $0x160] sm:$0xff]  ;;  %v6067_v31 = vld [vmem:[#allocation13 + $0x190] sm:$0xff] }
 0x3bc   : > { %4003 = vmatpush.bf16.msra.mxu2 %v6038_v49  ;;  %3978 = vmatpush.bf16.msra.mxu0 %v6021_v15 }
 0x3bd   : > { %v3454_v41 = vpack.c.bf16 %v3446_v54, %v3446_v54  ;;  %v6076_v54 = vld [vmem:[#allocation13 + $0x1d8] sm:$0xff] }
 0x3be   : > { %4016 = vmatpush.bf16.msra.mxu3 %v6046_v20  ;;  %3991 = vmatpush.bf16.msra.mxu1 %v6029_v18  ;;  %v3220_v22 = vpop.f32.mrf.mxu2 }
 0x3c0   : > { %4004 = vmatpush.bf16.msra.mxu2 %v6037_v56  ;;  %3979 = vmatpush.bf16.msra.mxu0 %v6020_v0  ;;  %v3233_v26 = vpop.f32.mrf.mxu3 }
 0x3c2   : > { %4017 = vmatpush.bf16.msra.mxu3 %v6045_v62  ;;  %3992 = vmatpush.bf16.msra.mxu1 %v6028_v1  ;;  %v6050_v62 = vld [vmem:[#allocation13 + $0x108] sm:$0xff] }
 0x3c3   : > { %v6058_v1 = vld [vmem:[#allocation13 + $0x148] sm:$0xff] }
 0x3c4   : > { %4005 = vmatpush.bf16.msra.mxu2 %v6036_v2  ;;  %3980 = vmatpush.bf16.msra.mxu0 %v6019_v40  ;;  %v6071_v2 = vld [vmem:[#allocation13 + $0x1b0] sm:$0xff]  ;;  %v6070_v40 = vld [vmem:[#allocation13 + $0x1a8] sm:$0xff] }
 0x3c6   : > { %4018 = vmatpush.bf16.msra.mxu3 %v6044_v23  ;;  %3993 = vmatpush.bf16.msra.mxu1 %v6027_v30  ;;  %v6057_v23 = vld [vmem:[#allocation13 + $0x140] sm:$0xff] }
 0x3c8   : > { %4006 = vmatpush.bf16.msra.mxu2 %v6035_v7  ;;  %3981 = vmatpush.bf16.msra.mxu0 %v6018_v16  ;;  %v6069_v7 = vld [vmem:[#allocation13 + $0x1a0] sm:$0xff] }
 0x3ca   : > { %4019 = vmatpush.bf16.msra.mxu3 %v6043_v42  ;;  %3994 = vmatpush.bf16.msra.mxu1 %v6026_v19 }
 0x3cc   : > { %4007 = vmatpush.bf16.msra.mxu2 %v6034_v17  ;;  %3982 = vmatpush.bf16.msra.mxu0 %v6017_v28  ;;  %v3244_v47 = vpop.f32.mrf.mxu0  ;;  %v6066_v17 = vld [vmem:[#allocation13 + $0x188] sm:$0xff]  ;;  %v6080_v28 = vld [vmem:[#allocation13 + $0x1f8] sm:$0xff] }
 0x3cd   : > { %v3245_v49 = vadd.f32 %v3244_v47, %v1735_v45 }
 0x3ce   : > { %4020 = vmatpush.bf16.msra.mxu3 %v6042_v52  ;;  %3995 = vmatpush.bf16.msra.mxu1 %v6025_v29  ;;  %v3257_v55 = vpop.f32.mrf.mxu1  ;;  %v6065_v52 = vld [vmem:[#allocation13 + $0x180] sm:$0xff]  ;;  %v6079_v29 = vld [vmem:[#allocation13 + $0x1f0] sm:$0xff] }
 0x3cf   : > { %3983 = vmatmul.bf16.vlgmr.msra.gmra.mxu0 %v3451_v36  ;;  %v3258_v20 = vadd.f32 %v3257_v55, %v3245_v49  ;;  %v6075_v36 = vld [vmem:[#allocation13 + $0x1d0] sm:$0xff] }
 0x3d0   : > { %4008 = vmatpush.bf16.msra.mxu2 %v6033_v25  ;;  %4027 = vmatpush.bf16.msrb.mxu0 %v6056_v35  ;;  %v6078_v35 = vld [vmem:[#allocation13 + $0x1e8] sm:$0xff] }
 0x3d1   : > { %3996 = vmatmul.bf16.vlgmr.msra.gmra.mxu1 %v3452_v37 }
 0x3d2   : > { %4040 = vmatpush.bf16.msrb.mxu1 %v6064_v33  ;;  %4021 = vmatpush.bf16.msra.mxu3 %v6041_v8  ;;  %v6077_v33 = vld [vmem:[#allocation13 + $0x1e0] sm:$0xff] }
 0x3d3   : > { %4009 = vmatmul.bf16.vlgmr.msra.gmra.mxu2 %v3453_v39 }
 0x3d4   : > { %4028 = vmatpush.bf16.msrb.mxu0 %v6055_v38  ;;  %v3246_v58 = vpop.f32.mrf.mxu0  ;;  %4053 = vmatpush.bf16.msrb.mxu2 %v6072_v61 }
 0x3d5   : > { %4022 = vmatmul.bf16.vlgmr.msra.gmra.mxu3 %v3454_v41  ;;  %v6074_v41 = vld [vmem:[#allocation13 + $0x1c8] sm:$0xff] }
 0x3d6   : > { %4041 = vmatpush.bf16.msrb.mxu1 %v6063_v50  ;;  %v3270_v15 = vpop.f32.mrf.mxu2  ;;  %v3259_v0 = vpop.f32.mrf.mxu1  ;;  %4066 = vmatpush.bf16.msrb.mxu3 %v6080_v28 }
 0x3d7   : > { %v3271_v18 = vadd.f32 %v3270_v15, %v3258_v20  ;;  %v1738_v20 = vperm.slane %v6828_v53, 7 }
 0x3d8   : > { %4029 = vmatpush.bf16.msrb.mxu0 %v6054_v43  ;;  %v3283_v56 = vpop.f32.mrf.mxu3  ;;  %4054 = vmatpush.bf16.msrb.mxu2 %v6071_v2 }
 0x3d9   : > { %v3284_v60 = vadd.f32 %v3283_v56, %v3271_v18 }
 0x3da   : > { %4042 = vmatpush.bf16.msrb.mxu1 %v6062_v44  ;;  %4067 = vmatpush.bf16.msrb.mxu3 %v6079_v29 }
 0x3db   : > { %v3447_v4 = vmax.f32 %v3284_v60, 0.0 }
 0x3dc   : > { %4030 = vmatpush.bf16.msrb.mxu0 %v6053_v46  ;;  %4055 = vmatpush.bf16.msrb.mxu2 %v6070_v40 }
 0x3dd   : > { %v3455_v30 = vpack.c.bf16 %v3447_v4, %v3447_v4 }
 0x3de   : > { %4043 = vmatpush.bf16.msrb.mxu1 %v6061_v48  ;;  %v3272_v3 = vpop.f32.mrf.mxu2  ;;  %4068 = vmatpush.bf16.msrb.mxu3 %v6078_v35  ;;  %v6073_v48 = vld [vmem:[#allocation13 + $0x1c0] sm:$0xff] }
 0x3e0   : > { %4031 = vmatpush.bf16.msrb.mxu0 %v6052_v51  ;;  %v3285_v5 = vpop.f32.mrf.mxu3  ;;  %4056 = vmatpush.bf16.msrb.mxu2 %v6069_v7 }
 0x3e1   : > { %v6297_v5 = vld [vmem:[%s6909_s6] ss:$0 sm:$0xff] }
 0x3e2   : > { %4044 = vmatpush.bf16.msrb.mxu1 %v6060_v13  ;;  %4069 = vmatpush.bf16.msrb.mxu3 %v6077_v33 }
 0x3e4   : > { %4032 = vmatpush.bf16.msrb.mxu0 %v6051_v57  ;;  %4057 = vmatpush.bf16.msrb.mxu2 %v6068_v9 }
 0x3e6   : > { %4045 = vmatpush.bf16.msrb.mxu1 %v6059_v59  ;;  %4070 = vmatpush.bf16.msrb.mxu3 %v6076_v54 }
 0x3e8   : > { %4033 = vmatpush.bf16.msrb.mxu0 %v6050_v62  ;;  %4058 = vmatpush.bf16.msrb.mxu2 %v6067_v31 }
 0x3ea   : > { %4046 = vmatpush.bf16.msrb.mxu1 %v6058_v1  ;;  %4071 = vmatpush.bf16.msrb.mxu3 %v6075_v36 }
 0x3ec   : > { %4034 = vmatpush.bf16.msrb.mxu0 %v6049_v6  ;;  %v3296_v11 = vpop.f32.mrf.mxu0  ;;  %4059 = vmatpush.bf16.msrb.mxu2 %v6066_v17 }
 0x3ed   : > { %v3297_v12 = vadd.f32 %v3296_v11, %v1736_v10 }
 0x3ee   : > { %4047 = vmatpush.bf16.msrb.mxu1 %v6057_v23  ;;  %v3309_v14 = vpop.f32.mrf.mxu1  ;;  %4072 = vmatpush.bf16.msrb.mxu3 %v6074_v41 }
 0x3ef   : > { %4035 = vmatmul.bf16.vlgmr.msrb.gmra.mxu0 %v3455_v30  ;;  %v3310_v42 = vadd.f32 %v3309_v14, %v3297_v12 }
 0x3f0   : > { %4060 = vmatpush.bf16.msrb.mxu2 %v6065_v52 }
 0x3f2   : > { %4073 = vmatpush.bf16.msrb.mxu3 %v6073_v48 }
 0x3f4   : > { %v3298_v22 = vpop.f32.mrf.mxu0 }
 0x3f6   : > { %v3322_v16 = vpop.f32.mrf.mxu2  ;;  %v3311_v27 = vpop.f32.mrf.mxu1 }
 0x3f7   : > { %v3323_v21 = vadd.f32 %v3322_v16, %v3310_v42 }
 0x3f8   : > { %v3335_v19 = vpop.f32.mrf.mxu3 }
 0x3f9   : > { %v3336_v24 = vadd.f32 %v3335_v19, %v3323_v21 }
 0x3fb   : > { %v3448_v63 = vmax.f32 %v3336_v24, 0.0 }
 0x3fd   : > { %v3456_v25 = vpack.c.bf16 %v3448_v63, %v3448_v63 }
 0x3fe   : > { %v3324_v26 = vpop.f32.mrf.mxu2 }
 0x3ff   : > { %4048 = vmatmul.bf16.vlgmr.msrb.gmra.mxu1 %v3456_v25 }
 0x400   : > { %v3337_v32 = vpop.f32.mrf.mxu3 }
 0x40c   : > { %v3348_v8 = vpop.f32.mrf.mxu0 }
 0x40d   : > { %v3349_v37 = vadd.f32 %v3348_v8, %v1737_v34 }
 0x40e   : > { %v3361_v38 = vpop.f32.mrf.mxu1 }
 0x40f   : > { %v3362_v50 = vadd.f32 %v3361_v38, %v3349_v37 }
 0x414   : > { %v3350_v46 = vpop.f32.mrf.mxu0 }
 0x416   : > { %v3374_v39 = vpop.f32.mrf.mxu2  ;;  %v3363_v47 = vpop.f32.mrf.mxu1 }
 0x417   : > { %v3375_v43 = vadd.f32 %v3374_v39, %v3362_v50 }
 0x418   : > { %v3387_v44 = vpop.f32.mrf.mxu3 }
 0x419   : > { %v3388_v45 = vadd.f32 %v3387_v44, %v3375_v43 }
 0x41b   : > { %v3449_v49 = vmax.f32 %v3388_v45, 0.0 }
 0x41d   : > { %v3457_v51 = vpack.c.bf16 %v3449_v49, %v3449_v49 }
 0x41e   : > { %v3376_v55 = vpop.f32.mrf.mxu2 }
 0x41f   : > { %4061 = vmatmul.bf16.vlgmr.msrb.gmra.mxu2 %v3457_v51 }
 0x420   : > { %v3389_v13 = vpop.f32.mrf.mxu3 }
 0x42c   : > { %v3400_v15 = vpop.f32.mrf.mxu0 }
 0x42d   : > { %v3401_v56 = vadd.f32 %v3400_v15, %v1738_v20 }
 0x42e   : > { %v3413_v18 = vpop.f32.mrf.mxu1 }
 0x42f   : > { %v3414_v57 = vadd.f32 %v3413_v18, %v3401_v56 }
 0x434   : > { %v3402_v61 = vpop.f32.mrf.mxu0 }
 0x436   : > { %v3426_v58 = vpop.f32.mrf.mxu2  ;;  %v3415_v62 = vpop.f32.mrf.mxu1 }
 0x437   : > { %v3427_v60 = vadd.f32 %v3426_v58, %v3414_v57 }
 0x438   : > { %v3439_v59 = vpop.f32.mrf.mxu3 }
 0x439   : > { %v3440_v0 = vadd.f32 %v3439_v59, %v3427_v60 }
 0x43b   : > { %v3450_v1 = vmax.f32 %v3440_v0, 0.0 }
 0x43d   : > { %v3458_v2 = vpack.c.bf16 %v3450_v1, %v3450_v1 }
 0x43e   : > { %v3428_v3 = vpop.f32.mrf.mxu2 }
 0x43f   : > { %4074 = vmatmul.bf16.vlgmr.msrb.gmra.mxu3 %v3458_v2 }
 0x440   : > { %v3441_v4 = vpop.f32.mrf.mxu3 }
 0x44c   : > { %v3984_v53 = vpop.f32.mrf.mxu0 }
 0x44d   : > { %v3985_v6 = vadd.f32 %v6297_v5, %v3984_v53 }
 0x44e   : > { %v3997_v23 = vpop.f32.mrf.mxu1 }
 0x44f   : > { %v3998_v40 = vadd.f32 %v3997_v23, %v3985_v6 }
 0x454   : > { %v3986_v7 = vpop.f32.mrf.mxu0 }
 0x456   : > { %v4010_v30 = vpop.f32.mrf.mxu2  ;;  %v3999_v10 = vpop.f32.mrf.mxu1 }
 0x457   : > { %v4011_v9 = vadd.f32 %v4010_v30, %v3998_v40 }
 0x458   : > { %v4023_v11 = vpop.f32.mrf.mxu3 }
 0x459   : > { %v4024_v12 = vadd.f32 %v4023_v11, %v4011_v9 }
 0x45e   : > { %v4012_v14 = vpop.f32.mrf.mxu2 }
 0x460   : > { %v4025_v31 = vpop.f32.mrf.mxu3 }
 0x46c   : > { %v4036_v42 = vpop.f32.mrf.mxu0 }
 0x46d   : > { %v4037_v16 = vadd.f32 %v4036_v42, %v4024_v12 }
 0x474   : > { %v4038_v19 = vpop.f32.mrf.mxu0 }
 0x47c   : > { %v4049_v17 = vpop.f32.mrf.mxu1 }
 0x47d   : > { %v4050_v27 = vadd.f32 %v4049_v17, %v4037_v16 }
 0x484   : > { %v4051_v21 = vpop.f32.mrf.mxu1 }
 0x4a2   : > { %v4062_v22 = vpop.f32.mrf.mxu2 }
 0x4a3   : > { %v4063_v52 = vadd.f32 %v4062_v22, %v4050_v27 }
 0x4aa   : > { %v4064_v24 = vpop.f32.mrf.mxu2 }
 0x4c2   : > { %v4075_v28 = vpop.f32.mrf.mxu3 }
 0x4c3   : > { %v4076_v63 = vadd.f32 %v4075_v28, %v4063_v52 }
 0x4c5   : > { %4079 = vst [vmem:[#allocation15] sm:$0x3] %v4076_v63 }
 0x4ca   : > { %v4077_v29 = vpop.f32.mrf.mxu3 }
 0x4cb PF: > { %s6920_s9 = sadd.s32 4294967295, %s6572_s29   ;;  %s4090_s14 = sshll.u32 %s6910_s7, 4  ;;  %s4091_s14 = int_to_ptr.hbm [resolvable:$true] %s4090_s14 }
 0x4cc   : > { %p6232_p3 = scmp.eq.s32.totalorder %s6920_s9, 1  ;;  %s6588_s12 = smov [#allocation15]  }
 0x4cd   : > { %s4088_s16 = sshll.u32 %s6588_s12, 4  ;;  %s4089_s16 = int_to_ptr.vmem [resolvable:$true] %s4088_s16 }
 0x4ce   : > { %6198 = dma.vmem_to_hbm [thread:$0]  (%p6232_p3), %s4089_s16, 32, %s4091_s14, [#allocation6]  }
 0x4cf   : > { %6547 = dma.done.wait (%p6232_p3), [#allocation6], 32  }
 0x4d0   : > { %6549 = vsyncadd (%p6232_p3), [#allocation6], 4294967264 }
 0x4d1 PF: > { %s24_s29 = sadd.s32 1, %s6572_s29   ;;  %s6921_s24 = smov %s6556_s25 }
 0x4d2   : > { %p21_p4 = scmp.ge.s32.totalorder %s24_s29, 4   ;;  %s6922_s25 = smov %s6560_s26 }
 0x4d3   : > { %s6923_s26 = smov %s6725_s19  ;;  %s6924_s27 = smov %s6568_s28 }
 0x4d4   : > { %s6925_s28 = smov %s6927_s11  ;;  %23 = sbr.rel (!%p21_p4) target bundleno = 11 (0xb), region = 116 }
 0x4d9   :  { %4104 = vsyncpa [#allocation5], 1 }
 0x4da   :  { %4106 = vsyncpa [#allocation5 + $0x1], 1 }
 0x4db   :  { %4107 = vsyncpa [#allocation8], 1 }
 0x4dc   :  { %4108 = vsyncpa [#allocation11], 1 }
 0x4dd   :  { %4109 = vsyncpa [#allocation14], 1 }
 0x4de   :  { %4110 = vsyncpa [#allocation6], 1 }
 0x4df   :  { %4112 = vsyncpa [#allocation6 + $0x1], 1 }

</bundles_post_ra>
